<compile_context>
chip_gen: v5e
topology: v5e:2x2
jax: 0.10.0
libtpu: 0.0.40
codegen_flags: <defaults>
</compile_context>

<pallas_src>
import functools

import jax
import jax.numpy as jnp
from jax.experimental import pallas as pl
from jax.experimental.pallas import tpu as pltpu

BN_EPS = 1e-5
LANE = 128


# ---------------------------------------------------------------------------
# In-kernel helpers
# ---------------------------------------------------------------------------
def _build_shifted(dst_ref, img, H, W):
    """dst_ref: (3, H+2, W, C) scratch.  dst[dx, r, w, :] = img[r-1, w+dx-1, :]
    (zero outside).  Only the halo rows/cols are zeroed; the interior is fully
    overwritten every step."""
    C = dst_ref.shape[-1]
    dt = img.dtype
    zrow = jnp.zeros((3, 1, W, C), dt)
    dst_ref[:, 0:1, :, :] = zrow                       # top halo row
    dst_ref[:, H + 1:H + 2, :, :] = zrow               # bottom halo row
    zcol = jnp.zeros((1, H + 2, 1, C), dt)
    dst_ref[0:1, :, 0:1, :] = zcol                     # left halo col (dx=0)
    dst_ref[2:3, :, W - 1:W, :] = zcol                 # right halo col (dx=2)
    dst_ref[1, 1:H + 1, :, :] = img                    # aligned copy
    dst_ref[0, 1:H + 1, 1:W, :] = img[:, :W - 1, :]    # 1-sublane shift (XLU)
    dst_ref[2, 1:H + 1, 0:W - 1, :] = img[:, 1:, :]    # 1-sublane shift (XLU)


def _fill_patch(patch_ref, src_ref, H, W, C):
    """patch[:, t*C:(t+1)*C] = src[dx, dy:dy+H] for tap t = dy*3+dx.
    dy slices the leading (untiled) dim of src_ref; column offsets are
    128-lane aligned -> unmasked stores."""
    M = H * W
    for t in range(9):
        dy, dx = divmod(t, 3)
        patch_ref[:, t * C:(t + 1) * C] = (
            src_ref[dx, dy:dy + H, :, :].reshape(M, C))


# ---------------------------------------------------------------------------
# Fused BasicBlock kernel (one batch image per grid step, stride 1, padding 1)
# ---------------------------------------------------------------------------
def _basic_block_kernel(x_ref, w1_ref, sh1_ref, w2_ref, sh2_ref, *rest,
                        H, W, has_proj):
    if has_proj:
        wr_ref, shr_ref, o_ref, xs_ref, os_ref, patch_ref = rest
    else:
        o_ref, xs_ref, os_ref, patch_ref = rest

    cdt = w1_ref.dtype                 # MXU operand dtype (bf16 or f32)
    Cpi = xs_ref.shape[-1]             # padded in-channels
    Cpo = os_ref.shape[-1]             # padded out-channels
    M = H * W

    x_f32 = x_ref[0]                   # (H, W, Cpi) float32
    x_c = x_f32.astype(cdt)

    # ---- conv1 (3x3, stride 1, pad 1); BN1 scale pre-folded into w1 --------
    _build_shifted(xs_ref, x_c, H, W)
    _fill_patch(patch_ref, xs_ref, H, W, Cpi)
    out1 = jnp.dot(patch_ref[:, :9 * Cpi], w1_ref[...],
                   preferred_element_type=jnp.float32)
    out1 = jnp.maximum(out1 + sh1_ref[...], 0.0)       # (M, Cpo) f32

    # ---- conv2 (3x3, stride 1, pad 1); BN2 scale pre-folded into w2 --------
    _build_shifted(os_ref, out1.reshape(H, W, Cpo).astype(cdt), H, W)
    _fill_patch(patch_ref, os_ref, H, W, Cpo)
    y = jnp.dot(patch_ref[:, :9 * Cpo], w2_ref[...],
                preferred_element_type=jnp.float32) + sh2_ref[...]

    # ---- residual add (f32) + final ReLU ------------------------------------
    if has_proj:
        res = jnp.dot(x_c.reshape(M, Cpi), wr_ref[...],
                      preferred_element_type=jnp.float32) + shr_ref[...]
    else:
        res = x_f32.reshape(M, Cpi)    # Cpi == Cpo for the identity residual
    y = jnp.maximum(y + res, 0.0)
    o_ref[0] = y.reshape(H, W, Cpo).astype(o_ref.dtype)


# ---------------------------------------------------------------------------
# Wrapper: BN folding, channel padding, pallas_call
# ---------------------------------------------------------------------------
def _round_up(v, m):
    return (v + m - 1) // m * m


def _fold_bn_into_conv(w_oihw, bias, gamma, beta, mean, var):
    """Fold eval-mode BN (running stats) + conv bias into (9, Cin, Cout)
    weights and a per-channel shift."""
    cout, cin = w_oihw.shape[0], w_oihw.shape[1]
    scale = gamma / jnp.sqrt(var + BN_EPS)                     # (Cout,)
    shift = beta + (bias - mean) * scale                       # (Cout,)
    wm = jnp.transpose(w_oihw, (2, 3, 1, 0)).reshape(9, cin, cout)
    return wm * scale[None, None, :], shift


def basic_block_forward(x_nchw, params, *, padding=1, first_stride=1,
                        residual_conv_params=None,
                        mxu_dtype=jnp.bfloat16, out_dtype=None):
    """Forward pass of BasicBlock.  x_nchw: (N, Cin, H, W) float32."""
    if first_stride != 1 or padding != 1:
        # TODO(synk): strided conv1 / non-unit padding (ResNet downsample
        # blocks) needs strided tap slicing; not implemented in this kernel.
        raise NotImplementedError("fused kernel supports stride=1, padding=1")

    N, Cin, H, W = x_nchw.shape
    Cout = params["w1"].shape[0]
    if residual_conv_params is None and Cin != Cout:
        raise ValueError("identity residual requires in_channels == out_channels")
    if out_dtype is None:
        out_dtype = jnp.bfloat16 if mxu_dtype == jnp.bfloat16 else jnp.float32

    # Lane-dense channel padding (128 lanes).
    # TODO(synk): on v6e/v7x with C > 128, pad to 256 to match the 2x256^2 MXU.
    Cpi = _round_up(Cin, LANE)
    Cpo = _round_up(Cout, LANE)

    w1m, sh1 = _fold_bn_into_conv(params["w1"], params["b1"], params["g1"],
                                  params["be1"], params["m1"], params["v1"])
    w2m, sh2 = _fold_bn_into_conv(params["w2"], params["b2"], params["g2"],
                                  params["be2"], params["m2"], params["v2"])
    w1p = jnp.pad(w1m, ((0, 0), (0, Cpi - Cin), (0, Cpo - Cout)))
    w2p = jnp.pad(w2m, ((0, 0), (0, Cpo - Cout), (0, Cpo - Cout)))
    w1p = w1p.reshape(9 * Cpi, Cpo).astype(mxu_dtype)
    w2p = w2p.reshape(9 * Cpo, Cpo).astype(mxu_dtype)
    sh1p = jnp.pad(sh1, (0, Cpo - Cout))[None, :].astype(jnp.float32)
    sh2p = jnp.pad(sh2, (0, Cpo - Cout))[None, :].astype(jnp.float32)

    # x stays f32 so the identity residual is added in full precision; the
    # kernel casts only the matmul LHS to mxu_dtype.
    x_nhwc = jnp.transpose(x_nchw, (0, 2, 3, 1)).astype(jnp.float32)
    x_nhwc = jnp.pad(x_nhwc, ((0, 0), (0, 0), (0, 0), (0, Cpi - Cin)))

    inputs = [x_nhwc, w1p, sh1p, w2p, sh2p]
    in_specs = [
        pl.BlockSpec((1, H, W, Cpi), lambda n: (n, 0, 0, 0)),
        pl.BlockSpec((9 * Cpi, Cpo), lambda n: (0, 0)),
        pl.BlockSpec((1, Cpo), lambda n: (0, 0)),
        pl.BlockSpec((9 * Cpo, Cpo), lambda n: (0, 0)),
        pl.BlockSpec((1, Cpo), lambda n: (0, 0)),
    ]

    has_proj = residual_conv_params is not None
    if has_proj:
        # Projection residual: 1x1 conv (stride 1) with optional BatchNorm.
        rp = residual_conv_params
        wr = rp["w"]                                        # (Cout, Cin, 1, 1)
        br = rp.get("b", jnp.zeros((Cout,), jnp.float32))
        if "g" in rp:                                       # Conv2d + BatchNorm2d
            scale_r = rp["g"] / jnp.sqrt(rp["v"] + BN_EPS)
            shift_r = rp["be"] + (br - rp["m"]) * scale_r
        else:                                               # plain Conv2d
            scale_r = jnp.ones((Cout,), jnp.float32)
            shift_r = br
        wrm = (jnp.transpose(wr, (2, 3, 1, 0)).reshape(Cin, Cout)
               * scale_r[None, :])
        wrp = jnp.pad(wrm, ((0, Cpi - Cin), (0, Cpo - Cout))).astype(mxu_dtype)
        shrp = jnp.pad(shift_r, (0, Cpo - Cout))[None, :].astype(jnp.float32)
        inputs += [wrp, shrp]
        in_specs += [pl.BlockSpec((Cpi, Cpo), lambda n: (0, 0)),
                     pl.BlockSpec((1, Cpo), lambda n: (0, 0))]

    kernel = functools.partial(_basic_block_kernel, H=H, W=W, has_proj=has_proj)
    out = pl.pallas_call(
        kernel,
        out_shape=jax.ShapeDtypeStruct((N, H, W, Cpo), out_dtype),
        grid_spec=pltpu.PrefetchScalarGridSpec(
            num_scalar_prefetch=0,
            grid=(N,),
            in_specs=in_specs,
            out_specs=pl.BlockSpec((1, H, W, Cpo), lambda n: (n, 0, 0, 0)),
            scratch_shapes=[
                pltpu.VMEM((3, H + 2, W, Cpi), mxu_dtype),          # dx-shifted x
                pltpu.VMEM((3, H + 2, W, Cpo), mxu_dtype),          # dx-shifted out1
                pltpu.VMEM((H * W, 9 * max(Cpi, Cpo)), mxu_dtype),  # patch matrix
            ],
        ),
        compiler_params=pltpu.CompilerParams(
            dimension_semantics=("parallel",),
            vmem_limit_bytes=32 * 1024 * 1024),
    )(*inputs)
    out = out[..., :Cout]                                   # drop channel padding
    return jnp.transpose(out, (0, 3, 1, 2))                 # back to NCHW


# ---------------------------------------------------------------------------
# Plain-JAX reference (eval-mode BN, identity residual) for verification
# ---------------------------------------------------------------------------
def _ref_forward(x, params, *, padding=1, first_stride=1):
    def conv(x, w, b, s, p):
        y = jax.lax.conv_general_dilated(
            x, w, (s, s), [(p, p), (p, p)],
            dimension_numbers=("NCHW", "OIHW", "NCHW"))
        return y + b[None, :, None, None]

    def bn(x, g, be, m, v):
        return ((x - m[None, :, None, None]) /
                jnp.sqrt(v[None, :, None, None] + BN_EPS)
                * g[None, :, None, None] + be[None, :, None, None])

    out = jax.nn.relu(bn(conv(x, params["w1"], params["b1"], first_stride,
                              padding),
                         params["g1"], params["be1"], params["m1"],
                         params["v1"]))
    out = bn(conv(out, params["w2"], params["b2"], 1, padding),
             params["g2"], params["be2"], params["m2"], params["v2"])
    out = out + x
    return jax.nn.relu(out)


# ---------------------------------------------------------------------------
if __name__ == "__main__":
    # Identity-residual configuration: in_channels == out_channels, stride 1.
    N, C, H, W = 2, 8, 16, 16

    key = jax.random.PRNGKey(0)
    keys = jax.random.split(key, 16)
    params = {
        "w1": 0.1 * jax.random.normal(keys[0], (C, C, 3, 3), jnp.float32),
        "b1": 0.1 * jax.random.normal(keys[1], (C,), jnp.float32),
        "g1": 1.0 + 0.1 * jax.random.normal(keys[2], (C,), jnp.float32),
        "be1": 0.1 * jax.random.normal(keys[3], (C,), jnp.float32),
        "m1": 0.1 * jax.random.normal(keys[4], (C,), jnp.float32),
        "v1": 0.5 + jnp.abs(jax.random.normal(keys[5], (C,), jnp.float32)),
        "w2": 0.1 * jax.random.normal(keys[6], (C, C, 3, 3), jnp.float32),
        "b2": 0.1 * jax.random.normal(keys[7], (C,), jnp.float32),
        "g2": 1.0 + 0.1 * jax.random.normal(keys[8], (C,), jnp.float32),
        "be2": 0.1 * jax.random.normal(keys[9], (C,), jnp.float32),
        "m2": 0.1 * jax.random.normal(keys[10], (C,), jnp.float32),
        "v2": 0.5 + jnp.abs(jax.random.normal(keys[11], (C,), jnp.float32)),
    }
    x = jax.random.normal(keys[12], (N, C, H, W), jnp.float32)

    # TODO(synk): train-mode BatchNorm (batch statistics) is not implemented;
    # this reproduces eval-mode BN with running stats folded into the weights.
    ref = jax.block_until_ready(_ref_forward(x, params))

    # Strict semantic check: f32 MXU operands / f32 output vs. f32 reference.
    out_f32 = jax.block_until_ready(
        basic_block_forward(x, params, mxu_dtype=jnp.float32))
    assert out_f32.shape == ref.shape == (N, C, H, W)
    max_err_f32 = float(jnp.max(jnp.abs(out_f32 - ref)))
    assert jnp.allclose(out_f32, ref, atol=1e-3, rtol=1e-3), max_err_f32

    # Fast path: bf16 MXU operands, f32 accumulation, f32 residual add,
    # bf16 output — loose sanity bound vs. the f32 reference.
    out_bf16 = jax.block_until_ready(basic_block_forward(x, params))
    max_err_bf16 = float(jnp.max(jnp.abs(out_bf16.astype(jnp.float32) - ref)))
    assert max_err_bf16 < 0.25, max_err_bf16

    print("KERNEL_OK")
</pallas_src>

<mosaic_0001>
module attributes {stable_mosaic.version = 11 : i64} {
  func.func @_basic_block_kernel(%arg0: i32, %arg1: memref<1x16x16x128xf32, #tpu.memory_space<vmem>>, %arg2: memref<1152x128xf32, #tpu.memory_space<vmem>>, %arg3: memref<1x128xf32, #tpu.memory_space<vmem>>, %arg4: memref<1152x128xf32, #tpu.memory_space<vmem>>, %arg5: memref<1x128xf32, #tpu.memory_space<vmem>>, %arg6: memref<1x16x16x128xf32, #tpu.memory_space<vmem>>, %arg7: memref<3x18x16x128xf32, #tpu.memory_space<vmem>>, %arg8: memref<3x18x16x128xf32, #tpu.memory_space<vmem>>, %arg9: memref<256x1152xf32, #tpu.memory_space<vmem>>) attributes {dimension_semantics = [#tpu.dimension_semantics<parallel>], iteration_bounds = array<i64: 2>, scalar_prefetch = 0 : i64, scratch_operands = 3 : i64, tpu.core_type = #tpu.core_type<tc>, window_params = [{transform_indices = @transform_0, window_bounds = array<i64: 1, 16, 16, 128>}, {pipeline_mode = #tpu.pipeline_mode<synchronous>, transform_indices = @transform_1, window_bounds = array<i64: 1152, 128>}, {pipeline_mode = #tpu.pipeline_mode<synchronous>, transform_indices = @transform_2, window_bounds = array<i64: 1, 128>}, {pipeline_mode = #tpu.pipeline_mode<synchronous>, transform_indices = @transform_3, window_bounds = array<i64: 1152, 128>}, {pipeline_mode = #tpu.pipeline_mode<synchronous>, transform_indices = @transform_4, window_bounds = array<i64: 1, 128>}, {transform_indices = @transform_5, window_bounds = array<i64: 1, 16, 16, 128>}]} {
    %c0 = arith.constant 0 : index
    %c0_0 = arith.constant 0 : index
    %c0_1 = arith.constant 0 : index
    %c0_2 = arith.constant 0 : index
    %0 = vector.load %arg1[%c0, %c0_0, %c0_1, %c0_2] : memref<1x16x16x128xf32, #tpu.memory_space<vmem>>, vector<1x16x16x128xf32>
    %1 = vector.shape_cast %0 : vector<1x16x16x128xf32> to vector<16x16x128xf32>
    %cst = arith.constant 0.000000e+00 : f32
    %2 = vector.broadcast %cst : f32 to vector<3x1x16x128xf32>
    %c0_3 = arith.constant 0 : index
    %c0_4 = arith.constant 0 : index
    %c0_5 = arith.constant 0 : index
    %c0_6 = arith.constant 0 : index
    %3 = vector.load %arg7[%c0_3, %c0_4, %c0_5, %c0_6] : memref<3x18x16x128xf32, #tpu.memory_space<vmem>>, vector<3x1x16x128xf32>
    tpu.vector_store %arg7[%c0_3, %c0_4, %c0_5, %c0_6], %2 {strides = array<i32>} : memref<3x18x16x128xf32, #tpu.memory_space<vmem>>, vector<3x1x16x128xf32>,
    %c0_7 = arith.constant 0 : index
    %c17 = arith.constant 17 : index
    %c0_8 = arith.constant 0 : index
    %c0_9 = arith.constant 0 : index
    %4 = vector.load %arg7[%c0_7, %c17, %c0_8, %c0_9] : memref<3x18x16x128xf32, #tpu.memory_space<vmem>>, vector<3x1x16x128xf32>
    tpu.vector_store %arg7[%c0_7, %c17, %c0_8, %c0_9], %2 {strides = array<i32>} : memref<3x18x16x128xf32, #tpu.memory_space<vmem>>, vector<3x1x16x128xf32>,
    %cst_10 = arith.constant 0.000000e+00 : f32
    %5 = vector.broadcast %cst_10 : f32 to vector<1x18x1x128xf32>
    %c0_11 = arith.constant 0 : index
    %c0_12 = arith.constant 0 : index
    %c0_13 = arith.constant 0 : index
    %c0_14 = arith.constant 0 : index
    %6 = vector.load %arg7[%c0_11, %c0_12, %c0_13, %c0_14] : memref<3x18x16x128xf32, #tpu.memory_space<vmem>>, vector<1x18x1x128xf32>
    tpu.vector_store %arg7[%c0_11, %c0_12, %c0_13, %c0_14], %5 {strides = array<i32>} : memref<3x18x16x128xf32, #tpu.memory_space<vmem>>, vector<1x18x1x128xf32>,
    %c2 = arith.constant 2 : index
    %c0_15 = arith.constant 0 : index
    %c15 = arith.constant 15 : index
    %c0_16 = arith.constant 0 : index
    %7 = vector.load %arg7[%c2, %c0_15, %c15, %c0_16] : memref<3x18x16x128xf32, #tpu.memory_space<vmem>>, vector<1x18x1x128xf32>
    tpu.vector_store %arg7[%c2, %c0_15, %c15, %c0_16], %5 {strides = array<i32>} : memref<3x18x16x128xf32, #tpu.memory_space<vmem>>, vector<1x18x1x128xf32>,
    %c1 = arith.constant 1 : index
    %c1_17 = arith.constant 1 : index
    %c0_18 = arith.constant 0 : index
    %c0_19 = arith.constant 0 : index
    %8 = vector.load %arg7[%c1, %c1_17, %c0_18, %c0_19] : memref<3x18x16x128xf32, #tpu.memory_space<vmem>>, vector<1x16x16x128xf32>
    %9 = vector.shape_cast %8 : vector<1x16x16x128xf32> to vector<16x16x128xf32>
    %10 = vector.shape_cast %1 : vector<16x16x128xf32> to vector<1x16x16x128xf32>
    tpu.vector_store %arg7[%c1, %c1_17, %c0_18, %c0_19], %10 {strides = array<i32>} : memref<3x18x16x128xf32, #tpu.memory_space<vmem>>, vector<1x16x16x128xf32>,
    %11 = vector.extract_strided_slice %1 {offsets = [0, 0, 0], sizes = [16, 15, 128], strides = [1, 1, 1]} : vector<16x16x128xf32> to vector<16x15x128xf32>
    %c0_20 = arith.constant 0 : index
    %c1_21 = arith.constant 1 : index
    %c1_22 = arith.constant 1 : index
    %c0_23 = arith.constant 0 : index
    %12 = vector.load %arg7[%c0_20, %c1_21, %c1_22, %c0_23] : memref<3x18x16x128xf32, #tpu.memory_space<vmem>>, vector<1x16x15x128xf32>
    %13 = vector.shape_cast %12 : vector<1x16x15x128xf32> to vector<16x15x128xf32>
    %14 = vector.shape_cast %11 : vector<16x15x128xf32> to vector<1x16x15x128xf32>
    tpu.vector_store %arg7[%c0_20, %c1_21, %c1_22, %c0_23], %14 {strides = array<i32>} : memref<3x18x16x128xf32, #tpu.memory_space<vmem>>, vector<1x16x15x128xf32>,
    %15 = vector.extract_strided_slice %1 {offsets = [0, 1, 0], sizes = [16, 15, 128], strides = [1, 1, 1]} : vector<16x16x128xf32> to vector<16x15x128xf32>
    %c2_24 = arith.constant 2 : index
    %c1_25 = arith.constant 1 : index
    %c0_26 = arith.constant 0 : index
    %c0_27 = arith.constant 0 : index
    %16 = vector.load %arg7[%c2_24, %c1_25, %c0_26, %c0_27] : memref<3x18x16x128xf32, #tpu.memory_space<vmem>>, vector<1x16x15x128xf32>
    %17 = vector.shape_cast %16 : vector<1x16x15x128xf32> to vector<16x15x128xf32>
    %18 = vector.shape_cast %15 : vector<16x15x128xf32> to vector<1x16x15x128xf32>
    tpu.vector_store %arg7[%c2_24, %c1_25, %c0_26, %c0_27], %18 {strides = array<i32>} : memref<3x18x16x128xf32, #tpu.memory_space<vmem>>, vector<1x16x15x128xf32>,
    %c0_28 = arith.constant 0 : index
    %c0_29 = arith.constant 0 : index
    %c0_30 = arith.constant 0 : index
    %c0_31 = arith.constant 0 : index
    %19 = vector.load %arg7[%c0_28, %c0_29, %c0_30, %c0_31] : memref<3x18x16x128xf32, #tpu.memory_space<vmem>>, vector<1x16x16x128xf32>
    %20 = vector.shape_cast %19 : vector<1x16x16x128xf32> to vector<16x16x128xf32>
    %21 = vector.shape_cast %20 : vector<16x16x128xf32> to vector<256x128xf32>
    %c0_32 = arith.constant 0 : index
    %c0_33 = arith.constant 0 : index
    %22 = vector.load %arg9[%c0_32, %c0_33] : memref<256x1152xf32, #tpu.memory_space<vmem>>, vector<256x128xf32>
    tpu.vector_store %arg9[%c0_32, %c0_33], %21 {strides = array<i32>} : memref<256x1152xf32, #tpu.memory_space<vmem>>, vector<256x128xf32>,
    %c1_34 = arith.constant 1 : index
    %c0_35 = arith.constant 0 : index
    %c0_36 = arith.constant 0 : index
    %c0_37 = arith.constant 0 : index
    %23 = vector.load %arg7[%c1_34, %c0_35, %c0_36, %c0_37] : memref<3x18x16x128xf32, #tpu.memory_space<vmem>>, vector<1x16x16x128xf32>
    %24 = vector.shape_cast %23 : vector<1x16x16x128xf32> to vector<16x16x128xf32>
    %25 = vector.shape_cast %24 : vector<16x16x128xf32> to vector<256x128xf32>
    %c0_38 = arith.constant 0 : index
    %c128 = arith.constant 128 : index
    %26 = vector.load %arg9[%c0_38, %c128] : memref<256x1152xf32, #tpu.memory_space<vmem>>, vector<256x128xf32>
    tpu.vector_store %arg9[%c0_38, %c128], %25 {strides = array<i32>} : memref<256x1152xf32, #tpu.memory_space<vmem>>, vector<256x128xf32>,
    %c2_39 = arith.constant 2 : index
    %c0_40 = arith.constant 0 : index
    %c0_41 = arith.constant 0 : index
    %c0_42 = arith.constant 0 : index
    %27 = vector.load %arg7[%c2_39, %c0_40, %c0_41, %c0_42] : memref<3x18x16x128xf32, #tpu.memory_space<vmem>>, vector<1x16x16x128xf32>
    %28 = vector.shape_cast %27 : vector<1x16x16x128xf32> to vector<16x16x128xf32>
    %29 = vector.shape_cast %28 : vector<16x16x128xf32> to vector<256x128xf32>
    %c0_43 = arith.constant 0 : index
    %c256 = arith.constant 256 : index
    %30 = vector.load %arg9[%c0_43, %c256] : memref<256x1152xf32, #tpu.memory_space<vmem>>, vector<256x128xf32>
    tpu.vector_store %arg9[%c0_43, %c256], %29 {strides = array<i32>} : memref<256x1152xf32, #tpu.memory_space<vmem>>, vector<256x128xf32>,
    %c0_44 = arith.constant 0 : index
    %c1_45 = arith.constant 1 : index
    %c0_46 = arith.constant 0 : index
    %c0_47 = arith.constant 0 : index
    %31 = vector.load %arg7[%c0_44, %c1_45, %c0_46, %c0_47] : memref<3x18x16x128xf32, #tpu.memory_space<vmem>>, vector<1x16x16x128xf32>
    %32 = vector.shape_cast %31 : vector<1x16x16x128xf32> to vector<16x16x128xf32>
    %33 = vector.shape_cast %32 : vector<16x16x128xf32> to vector<256x128xf32>
    %c0_48 = arith.constant 0 : index
    %c384 = arith.constant 384 : index
    %34 = vector.load %arg9[%c0_48, %c384] : memref<256x1152xf32, #tpu.memory_space<vmem>>, vector<256x128xf32>
    tpu.vector_store %arg9[%c0_48, %c384], %33 {strides = array<i32>} : memref<256x1152xf32, #tpu.memory_space<vmem>>, vector<256x128xf32>,
    %c1_49 = arith.constant 1 : index
    %c1_50 = arith.constant 1 : index
    %c0_51 = arith.constant 0 : index
    %c0_52 = arith.constant 0 : index
    %35 = vector.load %arg7[%c1_49, %c1_50, %c0_51, %c0_52] : memref<3x18x16x128xf32, #tpu.memory_space<vmem>>, vector<1x16x16x128xf32>
    %36 = vector.shape_cast %35 : vector<1x16x16x128xf32> to vector<16x16x128xf32>
    %37 = vector.shape_cast %36 : vector<16x16x128xf32> to vector<256x128xf32>
    %c0_53 = arith.constant 0 : index
    %c512 = arith.constant 512 : index
    %38 = vector.load %arg9[%c0_53, %c512] : memref<256x1152xf32, #tpu.memory_space<vmem>>, vector<256x128xf32>
    tpu.vector_store %arg9[%c0_53, %c512], %37 {strides = array<i32>} : memref<256x1152xf32, #tpu.memory_space<vmem>>, vector<256x128xf32>,
    %c2_54 = arith.constant 2 : index
    %c1_55 = arith.constant 1 : index
    %c0_56 = arith.constant 0 : index
    %c0_57 = arith.constant 0 : index
    %39 = vector.load %arg7[%c2_54, %c1_55, %c0_56, %c0_57] : memref<3x18x16x128xf32, #tpu.memory_space<vmem>>, vector<1x16x16x128xf32>
    %40 = vector.shape_cast %39 : vector<1x16x16x128xf32> to vector<16x16x128xf32>
    %41 = vector.shape_cast %40 : vector<16x16x128xf32> to vector<256x128xf32>
    %c0_58 = arith.constant 0 : index
    %c640 = arith.constant 640 : index
    %42 = vector.load %arg9[%c0_58, %c640] : memref<256x1152xf32, #tpu.memory_space<vmem>>, vector<256x128xf32>
    tpu.vector_store %arg9[%c0_58, %c640], %41 {strides = array<i32>} : memref<256x1152xf32, #tpu.memory_space<vmem>>, vector<256x128xf32>,
    %c0_59 = arith.constant 0 : index
    %c2_60 = arith.constant 2 : index
    %c0_61 = arith.constant 0 : index
    %c0_62 = arith.constant 0 : index
    %43 = vector.load %arg7[%c0_59, %c2_60, %c0_61, %c0_62] : memref<3x18x16x128xf32, #tpu.memory_space<vmem>>, vector<1x16x16x128xf32>
    %44 = vector.shape_cast %43 : vector<1x16x16x128xf32> to vector<16x16x128xf32>
    %45 = vector.shape_cast %44 : vector<16x16x128xf32> to vector<256x128xf32>
    %c0_63 = arith.constant 0 : index
    %c768 = arith.constant 768 : index
    %46 = vector.load %arg9[%c0_63, %c768] : memref<256x1152xf32, #tpu.memory_space<vmem>>, vector<256x128xf32>
    tpu.vector_store %arg9[%c0_63, %c768], %45 {strides = array<i32>} : memref<256x1152xf32, #tpu.memory_space<vmem>>, vector<256x128xf32>,
    %c1_64 = arith.constant 1 : index
    %c2_65 = arith.constant 2 : index
    %c0_66 = arith.constant 0 : index
    %c0_67 = arith.constant 0 : index
    %47 = vector.load %arg7[%c1_64, %c2_65, %c0_66, %c0_67] : memref<3x18x16x128xf32, #tpu.memory_space<vmem>>, vector<1x16x16x128xf32>
    %48 = vector.shape_cast %47 : vector<1x16x16x128xf32> to vector<16x16x128xf32>
    %49 = vector.shape_cast %48 : vector<16x16x128xf32> to vector<256x128xf32>
    %c0_68 = arith.constant 0 : index
    %c896 = arith.constant 896 : index
    %50 = vector.load %arg9[%c0_68, %c896] : memref<256x1152xf32, #tpu.memory_space<vmem>>, vector<256x128xf32>
    tpu.vector_store %arg9[%c0_68, %c896], %49 {strides = array<i32>} : memref<256x1152xf32, #tpu.memory_space<vmem>>, vector<256x128xf32>,
    %c2_69 = arith.constant 2 : index
    %c2_70 = arith.constant 2 : index
    %c0_71 = arith.constant 0 : index
    %c0_72 = arith.constant 0 : index
    %51 = vector.load %arg7[%c2_69, %c2_70, %c0_71, %c0_72] : memref<3x18x16x128xf32, #tpu.memory_space<vmem>>, vector<1x16x16x128xf32>
    %52 = vector.shape_cast %51 : vector<1x16x16x128xf32> to vector<16x16x128xf32>
    %53 = vector.shape_cast %52 : vector<16x16x128xf32> to vector<256x128xf32>
    %c0_73 = arith.constant 0 : index
    %c1024 = arith.constant 1024 : index
    %54 = vector.load %arg9[%c0_73, %c1024] : memref<256x1152xf32, #tpu.memory_space<vmem>>, vector<256x128xf32>
    tpu.vector_store %arg9[%c0_73, %c1024], %53 {strides = array<i32>} : memref<256x1152xf32, #tpu.memory_space<vmem>>, vector<256x128xf32>,
    %c0_74 = arith.constant 0 : index
    %c0_75 = arith.constant 0 : index
    %55 = vector.load %arg9[%c0_74, %c0_75] : memref<256x1152xf32, #tpu.memory_space<vmem>>, vector<256x1152xf32>
    %c0_76 = arith.constant 0 : index
    %c0_77 = arith.constant 0 : index
    %56 = vector.load %arg2[%c0_76, %c0_77] : memref<1152x128xf32, #tpu.memory_space<vmem>>, vector<1152x128xf32>
    %cst_78 = arith.constant dense<0.000000e+00> : vector<256x128xf32>
    %57 = tpu.matmul %55, %56, %cst_78 {dimension_numbers = #tpu.dot_dimension_numbers<[1], [0], [0], [1], [0, 0, 1, 1], [], []>} : vector<256x1152xf32>, vector<1152x128xf32>, vector<256x128xf32> -> vector<256x128xf32>
    %c0_79 = arith.constant 0 : index
    %c0_80 = arith.constant 0 : index
    %58 = vector.load %arg3[%c0_79, %c0_80] : memref<1x128xf32, #tpu.memory_space<vmem>>, vector<1x128xf32>
    %59 = vector.broadcast %58 : vector<1x128xf32> to vector<256x128xf32>
    %60 = arith.addf %57, %59 : vector<256x128xf32>
    %cst_81 = arith.constant 0.000000e+00 : f32
    %61 = vector.broadcast %cst_81 : f32 to vector<256x128xf32>
    %62 = arith.maximumf %60, %61 : vector<256x128xf32>
    %63 = vector.shape_cast %62 : vector<256x128xf32> to vector<16x16x128xf32>
    %cst_82 = arith.constant 0.000000e+00 : f32
    %64 = vector.broadcast %cst_82 : f32 to vector<3x1x16x128xf32>
    %c0_83 = arith.constant 0 : index
    %c0_84 = arith.constant 0 : index
    %c0_85 = arith.constant 0 : index
    %c0_86 = arith.constant 0 : index
    %65 = vector.load %arg8[%c0_83, %c0_84, %c0_85, %c0_86] : memref<3x18x16x128xf32, #tpu.memory_space<vmem>>, vector<3x1x16x128xf32>
    tpu.vector_store %arg8[%c0_83, %c0_84, %c0_85, %c0_86], %64 {strides = array<i32>} : memref<3x18x16x128xf32, #tpu.memory_space<vmem>>, vector<3x1x16x128xf32>,
    %c0_87 = arith.constant 0 : index
    %c17_88 = arith.constant 17 : index
    %c0_89 = arith.constant 0 : index
    %c0_90 = arith.constant 0 : index
    %66 = vector.load %arg8[%c0_87, %c17_88, %c0_89, %c0_90] : memref<3x18x16x128xf32, #tpu.memory_space<vmem>>, vector<3x1x16x128xf32>
    tpu.vector_store %arg8[%c0_87, %c17_88, %c0_89, %c0_90], %64 {strides = array<i32>} : memref<3x18x16x128xf32, #tpu.memory_space<vmem>>, vector<3x1x16x128xf32>,
    %cst_91 = arith.constant 0.000000e+00 : f32
    %67 = vector.broadcast %cst_91 : f32 to vector<1x18x1x128xf32>
    %c0_92 = arith.constant 0 : index
    %c0_93 = arith.constant 0 : index
    %c0_94 = arith.constant 0 : index
    %c0_95 = arith.constant 0 : index
    %68 = vector.load %arg8[%c0_92, %c0_93, %c0_94, %c0_95] : memref<3x18x16x128xf32, #tpu.memory_space<vmem>>, vector<1x18x1x128xf32>
    tpu.vector_store %arg8[%c0_92, %c0_93, %c0_94, %c0_95], %67 {strides = array<i32>} : memref<3x18x16x128xf32, #tpu.memory_space<vmem>>, vector<1x18x1x128xf32>,
    %c2_96 = arith.constant 2 : index
    %c0_97 = arith.constant 0 : index
    %c15_98 = arith.constant 15 : index
    %c0_99 = arith.constant 0 : index
    %69 = vector.load %arg8[%c2_96, %c0_97, %c15_98, %c0_99] : memref<3x18x16x128xf32, #tpu.memory_space<vmem>>, vector<1x18x1x128xf32>
    tpu.vector_store %arg8[%c2_96, %c0_97, %c15_98, %c0_99], %67 {strides = array<i32>} : memref<3x18x16x128xf32, #tpu.memory_space<vmem>>, vector<1x18x1x128xf32>,
    %c1_100 = arith.constant 1 : index
    %c1_101 = arith.constant 1 : index
    %c0_102 = arith.constant 0 : index
    %c0_103 = arith.constant 0 : index
    %70 = vector.load %arg8[%c1_100, %c1_101, %c0_102, %c0_103] : memref<3x18x16x128xf32, #tpu.memory_space<vmem>>, vector<1x16x16x128xf32>
    %71 = vector.shape_cast %70 : vector<1x16x16x128xf32> to vector<16x16x128xf32>
    %72 = vector.shape_cast %63 : vector<16x16x128xf32> to vector<1x16x16x128xf32>
    tpu.vector_store %arg8[%c1_100, %c1_101, %c0_102, %c0_103], %72 {strides = array<i32>} : memref<3x18x16x128xf32, #tpu.memory_space<vmem>>, vector<1x16x16x128xf32>,
    %73 = vector.extract_strided_slice %63 {offsets = [0, 0, 0], sizes = [16, 15, 128], strides = [1, 1, 1]} : vector<16x16x128xf32> to vector<16x15x128xf32>
    %c0_104 = arith.constant 0 : index
    %c1_105 = arith.constant 1 : index
    %c1_106 = arith.constant 1 : index
    %c0_107 = arith.constant 0 : index
    %74 = vector.load %arg8[%c0_104, %c1_105, %c1_106, %c0_107] : memref<3x18x16x128xf32, #tpu.memory_space<vmem>>, vector<1x16x15x128xf32>
    %75 = vector.shape_cast %74 : vector<1x16x15x128xf32> to vector<16x15x128xf32>
    %76 = vector.shape_cast %73 : vector<16x15x128xf32> to vector<1x16x15x128xf32>
    tpu.vector_store %arg8[%c0_104, %c1_105, %c1_106, %c0_107], %76 {strides = array<i32>} : memref<3x18x16x128xf32, #tpu.memory_space<vmem>>, vector<1x16x15x128xf32>,
    %77 = vector.extract_strided_slice %63 {offsets = [0, 1, 0], sizes = [16, 15, 128], strides = [1, 1, 1]} : vector<16x16x128xf32> to vector<16x15x128xf32>
    %c2_108 = arith.constant 2 : index
    %c1_109 = arith.constant 1 : index
    %c0_110 = arith.constant 0 : index
    %c0_111 = arith.constant 0 : index
    %78 = vector.load %arg8[%c2_108, %c1_109, %c0_110, %c0_111] : memref<3x18x16x128xf32, #tpu.memory_space<vmem>>, vector<1x16x15x128xf32>
    %79 = vector.shape_cast %78 : vector<1x16x15x128xf32> to vector<16x15x128xf32>
    %80 = vector.shape_cast %77 : vector<16x15x128xf32> to vector<1x16x15x128xf32>
    tpu.vector_store %arg8[%c2_108, %c1_109, %c0_110, %c0_111], %80 {strides = array<i32>} : memref<3x18x16x128xf32, #tpu.memory_space<vmem>>, vector<1x16x15x128xf32>,
    %c0_112 = arith.constant 0 : index
    %c0_113 = arith.constant 0 : index
    %c0_114 = arith.constant 0 : index
    %c0_115 = arith.constant 0 : index
    %81 = vector.load %arg8[%c0_112, %c0_113, %c0_114, %c0_115] : memref<3x18x16x128xf32, #tpu.memory_space<vmem>>, vector<1x16x16x128xf32>
    %82 = vector.shape_cast %81 : vector<1x16x16x128xf32> to vector<16x16x128xf32>
    %83 = vector.shape_cast %82 : vector<16x16x128xf32> to vector<256x128xf32>
    %c0_116 = arith.constant 0 : index
    %c0_117 = arith.constant 0 : index
    %84 = vector.load %arg9[%c0_116, %c0_117] : memref<256x1152xf32, #tpu.memory_space<vmem>>, vector<256x128xf32>
    tpu.vector_store %arg9[%c0_116, %c0_117], %83 {strides = array<i32>} : memref<256x1152xf32, #tpu.memory_space<vmem>>, vector<256x128xf32>,
    %c1_118 = arith.constant 1 : index
    %c0_119 = arith.constant 0 : index
    %c0_120 = arith.constant 0 : index
    %c0_121 = arith.constant 0 : index
    %85 = vector.load %arg8[%c1_118, %c0_119, %c0_120, %c0_121] : memref<3x18x16x128xf32, #tpu.memory_space<vmem>>, vector<1x16x16x128xf32>
    %86 = vector.shape_cast %85 : vector<1x16x16x128xf32> to vector<16x16x128xf32>
    %87 = vector.shape_cast %86 : vector<16x16x128xf32> to vector<256x128xf32>
    %c0_122 = arith.constant 0 : index
    %c128_123 = arith.constant 128 : index
    %88 = vector.load %arg9[%c0_122, %c128_123] : memref<256x1152xf32, #tpu.memory_space<vmem>>, vector<256x128xf32>
    tpu.vector_store %arg9[%c0_122, %c128_123], %87 {strides = array<i32>} : memref<256x1152xf32, #tpu.memory_space<vmem>>, vector<256x128xf32>,
    %c2_124 = arith.constant 2 : index
    %c0_125 = arith.constant 0 : index
    %c0_126 = arith.constant 0 : index
    %c0_127 = arith.constant 0 : index
    %89 = vector.load %arg8[%c2_124, %c0_125, %c0_126, %c0_127] : memref<3x18x16x128xf32, #tpu.memory_space<vmem>>, vector<1x16x16x128xf32>
    %90 = vector.shape_cast %89 : vector<1x16x16x128xf32> to vector<16x16x128xf32>
    %91 = vector.shape_cast %90 : vector<16x16x128xf32> to vector<256x128xf32>
    %c0_128 = arith.constant 0 : index
    %c256_129 = arith.constant 256 : index
    %92 = vector.load %arg9[%c0_128, %c256_129] : memref<256x1152xf32, #tpu.memory_space<vmem>>, vector<256x128xf32>
    tpu.vector_store %arg9[%c0_128, %c256_129], %91 {strides = array<i32>} : memref<256x1152xf32, #tpu.memory_space<vmem>>, vector<256x128xf32>,
    %c0_130 = arith.constant 0 : index
    %c1_131 = arith.constant 1 : index
    %c0_132 = arith.constant 0 : index
    %c0_133 = arith.constant 0 : index
    %93 = vector.load %arg8[%c0_130, %c1_131, %c0_132, %c0_133] : memref<3x18x16x128xf32, #tpu.memory_space<vmem>>, vector<1x16x16x128xf32>
    %94 = vector.shape_cast %93 : vector<1x16x16x128xf32> to vector<16x16x128xf32>
    %95 = vector.shape_cast %94 : vector<16x16x128xf32> to vector<256x128xf32>
    %c0_134 = arith.constant 0 : index
    %c384_135 = arith.constant 384 : index
    %96 = vector.load %arg9[%c0_134, %c384_135] : memref<256x1152xf32, #tpu.memory_space<vmem>>, vector<256x128xf32>
    tpu.vector_store %arg9[%c0_134, %c384_135], %95 {strides = array<i32>} : memref<256x1152xf32, #tpu.memory_space<vmem>>, vector<256x128xf32>,
    %c1_136 = arith.constant 1 : index
    %c1_137 = arith.constant 1 : index
    %c0_138 = arith.constant 0 : index
    %c0_139 = arith.constant 0 : index
    %97 = vector.load %arg8[%c1_136, %c1_137, %c0_138, %c0_139] : memref<3x18x16x128xf32, #tpu.memory_space<vmem>>, vector<1x16x16x128xf32>
    %98 = vector.shape_cast %97 : vector<1x16x16x128xf32> to vector<16x16x128xf32>
    %99 = vector.shape_cast %98 : vector<16x16x128xf32> to vector<256x128xf32>
    %c0_140 = arith.constant 0 : index
    %c512_141 = arith.constant 512 : index
    %100 = vector.load %arg9[%c0_140, %c512_141] : memref<256x1152xf32, #tpu.memory_space<vmem>>, vector<256x128xf32>
    tpu.vector_store %arg9[%c0_140, %c512_141], %99 {strides = array<i32>} : memref<256x1152xf32, #tpu.memory_space<vmem>>, vector<256x128xf32>,
    %c2_142 = arith.constant 2 : index
    %c1_143 = arith.constant 1 : index
    %c0_144 = arith.constant 0 : index
    %c0_145 = arith.constant 0 : index
    %101 = vector.load %arg8[%c2_142, %c1_143, %c0_144, %c0_145] : memref<3x18x16x128xf32, #tpu.memory_space<vmem>>, vector<1x16x16x128xf32>
    %102 = vector.shape_cast %101 : vector<1x16x16x128xf32> to vector<16x16x128xf32>
    %103 = vector.shape_cast %102 : vector<16x16x128xf32> to vector<256x128xf32>
    %c0_146 = arith.constant 0 : index
    %c640_147 = arith.constant 640 : index
    %104 = vector.load %arg9[%c0_146, %c640_147] : memref<256x1152xf32, #tpu.memory_space<vmem>>, vector<256x128xf32>
    tpu.vector_store %arg9[%c0_146, %c640_147], %103 {strides = array<i32>} : memref<256x1152xf32, #tpu.memory_space<vmem>>, vector<256x128xf32>,
    %c0_148 = arith.constant 0 : index
    %c2_149 = arith.constant 2 : index
    %c0_150 = arith.constant 0 : index
    %c0_151 = arith.constant 0 : index
    %105 = vector.load %arg8[%c0_148, %c2_149, %c0_150, %c0_151] : memref<3x18x16x128xf32, #tpu.memory_space<vmem>>, vector<1x16x16x128xf32>
    %106 = vector.shape_cast %105 : vector<1x16x16x128xf32> to vector<16x16x128xf32>
    %107 = vector.shape_cast %106 : vector<16x16x128xf32> to vector<256x128xf32>
    %c0_152 = arith.constant 0 : index
    %c768_153 = arith.constant 768 : index
    %108 = vector.load %arg9[%c0_152, %c768_153] : memref<256x1152xf32, #tpu.memory_space<vmem>>, vector<256x128xf32>
    tpu.vector_store %arg9[%c0_152, %c768_153], %107 {strides = array<i32>} : memref<256x1152xf32, #tpu.memory_space<vmem>>, vector<256x128xf32>,
    %c1_154 = arith.constant 1 : index
    %c2_155 = arith.constant 2 : index
    %c0_156 = arith.constant 0 : index
    %c0_157 = arith.constant 0 : index
    %109 = vector.load %arg8[%c1_154, %c2_155, %c0_156, %c0_157] : memref<3x18x16x128xf32, #tpu.memory_space<vmem>>, vector<1x16x16x128xf32>
    %110 = vector.shape_cast %109 : vector<1x16x16x128xf32> to vector<16x16x128xf32>
    %111 = vector.shape_cast %110 : vector<16x16x128xf32> to vector<256x128xf32>
    %c0_158 = arith.constant 0 : index
    %c896_159 = arith.constant 896 : index
    %112 = vector.load %arg9[%c0_158, %c896_159] : memref<256x1152xf32, #tpu.memory_space<vmem>>, vector<256x128xf32>
    tpu.vector_store %arg9[%c0_158, %c896_159], %111 {strides = array<i32>} : memref<256x1152xf32, #tpu.memory_space<vmem>>, vector<256x128xf32>,
    %c2_160 = arith.constant 2 : index
    %c2_161 = arith.constant 2 : index
    %c0_162 = arith.constant 0 : index
    %c0_163 = arith.constant 0 : index
    %113 = vector.load %arg8[%c2_160, %c2_161, %c0_162, %c0_163] : memref<3x18x16x128xf32, #tpu.memory_space<vmem>>, vector<1x16x16x128xf32>
    %114 = vector.shape_cast %113 : vector<1x16x16x128xf32> to vector<16x16x128xf32>
    %115 = vector.shape_cast %114 : vector<16x16x128xf32> to vector<256x128xf32>
    %c0_164 = arith.constant 0 : index
    %c1024_165 = arith.constant 1024 : index
    %116 = vector.load %arg9[%c0_164, %c1024_165] : memref<256x1152xf32, #tpu.memory_space<vmem>>, vector<256x128xf32>
    tpu.vector_store %arg9[%c0_164, %c1024_165], %115 {strides = array<i32>} : memref<256x1152xf32, #tpu.memory_space<vmem>>, vector<256x128xf32>,
    %c0_166 = arith.constant 0 : index
    %c0_167 = arith.constant 0 : index
    %117 = vector.load %arg9[%c0_166, %c0_167] : memref<256x1152xf32, #tpu.memory_space<vmem>>, vector<256x1152xf32>
    %c0_168 = arith.constant 0 : index
    %c0_169 = arith.constant 0 : index
    %118 = vector.load %arg4[%c0_168, %c0_169] : memref<1152x128xf32, #tpu.memory_space<vmem>>, vector<1152x128xf32>
    %cst_170 = arith.constant dense<0.000000e+00> : vector<256x128xf32>
    %119 = tpu.matmul %117, %118, %cst_170 {dimension_numbers = #tpu.dot_dimension_numbers<[1], [0], [0], [1], [0, 0, 1, 1], [], []>} : vector<256x1152xf32>, vector<1152x128xf32>, vector<256x128xf32> -> vector<256x128xf32>
    %c0_171 = arith.constant 0 : index
    %c0_172 = arith.constant 0 : index
    %120 = vector.load %arg5[%c0_171, %c0_172] : memref<1x128xf32, #tpu.memory_space<vmem>>, vector<1x128xf32>
    %121 = vector.broadcast %120 : vector<1x128xf32> to vector<256x128xf32>
    %122 = arith.addf %119, %121 : vector<256x128xf32>
    %123 = vector.shape_cast %1 : vector<16x16x128xf32> to vector<256x128xf32>
    %124 = arith.addf %122, %123 : vector<256x128xf32>
    %cst_173 = arith.constant 0.000000e+00 : f32
    %125 = vector.broadcast %cst_173 : f32 to vector<256x128xf32>
    %126 = arith.maximumf %124, %125 : vector<256x128xf32>
    %127 = vector.shape_cast %126 : vector<256x128xf32> to vector<16x16x128xf32>
    %c0_174 = arith.constant 0 : index
    %c0_175 = arith.constant 0 : index
    %c0_176 = arith.constant 0 : index
    %c0_177 = arith.constant 0 : index
    %128 = vector.load %arg6[%c0_174, %c0_175, %c0_176, %c0_177] : memref<1x16x16x128xf32, #tpu.memory_space<vmem>>, vector<1x16x16x128xf32>
    %129 = vector.shape_cast %128 : vector<1x16x16x128xf32> to vector<16x16x128xf32>
    %130 = vector.shape_cast %127 : vector<16x16x128xf32> to vector<1x16x16x128xf32>
    tpu.vector_store %arg6[%c0_174, %c0_175, %c0_176, %c0_177], %130 {strides = array<i32>} : memref<1x16x16x128xf32, #tpu.memory_space<vmem>>, vector<1x16x16x128xf32>,
    return
  }
  func.func @transform_0(%arg0: i32) -> (i32, i32, i32, i32) {
    %c0_i32 = arith.constant 0 : i32
    %c0_i32_0 = arith.constant 0 : i32
    %c0_i32_1 = arith.constant 0 : i32
    %c0_i32_2 = arith.constant 0 : i32
    return %arg0, %c0_i32, %c0_i32_0, %c0_i32_1 : i32, i32, i32, i32
  }
  func.func @transform_1(%arg0: i32) -> (i32, i32) {
    %c0_i32 = arith.constant 0 : i32
    %c0_i32_0 = arith.constant 0 : i32
    %c0_i32_1 = arith.constant 0 : i32
    return %c0_i32, %c0_i32_0 : i32, i32
  }
  func.func @transform_2(%arg0: i32) -> (i32, i32) {
    %c0_i32 = arith.constant 0 : i32
    %c0_i32_0 = arith.constant 0 : i32
    %c0_i32_1 = arith.constant 0 : i32
    return %c0_i32, %c0_i32_0 : i32, i32
  }
  func.func @transform_3(%arg0: i32) -> (i32, i32) {
    %c0_i32 = arith.constant 0 : i32
    %c0_i32_0 = arith.constant 0 : i32
    %c0_i32_1 = arith.constant 0 : i32
    return %c0_i32, %c0_i32_0 : i32, i32
  }
  func.func @transform_4(%arg0: i32) -> (i32, i32) {
    %c0_i32 = arith.constant 0 : i32
    %c0_i32_0 = arith.constant 0 : i32
    %c0_i32_1 = arith.constant 0 : i32
    return %c0_i32, %c0_i32_0 : i32, i32
  }
  func.func @transform_5(%arg0: i32) -> (i32, i32, i32, i32) {
    %c0_i32 = arith.constant 0 : i32
    %c0_i32_0 = arith.constant 0 : i32
    %c0_i32_1 = arith.constant 0 : i32
    %c0_i32_2 = arith.constant 0 : i32
    return %arg0, %c0_i32, %c0_i32_0, %c0_i32_1 : i32, i32, i32, i32
  }
}

</mosaic_0001>

<bundles_post_ra>
// kernel: tpu_custom_call.1
= control target key start
LH: loop header
LB: loop body
LE: loop exit
PB: predicated region body
PF: predicated region fallthrough
CT: control target
= control target key end

     0   :  { %10 = vsyncpa [#allocation6], 0  ;;  %s7381_s0 = inlined_call_operand.hbm [shape: f32[2,16,16,128], index: 0, kind: input, shape index: {}]   ;;  %s7382_s1 = inlined_call_operand.hbm [shape: f32[1152,128], index: 1, kind: input, shape index: {}]   ;;  %s7383_s2 = inlined_call_operand.vmem [shape: f32[1,128], index: 2, kind: input, shape index: {}]   ;;  %s7384_s3 = inlined_call_operand.hbm [shape: f32[1152,128], index: 3, kind: input, shape index: {}]   ;;  %s7385_s4 = inlined_call_operand.vmem [shape: f32[1,128], index: 4, kind: input, shape index: {}]   ;;  %s7386_s5 = inlined_call_operand.hbm [shape: f32[2,16,16,128], index: 5, kind: output, shape index: {}]  }
   0x1   :  { %12 = vsyncpa [#allocation6 + $0x1], 0 }
   0x2   :  { %13 = vsyncpa [#allocation9], 0 }
   0x3   :  { %14 = vsyncpa [#allocation7], 0 }
   0x4   :  { %16 = vsyncpa [#allocation7 + $0x1], 0  ;;  %s5279_s18 = smov 0   ;;  %s5281_s19 = smov 0  }
   0x5   :  { %s5283_s20 = smov 0   ;;  %s5285_s21 = smov 0  }
   0x6 LB: > { %s5300_s22 = sadd.s32 4294967295, %s5240_s21   ;;  %s4910_s23 = sadd.s32 4294967294, %s5240_s21   ;;  %s5240_s21 = sphi %s5285_s21, %s7511_s21   ;;  %s5236_s20 = sphi %s5283_s20, %s7510_s20   ;;  %s5232_s19 = sphi %s5281_s19, %s7509_s19   ;;  %s5228_s18 = sphi %s5279_s18, %s7508_s18  }
   0x7   : > { %p42_p0 = scmp.ne.s32.totalorder %s5232_s19, %s5228_s18  ;;  %p43_p1 = scmp.eq.s32.totalorder %s5300_s22, 0 }
   0x8   : > { %p150_p2 = scmp.eq.s32.totalorder %s5300_s22, 1  ;;  %p156_p3 = scmp.eq.s32.totalorder %s4910_s23, 1 }
   0x9   : > { %p5309_p4 = por %p43_p1, %p42_p0  ;;  %p4911_p5 = scmp.ge.s32.totalorder %s5240_s21, 1 }
   0xa   : > { %p5314_p6 = por %p156_p3, %p42_p0  ;;  %p163_p7 = scmp.lt.s32.totalorder %s5240_s21, 3 }
   0xb   : > { %s174_s28 = sshll.u32 %s7382_s1, 4  ;;  %s5242_s30 = smov [#allocation8]   ;;  %s175_s28 = int_to_ptr.hbm [resolvable:$true] %s174_s28 }
   0xc   : > { %p5322_p8 = pnand %p4911_p5, %p163_p7  ;;  %s176_s6 = sshll.u32 %s5242_s30, 4  ;;  %s177_s6 = int_to_ptr.vmem [resolvable:$true] %s176_s6 }
   0xd   : > { %s191_s9 = sshll.u32 %s7384_s3, 4  ;;  %s7387_s10 = smov 128   ;;  %s192_s9 = int_to_ptr.hbm [resolvable:$true] %s191_s9 }
   0xe   : > { %p4974_p9 = pneg %p5322_p8  ;;  %s5244_s11 = smov 8  }
   0xf   : > { %s5245_s12 = smov [#allocation10]   ;;  %s5341_s14 = sadd.s32 1, %s5240_s21  }
  0x10   : > { %p4975_p10 = pnand %p4974_p9, %p43_p1  ;;  %s193_s13 = sshll.u32 %s5245_s12, 4  ;;  %s194_s13 = int_to_ptr.vmem [resolvable:$true] %s193_s13 }
  0x11   : > { %s29_s15 = sadd.s32 1, %s5236_s20  ;;  %s26_s16 = ssub.s32 %s5240_s21, %s5341_s14 }
  0x12   : > { %4977 = dma.hbm_to_vmem [thread:$0]  (!%p4975_p10), %s175_s28, 18432, %s177_s6, [#allocation9], %s7387_s10, %s7387_s10, %s5244_s11  }
  0x13   : > { %4980 = dma.hbm_to_vmem [thread:$0]  (!%p4975_p10), %s192_s9, 18432, %s194_s13, [#allocation9], %s7387_s10, %s7387_s10, %s5244_s11  }
  0x14   : > { %p36_p12 = scmp.ne.s32.totalorder %s5236_s20, %s5232_s19  ;;  %p27_p13 = scmp.eq.s32.totalorder %s26_s16, 0 }
  0x15   : > { %p37_p0 = scmp.eq.s32.totalorder %s5240_s21, 0  ;;  %p4991_p5 = scmp.lt.s32.totalorder %s5240_s21, 2 }
  0x16   : > { %p5351_p3 = por %p150_p2, %p36_p12  ;;  %s210_s26 = sand.u32 1, %s5236_s20  }
  0x17   : > { %s5357_s23 = scalar_select %p27_p13, %s5236_s20, %s29_s15  }
  0x18   : > { %p38_p7 = por %p37_p0, %p36_p12  ;;  %s4915_s27 = sshll.u32 %s210_s26, 8 }
  0x19   : > { %s4928_s28 = sshll.u32 %s5240_s21, 8  ;;  %s214_s8 = scalar_lea.vmem [#allocation5], %s4915_s27 }
  0x1a   : > { %s219_s7 = scalar_lea.hbm %s7381_s0, %s4928_s28  ;;  %s222_s9 = sshll.u32 %s214_s8, 4  ;;  %s223_s9 = int_to_ptr.vmem [resolvable:$true] %s222_s9 }
  0x1b   : > { %s220_s12 = sshll.u32 %s219_s7, 4  ;;  %p5364_p2 = pnand %p4991_p5, %p38_p7  ;;  %s221_s12 = int_to_ptr.hbm [resolvable:$true] %s220_s12 }
  0x1c   : > { %s211_s15 = scalar_lea.sflag [#allocation6], %s210_s26  ;;  %s5140_s16 = sshra.s32 %s221_s12, 4  ;;  %s5141_s16 = int_to_ptr.hbm [resolvable:$true] %s5140_s16 }
  0x1d   : > { %s5142_s10 = scalar_lea.hbm %s5141_s16, 256  ;;  %p5144_p10 = pneg %p5364_p2 }
  0x1e   : > { %p5143_p9 = scmp.ne.s32.totalorder %s5141_s16, %s5142_s10  ;;  %s5147_s30 = scalar_lea.hbm %s7381_s0, 512 }
  0x1f   : > { %p5148_p0 = scmp.lt.s32.totalorder %s5141_s16, %s7381_s0  ;;  %p5149_p5 = scmp.lt.s32.totalorder %s5147_s30, %s5142_s10 }
  0x20   : > { %p5145_p12 = pnand %p5144_p10, %p5143_p9 }
  0x21   : > { %p5150_p7 = por %p5149_p5, %p5148_p0 }
  0x22   : > { %p5146_p13 = pneg %p5145_p12 }
  0x24   : > { %p5151_p11 = pnand %p5150_p7, %p5146_p13 }
  0x26   : > { %5154 = shalt.err (!%p5151_p11)
}
  0x27   : > { %s7398_s26 = smov 128   ;;  %234 = sbr.rel (%p5322_p8) target bundleno = 1549 (0x60d), region = 40 }
  0x28   : > { %4984 = dma.hbm_to_vmem [thread:$0]  (!%p5364_p2), %s221_s12, 4096, %s223_s9, %s211_s15, %s7398_s26, %s7398_s26, %s5244_s11  }
  0x2c   : > { %s5384_s8 = sand.u32 1, %s5232_s19  }
  0x2d   : > { %s4919_s10 = sshll.u32 %s5384_s8, 8  ;;  %s237_s16 = scalar_lea.sflag [#allocation6], %s5384_s8 }
  0x2e   : > { %s5390_s28 = scalar_lea.vmem [#allocation5], %s4919_s10 }
  0x2f   : > { %5215 = dma.done.wait (%p5309_p4), %s237_s16, 4096  }
  0x30   : > { %5217 = vsyncadd (%p5309_p4), %s237_s16, 4294963200 }
  0x31   : > { %5219 = dma.done.wait (%p43_p1), [#allocation9], 36864  }
  0x32   : > { %5221 = vsyncadd (%p43_p1), [#allocation9], 4294930432  ;;  %v5246_v0 = vmov 0.0   ;;  %v1342_v1 = vld [vmem:[#allocation8 + $0x78] sm:$0xff]  ;;  %v1341_v3 = vld [vmem:[#allocation8 + $0x70] sm:$0xff]  ;;  %s7220_s30 = scalar_lea.vmem [#allocation11], %s4919_s10 }
  0x33   : > { %310 = vst [vmem:[#allocation2] sm:$0xff] %v5246_v0  ;;  %v1358_v2 = vld [vmem:[#allocation8 + $0xf8] sm:$0xff]  ;;  %1475 = vmatpush.msra.mxu0 %v1342_v1  ;;  %4930 = vmatpush.msra.mxu2 %v1342_v1  ;;  %v1357_v4 = vld [vmem:[#allocation8 + $0xf0] sm:$0xff]  ;;  %v1340_v5 = vld [vmem:[#allocation8 + $0x68] sm:$0xff]  ;;  %s4929_s6 = sshll.u32 %s5300_s22, 8  ;;  %s4815_s16 = sshll.u32 %s7220_s30, 4  ;;  %s4816_s16 = int_to_ptr.vmem [resolvable:$true] %s4815_s16 }
  0x34   : > { %323 = vst [vmem:[#allocation2] sm:$0x1] %v5246_v0  ;;  %4946 = vmatpush.msra.mxu3 %v1358_v2  ;;  %1588 = vmatpush.msra.mxu1 %v1358_v2  ;;  %v1356_v6 = vld [vmem:[#allocation8 + $0xe8] sm:$0xff]  ;;  %v1339_v7 = vld [vmem:[#allocation8 + $0x60] sm:$0xff]  ;;  %v1338_v9 = vld [vmem:[#allocation8 + $0x58] sm:$0xff]  ;;  %s4814_s10 = scalar_lea.hbm %s7386_s5, %s4929_s6  ;;  %s4803_s22 = scalar_lea.sflag [#allocation7], %s5384_s8 }
  0x35   : > { %311 = vst [vmem:[#allocation2 + $0x8] sm:$0xff] %v5246_v0  ;;  %1476 = vmatpush.msra.mxu0 %v1341_v3  ;;  %4931 = vmatpush.msra.mxu2 %v1341_v3  ;;  %v1355_v8 = vld [vmem:[#allocation8 + $0xe0] sm:$0xff]  ;;  %v1354_v10 = vld [vmem:[#allocation8 + $0xd8] sm:$0xff]  ;;  %v1337_v11 = vld [vmem:[#allocation8 + $0x50] sm:$0xff]  ;;  %s5190_s12 = scalar_lea.hbm %s7386_s5, 512 }
  0x36   : > { %315 = vst [vmem:[#allocation2 + $0x248] sm:$0xff] %v5246_v0  ;;  %4947 = vmatpush.msra.mxu3 %v1357_v4  ;;  %1589 = vmatpush.msra.mxu1 %v1357_v4  ;;  %v1353_v12 = vld [vmem:[#allocation8 + $0xd0] sm:$0xff]  ;;  %v1336_v13 = vld [vmem:[#allocation8 + $0x48] sm:$0xff]  ;;  %v1335_v15 = vld [vmem:[#allocation8 + $0x40] sm:$0xff] }
  0x37   : > { %317 = vst [vmem:[#allocation2 + $0x110] sm:$0xff] %v5246_v0  ;;  %1477 = vmatpush.msra.mxu0 %v1340_v5  ;;  %4932 = vmatpush.msra.mxu2 %v1340_v5  ;;  %v1352_v14 = vld [vmem:[#allocation8 + $0xc8] sm:$0xff]  ;;  %v1351_v16 = vld [vmem:[#allocation8 + $0xc0] sm:$0xff]  ;;  %v1334_v17 = vld [vmem:[#allocation8 + $0x38] sm:$0xff] }
  0x38   : > { %4948 = vmatpush.msra.mxu3 %v1356_v6  ;;  %1590 = vmatpush.msra.mxu1 %v1356_v6  ;;  %322 = vst [vmem:[#allocation2 + $0x358] sm:$0xff] %v5246_v0  ;;  %v1350_v18 = vld [vmem:[#allocation8 + $0xb8] sm:$0xff]  ;;  %v1333_v19 = vld [vmem:[#allocation8 + $0x30] sm:$0xff]  ;;  %v1332_v21 = vld [vmem:[#allocation8 + $0x28] sm:$0xff] }
  0x39   : > { %1478 = vmatpush.msra.mxu0 %v1339_v7  ;;  %4933 = vmatpush.msra.mxu2 %v1339_v7  ;;  %324 = vst [vmem:[#allocation2 + $0x10] sm:$0x1] %v5246_v0  ;;  %v1349_v20 = vld [vmem:[#allocation8 + $0xb0] sm:$0xff]  ;;  %v1348_v22 = vld [vmem:[#allocation8 + $0xa8] sm:$0xff]  ;;  %v1331_v23 = vld [vmem:[#allocation8 + $0x20] sm:$0xff] }
  0x3a   : > { %4949 = vmatpush.msra.mxu3 %v1355_v8  ;;  %1591 = vmatpush.msra.mxu1 %v1355_v8  ;;  %325 = vst [vmem:[#allocation2 + $0x20] sm:$0x1] %v5246_v0  ;;  %v1347_v24 = vld [vmem:[#allocation8 + $0xa0] sm:$0xff]  ;;  %v1330_v25 = vld [vmem:[#allocation8 + $0x18] sm:$0xff]  ;;  %v1329_v27 = vld [vmem:[#allocation8 + $0x10] sm:$0xff] }
  0x3b   : > { %1479 = vmatpush.msra.mxu0 %v1338_v9  ;;  %4934 = vmatpush.msra.mxu2 %v1338_v9  ;;  %326 = vst [vmem:[#allocation2 + $0x30] sm:$0x1] %v5246_v0  ;;  %v1346_v26 = vld [vmem:[#allocation8 + $0x98] sm:$0xff]  ;;  %v1345_v28 = vld [vmem:[#allocation8 + $0x90] sm:$0xff]  ;;  %v1328_v29 = vld [vmem:[#allocation8 + $0x8] sm:$0xff] }
  0x3c   : > { %4950 = vmatpush.msra.mxu3 %v1354_v10  ;;  %1592 = vmatpush.msra.mxu1 %v1354_v10  ;;  %327 = vst [vmem:[#allocation2 + $0x40] sm:$0x1] %v5246_v0  ;;  %v1344_v30 = vld [vmem:[#allocation8 + $0x88] sm:$0xff]  ;;  %v1327_v31 = vld [vmem:[#allocation8] sm:$0xff]  ;;  %v5433_v34 = vld [vmem:[%s5390_s28 + $0x70] sm:$0xff] }
  0x3d   : > { %1480 = vmatpush.msra.mxu0 %v1337_v11  ;;  %4935 = vmatpush.msra.mxu2 %v1337_v11  ;;  %328 = vst [vmem:[#allocation2 + $0x50] sm:$0x1] %v5246_v0  ;;  %v1343_v32 = vld [vmem:[#allocation8 + $0x80] sm:$0xff]  ;;  %v5458_v35 = vld [vmem:[%s5390_s28 + $0x78] sm:$0xff]  ;;  %v1373_v40 = vld [vmem:[#allocation8 + $0x170] sm:$0xff] }
  0x3e   : > { %4951 = vmatpush.msra.mxu3 %v1353_v12  ;;  %1593 = vmatpush.msra.mxu1 %v1353_v12  ;;  %329 = vst [vmem:[#allocation2 + $0x60] sm:$0x1] %v5246_v0  ;;  %v459_v33 = vld [vmem:[#allocation2] sm:$0xff]  ;;  %v1374_v36 = vld [vmem:[#allocation8 + $0x178] sm:$0xff]  ;;  %v1389_v41 = vld [vmem:[#allocation8 + $0x1f0] sm:$0xff] }
  0x3f   : > { %1481 = vmatpush.msra.mxu0 %v1336_v13  ;;  %4936 = vmatpush.msra.mxu2 %v1336_v13  ;;  %330 = vst [vmem:[#allocation2 + $0x70] sm:$0x1] %v5246_v0  ;;  %v1390_v37 = vld [vmem:[#allocation8 + $0x1f8] sm:$0xff]  ;;  %v5472_v38 = vld [vmem:[%s5390_s28] sm:$0xff]  ;;  %v5488_v43 = vld [vmem:[%s5390_s28 + $0x8] sm:$0xff] }
  0x40   : > { %4952 = vmatpush.msra.mxu3 %v1352_v14  ;;  %1594 = vmatpush.msra.mxu1 %v1352_v14  ;;  %331 = vst [vmem:[#allocation2 + $0x80] sm:$0x1] %v5246_v0  ;;  %v5475_v39 = vld [vmem:[%s5390_s28 + $0x80] sm:$0xff]  ;;  %v1406_v42 = vld [vmem:[#allocation8 + $0x278] sm:$0xff]  ;;  %v5491_v44 = vld [vmem:[%s5390_s28 + $0x88] sm:$0xff] }
  0x41   : > { %1482 = vmatpush.msra.mxu0 %v1335_v15  ;;  %4937 = vmatpush.msra.mxu2 %v1335_v15  ;;  %332 = vst [vmem:[#allocation2 + $0x90] sm:$0x1] %v5246_v0  ;;  %v1372_v45 = vld [vmem:[#allocation8 + $0x168] sm:$0xff]  ;;  %v1405_v47 = vld [vmem:[#allocation8 + $0x270] sm:$0xff]  ;;  %v1371_v50 = vld [vmem:[#allocation8 + $0x160] sm:$0xff] }
  0x42   : > { %4953 = vmatpush.msra.mxu3 %v1351_v16  ;;  %1595 = vmatpush.msra.mxu1 %v1351_v16  ;;  %333 = vst [vmem:[#allocation2 + $0xa0] sm:$0x1] %v5246_v0  ;;  %v1388_v46 = vld [vmem:[#allocation8 + $0x1e8] sm:$0xff]  ;;  %v5504_v48 = vld [vmem:[%s5390_s28 + $0x10] sm:$0xff]  ;;  %v1387_v51 = vld [vmem:[#allocation8 + $0x1e0] sm:$0xff] }
  0x43   : > { %1483 = vmatpush.msra.mxu0 %v1334_v17  ;;  %4938 = vmatpush.msra.mxu2 %v1334_v17  ;;  %334 = vst [vmem:[#allocation2 + $0xb0] sm:$0x1] %v5246_v0  ;;  %v5507_v49 = vld [vmem:[%s5390_s28 + $0x90] sm:$0xff]  ;;  %v1404_v52 = vld [vmem:[#allocation8 + $0x268] sm:$0xff]  ;;  %v5520_v54 = vld [vmem:[%s5390_s28 + $0x18] sm:$0xff] }
  0x44   : > { %4954 = vmatpush.msra.mxu3 %v1350_v18  ;;  %1596 = vmatpush.msra.mxu1 %v1350_v18  ;;  %335 = vst [vmem:[#allocation2 + $0xc0] sm:$0x1] %v5246_v0  ;;  %v5523_v55 = vld [vmem:[%s5390_s28 + $0x98] sm:$0xff]  ;;  %v1403_v58 = vld [vmem:[#allocation8 + $0x260] sm:$0xff]  ;;  %v1369_v61 = vld [vmem:[#allocation8 + $0x150] sm:$0xff] }
  0x45   : > { %1484 = vmatpush.msra.mxu0 %v1333_v19  ;;  %4939 = vmatpush.msra.mxu2 %v1333_v19  ;;  %336 = vst [vmem:[#allocation2 + $0xd0] sm:$0x1] %v5246_v0  ;;  %v1370_v56 = vld [vmem:[#allocation8 + $0x158] sm:$0xff]  ;;  %v5535_v60 = vld [vmem:[%s5390_s28 + $0xa0] sm:$0xff]  ;;  %v1385_v62 = vld [vmem:[#allocation8 + $0x1d0] sm:$0xff] }
  0x46   : > { %4955 = vmatpush.msra.mxu3 %v1349_v20  ;;  %1597 = vmatpush.msra.mxu1 %v1349_v20  ;;  %337 = vst [vmem:[#allocation2 + $0xe0] sm:$0x1] %v5246_v0  ;;  %v1386_v57 = vld [vmem:[#allocation8 + $0x1d8] sm:$0xff]  ;;  %v5554_v3 = vld [vmem:[%s5390_s28 + $0xa8] sm:$0xff]  ;;  %v1401_v7 = vld [vmem:[#allocation8 + $0x250] sm:$0xff] }
  0x47   : > { %1485 = vmatpush.msra.mxu0 %v1332_v21  ;;  %4940 = vmatpush.msra.mxu2 %v1332_v21  ;;  %338 = vst [vmem:[#allocation2 + $0xf0] sm:$0x1] %v5246_v0  ;;  %v1402_v63 = vld [vmem:[#allocation8 + $0x258] sm:$0xff]  ;;  %v1368_v5 = vld [vmem:[#allocation8 + $0x148] sm:$0xff]  ;;  %v300_v11 = vld [vmem:[%s5390_s28 + $0xb0] sm:$0xff] }
  0x48   : > { %4956 = vmatpush.msra.mxu3 %v1348_v22  ;;  %339 = vst [vmem:[#allocation2 + $0x100] sm:$0x1] %v5246_v0  ;;  %1598 = vmatpush.msra.mxu1 %v1348_v22  ;;  %v1384_v6 = vld [vmem:[#allocation8 + $0x1c8] sm:$0xff]  ;;  %v1367_v12 = vld [vmem:[#allocation8 + $0x140] sm:$0xff]  ;;  %v5578_v15 = vld [vmem:[%s5390_s28 + $0x30] sm:$0xff] }
  0x49   : > { %1486 = vmatpush.msra.mxu0 %v1331_v23  ;;  %4941 = vmatpush.msra.mxu2 %v1331_v23  ;;  %343 = vst [vmem:[#allocation2 + $0x25f] sm:$0x1] %v5246_v0  ;;  %v5562_v8 = vld [vmem:[%s5390_s28 + $0x28] sm:$0xff]  ;;  %v1383_v13 = vld [vmem:[#allocation8 + $0x1c0] sm:$0xff]  ;;  %v301_v18 = vld [vmem:[%s5390_s28 + $0xb8] sm:$0xff] }
  0x4a   : > { %4957 = vmatpush.msra.mxu3 %v1347_v24  ;;  %344 = vst [vmem:[#allocation2 + $0x26f] sm:$0x1] %v5246_v0  ;;  %1599 = vmatpush.msra.mxu1 %v1347_v24  ;;  %v1400_v14 = vld [vmem:[#allocation8 + $0x248] sm:$0xff]  ;;  %v1366_v19 = vld [vmem:[#allocation8 + $0x138] sm:$0xff]  ;;  %v1399_v21 = vld [vmem:[#allocation8 + $0x240] sm:$0xff] }
  0x4b   : > { %1487 = vmatpush.msra.mxu0 %v1330_v25  ;;  %4942 = vmatpush.msra.mxu2 %v1330_v25  ;;  %345 = vst [vmem:[#allocation2 + $0x27f] sm:$0x1] %v5246_v0  ;;  %v1382_v20 = vld [vmem:[#allocation8 + $0x1b8] sm:$0xff]  ;;  %v302_v24 = vld [vmem:[%s5390_s28 + $0xc0] sm:$0xff] }
  0x4c   : > { %4958 = vmatpush.msra.mxu3 %v1346_v26  ;;  %346 = vst [vmem:[#allocation2 + $0x28f] sm:$0x1] %v5246_v0  ;;  %1600 = vmatpush.msra.mxu1 %v1346_v26  ;;  %v5594_v22 = vld [vmem:[%s5390_s28 + $0x38] sm:$0xff]  ;;  %v1365_v26 = vld [vmem:[#allocation8 + $0x130] sm:$0xff] }
  0x4d   : > { %1488 = vmatpush.msra.mxu0 %v1329_v27  ;;  %4943 = vmatpush.msra.mxu2 %v1329_v27  ;;  %347 = vst [vmem:[#allocation2 + $0x29f] sm:$0x1] %v5246_v0  ;;  %v1381_v27 = vld [vmem:[#allocation8 + $0x1b0] sm:$0xff] }
  0x4e   : > { %4959 = vmatpush.msra.mxu3 %v1345_v28  ;;  %348 = vst [vmem:[#allocation2 + $0x2af] sm:$0x1] %v5246_v0  ;;  %1601 = vmatpush.msra.mxu1 %v1345_v28  ;;  %v1398_v28 = vld [vmem:[#allocation8 + $0x238] sm:$0xff] }
  0x4f   : > { %1489 = vmatpush.msra.mxu0 %v1328_v29  ;;  %4944 = vmatpush.msra.mxu2 %v1328_v29  ;;  %349 = vst [vmem:[#allocation2 + $0x2bf] sm:$0x1] %v5246_v0  ;;  %v5610_v29 = vld [vmem:[%s5390_s28 + $0x40] sm:$0xff] }
  0x50   : > { %4960 = vmatpush.msra.mxu3 %v1344_v30  ;;  %350 = vst [vmem:[#allocation2 + $0x2cf] sm:$0x1] %v5246_v0  ;;  %1602 = vmatpush.msra.mxu1 %v1344_v30 }
  0x51   : > { %1490 = vmatpush.msra.mxu0 %v1327_v31  ;;  %4945 = vmatpush.msra.mxu2 %v1327_v31  ;;  %351 = vst [vmem:[#allocation2 + $0x2df] sm:$0x1] %v5246_v0 }
  0x52   : > { %4961 = vmatpush.msra.mxu3 %v1343_v32  ;;  %1491 = vmatmul.f32.vlgmr.msra.gmra.mxu0 %v459_v33  ;;  %352 = vst [vmem:[#allocation2 + $0x2ef] sm:$0x1] %v5246_v0  ;;  %v1364_v33 = vld [vmem:[#allocation8 + $0x128] sm:$0xff] }
  0x53   : > { %353 = vst [vmem:[#allocation2 + $0x2ff] sm:$0x1] %v5246_v0  ;;  %1652 = vmatmul.f32.vlgmr.msra.gmra.mxu3 %v5433_v34  ;;  %1603 = vmatpush.msra.mxu1 %v1343_v32  ;;  %v303_v32 = vld [vmem:[%s5390_s28 + $0xc8] sm:$0xff] }
  0x54   : > { %354 = vst [vmem:[#allocation2 + $0x30f] sm:$0x1] %v5246_v0  ;;  %1604 = vmatmul.f32.vlgmr.msra.gmra.mxu1 %v5246_v0  ;;  %1701 = vmatpush.msrb.mxu2 %v1374_v36  ;;  %v5621_v36 = vld [vmem:[%s5390_s28 + $0x48] sm:$0xff] }
  0x55   : > { %355 = vst [vmem:[#allocation2 + $0x31f] sm:$0x1] %v5246_v0  ;;  %1814 = vmatpush.msrb.mxu3 %v1390_v37  ;;  %1927 = vmatpush.msrb.mxu0 %v1406_v42  ;;  %v1379_v42 = vld [vmem:[#allocation8 + $0x1a0] sm:$0xff] }
  0x56   : > { %356 = vst [vmem:[#allocation2 + $0x32f] sm:$0x1] %v5246_v0  ;;  %1702 = vmatpush.msrb.mxu2 %v1373_v40  ;;  %v304_v40 = vld [vmem:[%s5390_s28 + $0xd0] sm:$0xff] }
  0x57   : > { %357 = vst [vmem:[#allocation2 + $0x33f] sm:$0x1] %v5246_v0  ;;  %1815 = vmatpush.msrb.mxu3 %v1389_v41  ;;  %1928 = vmatpush.msrb.mxu0 %v1405_v47  ;;  %v1363_v41 = vld [vmem:[#allocation8 + $0x120] sm:$0xff]  ;;  %v305_v47 = vld [vmem:[%s5390_s28 + $0xd8] sm:$0xff] }
  0x58   : > { %358 = vst [vmem:[#allocation2 + $0x34f] sm:$0x1] %v5246_v0  ;;  %1703 = vmatpush.msrb.mxu2 %v1372_v45  ;;  %v5633_v45 = vld [vmem:[%s5390_s28 + $0x50] sm:$0xff] }
  0x59   : > { %2524 = vst [vmem:[#allocation3] sm:$0xff] %v5246_v0  ;;  %1816 = vmatpush.msrb.mxu3 %v1388_v46  ;;  %1929 = vmatpush.msrb.mxu0 %v1404_v52  ;;  %v1395_v52 = vld [vmem:[#allocation8 + $0x220] sm:$0xff] }
  0x5a   : > { %1494 = vmatmul.f32.gmra.mxu0 %v5246_v0  ;;  %2529 = vst [vmem:[#allocation3 + $0x248] sm:$0xff] %v5246_v0  ;;  %1704 = vmatpush.msrb.mxu2 %v1371_v50  ;;  %v1362_v50 = vld [vmem:[#allocation8 + $0x118] sm:$0xff] }
  0x5b   : > { %2531 = vst [vmem:[#allocation3 + $0x110] sm:$0xff] %v5246_v0  ;;  %1655 = vmatmul.f32.gmra.mxu3 %v5458_v35  ;;  %1930 = vmatpush.msrb.mxu0 %v1403_v58  ;;  %v306_v58 = vld [vmem:[%s5390_s28 + $0xe0] sm:$0xff] }
  0x5c   : > { %1607 = vmatmul.f32.gmra.mxu1 %v5246_v0  ;;  %2536 = vst [vmem:[#allocation3 + $0x358] sm:$0xff] %v5246_v0  ;;  %1817 = vmatpush.msrb.mxu3 %v1387_v51  ;;  %v1378_v51 = vld [vmem:[#allocation8 + $0x198] sm:$0xff] }
  0x5d   : > { %2538 = vst [vmem:[#allocation3 + $0x10] sm:$0x1] %v5246_v0  ;;  %1705 = vmatpush.msrb.mxu2 %v1370_v56  ;;  %1931 = vmatpush.msrb.mxu0 %v1402_v63  ;;  %v1421_v63 = vld [vmem:[#allocation8 + $0x2f0] sm:$0xff] }
  0x5e   : > { %2539 = vst [vmem:[#allocation3 + $0x20] sm:$0x1] %v5246_v0  ;;  %1818 = vmatpush.msrb.mxu3 %v1386_v57  ;;  %v5656_v57 = vld [vmem:[%s5390_s28 + $0x60] sm:$0xff] }
  0x5f   : > { %2540 = vst [vmem:[#allocation3 + $0x30] sm:$0x1] %v5246_v0  ;;  %1706 = vmatpush.msrb.mxu2 %v1369_v61  ;;  %1932 = vmatpush.msrb.mxu0 %v1401_v7  ;;  %v1394_v61 = vld [vmem:[#allocation8 + $0x218] sm:$0xff]  ;;  %v1360_v7 = vld [vmem:[#allocation8 + $0x108] sm:$0xff] }
  0x60   : > { %2541 = vst [vmem:[#allocation3 + $0x40] sm:$0x1] %v5246_v0  ;;  %1819 = vmatpush.msrb.mxu3 %v1385_v62  ;;  %v1422_v62 = vld [vmem:[#allocation8 + $0x2f8] sm:$0xff] }
  0x61   : > { %2542 = vst [vmem:[#allocation3 + $0x50] sm:$0x1] %v5246_v0  ;;  %1707 = vmatpush.msrb.mxu2 %v1368_v5  ;;  %1933 = vmatpush.msrb.mxu0 %v1400_v14  ;;  %v5667_v5 = vld [vmem:[%s5390_s28 + $0x68] sm:$0xff]  ;;  %v1418_v14 = vld [vmem:[#allocation8 + $0x2d8] sm:$0xff] }
  0x62   : > { %2543 = vst [vmem:[#allocation3 + $0x60] sm:$0x1] %v5246_v0  ;;  %1820 = vmatpush.msrb.mxu3 %v1384_v6  ;;  %2040 = vmatpush.msrb.mxu1 %v1422_v62  ;;  %v307_v6 = vld [vmem:[%s5390_s28 + $0xe8] sm:$0xff]  ;;  %v1453_v62 = vld [vmem:[#allocation8 + $0x3f0] sm:$0xff] }
  0x63   : > { %2544 = vst [vmem:[#allocation3 + $0x70] sm:$0x1] %v5246_v0  ;;  %1658 = vmatmul.f32.gmra.mxu3 %v5475_v39  ;;  %1708 = vmatpush.msrb.mxu2 %v1367_v12  ;;  %v1393_v12 = vld [vmem:[#allocation8 + $0x210] sm:$0xff] }
  0x64   : > { %2545 = vst [vmem:[#allocation3 + $0x80] sm:$0x1] %v5246_v0  ;;  %1610 = vmatmul.f32.gmra.mxu1 %v5472_v38  ;;  %1821 = vmatpush.msrb.mxu3 %v1383_v13  ;;  %v1419_v13 = vld [vmem:[#allocation8 + $0x2e0] sm:$0xff] }
  0x65   : > { %2546 = vst [vmem:[#allocation3 + $0x90] sm:$0x1] %v5246_v0  ;;  %1709 = vmatpush.msrb.mxu2 %v1366_v19  ;;  %1934 = vmatpush.msrb.mxu0 %v1399_v21  ;;  %v1416_v21 = vld [vmem:[#allocation8 + $0x2c8] sm:$0xff] }
  0x66   : > { %2547 = vst [vmem:[#allocation3 + $0xa0] sm:$0x1] %v5246_v0  ;;  %1822 = vmatpush.msrb.mxu3 %v1382_v20  ;;  %2041 = vmatpush.msrb.mxu1 %v1421_v63  ;;  %v1359_v20 = vld [vmem:[#allocation8 + $0x100] sm:$0xff] }
  0x67   : > { %2548 = vst [vmem:[#allocation3 + $0xb0] sm:$0x1] %v5246_v0  ;;  %1710 = vmatpush.msrb.mxu2 %v1365_v26  ;;  %1935 = vmatpush.msrb.mxu0 %v1398_v28  ;;  %v1415_v26 = vld [vmem:[#allocation8 + $0x2c0] sm:$0xff] }
  0x68   : > { %2549 = vst [vmem:[#allocation3 + $0xc0] sm:$0x1] %v5246_v0  ;;  %1823 = vmatpush.msrb.mxu3 %v1381_v27  ;;  %v1414_v27 = vld [vmem:[#allocation8 + $0x2b8] sm:$0xff]  ;;  %v1391_v28 = vld [vmem:[#allocation8 + $0x200] sm:$0xff] }
  0x69   : > { %2550 = vst [vmem:[#allocation3 + $0xd0] sm:$0x1] %v5246_v0  ;;  %1711 = vmatpush.msrb.mxu2 %v1364_v33 }
  0x6a   : > { %2551 = vst [vmem:[#allocation3 + $0xe0] sm:$0x1] %v5246_v0 }
  0x6b   : > { %2552 = vst [vmem:[#allocation3 + $0xf0] sm:$0x1] %v5246_v0  ;;  %1661 = vmatmul.f32.gmra.mxu3 %v5491_v44  ;;  %1712 = vmatpush.msrb.mxu2 %v1363_v41  ;;  %v1411_v41 = vld [vmem:[#allocation8 + $0x2a0] sm:$0xff] }
  0x6c   : > { %2553 = vst [vmem:[#allocation3 + $0x100] sm:$0x1] %v5246_v0  ;;  %1613 = vmatmul.f32.gmra.mxu1 %v5488_v43 }
  0x6d   : > { %2557 = vst [vmem:[#allocation3 + $0x25f] sm:$0x1] %v5246_v0  ;;  %1713 = vmatpush.msrb.mxu2 %v1362_v50  ;;  %v1408_v50 = vld [vmem:[#allocation8 + $0x288] sm:$0xff] }
  0x6e   : > { %2558 = vst [vmem:[#allocation3 + $0x26f] sm:$0x1] %v5246_v0 }
  0x6f   : > { %2559 = vst [vmem:[#allocation3 + $0x27f] sm:$0x1] %v5246_v0 }
  0x70   : > { %2560 = vst [vmem:[#allocation3 + $0x28f] sm:$0x1] %v5246_v0 }
  0x71   : > { %2561 = vst [vmem:[#allocation3 + $0x29f] sm:$0x1] %v5246_v0 }
  0x72   : > { %2562 = vst [vmem:[#allocation3 + $0x2af] sm:$0x1] %v5246_v0 }
  0x73   : > { %2563 = vst [vmem:[#allocation3 + $0x2bf] sm:$0x1] %v5246_v0  ;;  %1664 = vmatmul.f32.gmra.mxu3 %v5507_v49 }
  0x74   : > { %2564 = vst [vmem:[#allocation3 + $0x2cf] sm:$0x1] %v5246_v0  ;;  %1616 = vmatmul.f32.gmra.mxu1 %v5504_v48 }
  0x75   : > { %2565 = vst [vmem:[#allocation3 + $0x2df] sm:$0x1] %v5246_v0 }
  0x76   : > { %2566 = vst [vmem:[#allocation3 + $0x2ef] sm:$0x1] %v5246_v0 }
  0x77   : > { %2567 = vst [vmem:[#allocation3 + $0x2ff] sm:$0x1] %v5246_v0 }
  0x78   : > { %2568 = vst [vmem:[#allocation3 + $0x30f] sm:$0x1] %v5246_v0 }
  0x79   : > { %2569 = vst [vmem:[#allocation3 + $0x31f] sm:$0x1] %v5246_v0 }
  0x7a   : > { %2570 = vst [vmem:[#allocation3 + $0x32f] sm:$0x1] %v5246_v0 }
  0x7b   : > { %2571 = vst [vmem:[#allocation3 + $0x33f] sm:$0x1] %v5246_v0  ;;  %1667 = vmatmul.f32.gmra.mxu3 %v5523_v55 }
  0x7c   : > { %2572 = vst [vmem:[#allocation3 + $0x34f] sm:$0x1] %v5246_v0  ;;  %1619 = vmatmul.f32.gmra.mxu1 %v5520_v54 }
  0x7d   : > { %408 = vst [vmem:[#allocation2 + $0x81] sm:$0xff] %v5433_v34 }
  0x7e   : > { %340 = vst [vmem:[#allocation2 + $0x110] sm:$0x1] %v5246_v0 }
  0x7f   : > { %342 = vst [vmem:[#allocation2 + $0x24f] sm:$0x1] %v5246_v0 }
  0x80   : > { %359 = vst [vmem:[#allocation2 + $0x35f] sm:$0x1] %v5246_v0 }
  0x81   : > { %375 = vst [vmem:[#allocation2 + $0x1a0] sm:$0xff] %v5433_v34 }
  0x82   : > { %441 = vst [vmem:[#allocation2 + $0x2bf] sm:$0xfe] %v5433_v34  ;;  %v1380_v34 = vld [vmem:[#allocation8 + $0x1a8] sm:$0xff] }
  0x83   : > { %2537 = vst [vmem:[#allocation3] sm:$0x1] %v5246_v0  ;;  %1670 = vmatmul.f32.gmra.mxu3 %v5535_v60 }
  0x84   : > { %v475_v53 = vld [vmem:[#allocation2 + $0x80] sm:$0xff]  ;;  %2554 = vst [vmem:[#allocation3 + $0x110] sm:$0x1] %v5246_v0  ;;  %1824 = vmatpush.msrb.mxu3 %v1380_v34  ;;  %v1438_v34 = vld [vmem:[#allocation8 + $0x378] sm:$0xff] }
  0x85   : > { %1539 = vmatmul.f32.vlgmr.msra.gmra.mxu2 %v475_v53  ;;  %2556 = vst [vmem:[#allocation3 + $0x24f] sm:$0x1] %v5246_v0  ;;  %v5646_v53 = vld [vmem:[%s5390_s28 + $0x58] sm:$0xff] }
  0x86   : > { %2573 = vst [vmem:[#allocation3 + $0x35f] sm:$0x1] %v5246_v0  ;;  %v5541_v0 = vld [vmem:[%s5390_s28 + $0x20] sm:$0xff]  ;;  %1825 = vmatpush.msrb.mxu3 %v1379_v42  ;;  %v1410_v42 = vld [vmem:[#allocation8 + $0x298] sm:$0xff] }
  0x87   : > { %409 = vst [vmem:[#allocation2 + $0x89] sm:$0x7f] %v5458_v35  ;;  %1622 = vmatmul.f32.gmra.mxu1 %v5541_v0 }
  0x88   : > { %376 = vst [vmem:[#allocation2 + $0x1a8] sm:$0xff] %v5458_v35  ;;  %1826 = vmatpush.msrb.mxu3 %v1378_v51  ;;  %v1470_v51 = vld [vmem:[#allocation8 + $0x478] sm:$0xff] }
  0x89   : > { %442 = vst [vmem:[#allocation2 + $0x2c7] sm:$0xff] %v5458_v35  ;;  %v1397_v35 = vld [vmem:[#allocation8 + $0x230] sm:$0xff] }
  0x8a   : > { %394 = vst [vmem:[#allocation2 + $0x11] sm:$0xff] %v5472_v38  ;;  %1936 = vmatpush.msrb.mxu0 %v1397_v35  ;;  %v1412_v35 = vld [vmem:[#allocation8 + $0x2a8] sm:$0xff] }
  0x8b   : > { %427 = vst [vmem:[#allocation2 + $0x24f] sm:$0xfe] %v5472_v38  ;;  %1673 = vmatmul.f32.gmra.mxu3 %v5554_v3 }
  0x8c   : > { %410 = vst [vmem:[#allocation2 + $0x91] sm:$0xff] %v5475_v39 }
  0x8d   : > { %377 = vst [vmem:[#allocation2 + $0x1b0] sm:$0xff] %v5475_v39 }
  0x8e   : > { %v476_v59 = vld [vmem:[#allocation2 + $0x88] sm:$0xff]  ;;  %443 = vst [vmem:[#allocation2 + $0x2cf] sm:$0xfe] %v5475_v39 }
  0x8f   : > { %1542 = vmatmul.f32.gmra.mxu2 %v476_v59  ;;  %395 = vst [vmem:[#allocation2 + $0x19] sm:$0x7f] %v5488_v43  ;;  %1625 = vmatmul.f32.gmra.mxu1 %v5562_v8  ;;  %v1361_v59 = vld [vmem:[#allocation8 + $0x110] sm:$0xff] }
  0x90   : > { %362 = vst [vmem:[#allocation2 + $0x138] sm:$0xff] %v5488_v43  ;;  %1714 = vmatpush.msrb.mxu2 %v1361_v59 }
  0x91   : > { %v5543_v1 = vld [vmem:[#allocation2 + $0x10] sm:$0xff]  ;;  %428 = vst [vmem:[#allocation2 + $0x257] sm:$0xff] %v5488_v43 }
  0x92   : > { %1497 = vmatmul.f32.gmra.mxu0 %v5543_v1  ;;  %411 = vst [vmem:[#allocation2 + $0x99] sm:$0x7f] %v5491_v44  ;;  %1715 = vmatpush.msrb.mxu2 %v1360_v7 }
  0x93   : > { %v477_v2 = vld [vmem:[#allocation2 + $0x90] sm:$0xff]  ;;  %378 = vst [vmem:[#allocation2 + $0x1b8] sm:$0xff] %v5491_v44  ;;  %1676 = vmatmul.f32.gmra.mxu3 %v300_v11 }
  0x94   : > { %444 = vst [vmem:[#allocation2 + $0x2d7] sm:$0xff] %v5491_v44  ;;  %v1396_v44 = vld [vmem:[#allocation8 + $0x228] sm:$0xff]  ;;  %1716 = vmatpush.msrb.mxu2 %v1359_v20 }
  0x95   : > { %396 = vst [vmem:[#allocation2 + $0x21] sm:$0xff] %v5504_v48  ;;  %1937 = vmatpush.msrb.mxu0 %v1396_v44  ;;  %v1409_v44 = vld [vmem:[#allocation8 + $0x290] sm:$0xff]  ;;  %v1452_v20 = vld [vmem:[#allocation8 + $0x3e8] sm:$0xff] }
  0x96   : > { %v5556_v4 = vld [vmem:[#allocation2 + $0x18] sm:$0xff]  ;;  %363 = vst [vmem:[#allocation2 + $0x140] sm:$0xff] %v5504_v48  ;;  %2153 = vmatpush.msra.mxu2 %v1438_v34 }
  0x97   : > { %1545 = vmatmul.f32.gmra.mxu2 %v477_v2  ;;  %429 = vst [vmem:[#allocation2 + $0x25f] sm:$0xfe] %v5504_v48  ;;  %1628 = vmatmul.f32.gmra.mxu1 %v5578_v15 }
  0x98   : > { %412 = vst [vmem:[#allocation2 + $0xa1] sm:$0xff] %v5507_v49  ;;  %1938 = vmatpush.msrb.mxu0 %v1395_v52  ;;  %v1407_v52 = vld [vmem:[#allocation8 + $0x280] sm:$0xff] }
  0x99   : > { %379 = vst [vmem:[#allocation2 + $0x1c0] sm:$0xff] %v5507_v49  ;;  %v478_v9 = vld [vmem:[#allocation2 + $0x98] sm:$0xff] }
  0x9a   : > { %1500 = vmatmul.f32.gmra.mxu0 %v5556_v4  ;;  %445 = vst [vmem:[#allocation2 + $0x2df] sm:$0xfe] %v5507_v49 }
  0x9b   : > { %397 = vst [vmem:[#allocation2 + $0x29] sm:$0x7f] %v5520_v54  ;;  %1679 = vmatmul.f32.gmra.mxu3 %v301_v18  ;;  %1939 = vmatpush.msrb.mxu0 %v1394_v61 }
  0x9c   : > { %364 = vst [vmem:[#allocation2 + $0x148] sm:$0xff] %v5520_v54  ;;  %v5571_v10 = vld [vmem:[#allocation2 + $0x20] sm:$0xff] }
  0x9d   : > { %430 = vst [vmem:[#allocation2 + $0x267] sm:$0xff] %v5520_v54  ;;  %1940 = vmatpush.msrb.mxu0 %v1393_v12 }
  0x9e   : > { %413 = vst [vmem:[#allocation2 + $0xa9] sm:$0x7f] %v5523_v55 }
  0x9f   : > { %1548 = vmatmul.f32.gmra.mxu2 %v478_v9  ;;  %380 = vst [vmem:[#allocation2 + $0x1c8] sm:$0xff] %v5523_v55  ;;  %v479_v16 = vld [vmem:[#allocation2 + $0xa0] sm:$0xff]  ;;  %1631 = vmatmul.f32.gmra.mxu1 %v5594_v22  ;;  %v1420_v9 = vld [vmem:[#allocation8 + $0x2e8] sm:$0xff] }
  0xa0   : > { %446 = vst [vmem:[#allocation2 + $0x2e7] sm:$0xff] %v5523_v55  ;;  %2042 = vmatpush.msrb.mxu1 %v1420_v9  ;;  %v1469_v9 = vld [vmem:[#allocation8 + $0x470] sm:$0xff] }
  0xa1   : > { %398 = vst [vmem:[#allocation2 + $0x31] sm:$0xff] %v5541_v0 }
  0xa2   : > { %1503 = vmatmul.f32.gmra.mxu0 %v5571_v10  ;;  %365 = vst [vmem:[#allocation2 + $0x150] sm:$0xff] %v5541_v0  ;;  %v5587_v17 = vld [vmem:[#allocation2 + $0x28] sm:$0xff]  ;;  %2043 = vmatpush.msrb.mxu1 %v1419_v13  ;;  %v5704_v13 = vld [vmem:[%s7383_s2] ss:$0 sm:$0xff] }
  0xa3   : > { %431 = vst [vmem:[#allocation2 + $0x26f] sm:$0xfe] %v5541_v0  ;;  %1682 = vmatmul.f32.gmra.mxu3 %v302_v24 }
  0xa4   : > { %414 = vst [vmem:[#allocation2 + $0xb1] sm:$0xff] %v5535_v60  ;;  %2044 = vmatpush.msrb.mxu1 %v1418_v14  ;;  %v782_v12 = vld [vmem:[#allocation2 + $0x260] sm:$0xff] }
  0xa5   : > { %381 = vst [vmem:[#allocation2 + $0x1d0] sm:$0xff] %v5535_v60  ;;  %v480_v23 = vld [vmem:[#allocation2 + $0xa8] sm:$0xff] }
  0xa6   : > { %447 = vst [vmem:[#allocation2 + $0x2ef] sm:$0xfe] %v5535_v60  ;;  %v1377_v60 = vld [vmem:[#allocation8 + $0x190] sm:$0xff] }
  0xa7   : > { %1551 = vmatmul.f32.gmra.mxu2 %v479_v16  ;;  %399 = vst [vmem:[#allocation2 + $0x39] sm:$0x7f] %v5562_v8  ;;  %1634 = vmatmul.f32.gmra.mxu1 %v5610_v29  ;;  %v1417_v16 = vld [vmem:[#allocation8 + $0x2d0] sm:$0xff] }
  0xa8   : > { %366 = vst [vmem:[#allocation2 + $0x158] sm:$0xff] %v5562_v8  ;;  %v5605_v25 = vld [vmem:[#allocation2 + $0x30] sm:$0xff]  ;;  %1827 = vmatpush.msrb.mxu3 %v1377_v60  ;;  %2045 = vmatpush.msrb.mxu1 %v1417_v16  ;;  %v1436_v16 = vld [vmem:[#allocation8 + $0x368] sm:$0xff] }
  0xa9   : > { %432 = vst [vmem:[#allocation2 + $0x277] sm:$0xff] %v5562_v8  ;;  %v1437_v60 = vld [vmem:[#allocation8 + $0x370] sm:$0xff] }
  0xaa   : > { %1506 = vmatmul.f32.gmra.mxu0 %v5587_v17  ;;  %415 = vst [vmem:[#allocation2 + $0xb9] sm:$0x7f] %v5554_v3  ;;  %2046 = vmatpush.msrb.mxu1 %v1416_v21 }
  0xab   : > { %382 = vst [vmem:[#allocation2 + $0x1d8] sm:$0xff] %v5554_v3  ;;  %v481_v30 = vld [vmem:[#allocation2 + $0xb0] sm:$0xff]  ;;  %1685 = vmatmul.f32.gmra.mxu3 %v303_v32  ;;  %2154 = vmatpush.msra.mxu2 %v1437_v60 }
  0xac   : > { %448 = vst [vmem:[#allocation2 + $0x2f7] sm:$0xff] %v5554_v3  ;;  %2047 = vmatpush.msrb.mxu1 %v1415_v26  ;;  %v589_v26 = vld [vmem:[#allocation2 + $0x248] sm:$0xff] }
  0xad   : > { %400 = vst [vmem:[#allocation2 + $0x41] sm:$0xff] %v5578_v15  ;;  %2155 = vmatpush.msra.mxu2 %v1436_v16 }
  0xae   : > { %367 = vst [vmem:[#allocation2 + $0x160] sm:$0xff] %v5578_v15  ;;  %v5616_v31 = vld [vmem:[#allocation2 + $0x38] sm:$0xff]  ;;  %2048 = vmatpush.msrb.mxu1 %v1414_v27 }
  0xaf   : > { %1554 = vmatmul.f32.gmra.mxu2 %v480_v23  ;;  %433 = vst [vmem:[#allocation2 + $0x27f] sm:$0xfe] %v5578_v15  ;;  %1637 = vmatmul.f32.gmra.mxu1 %v5621_v36  ;;  %v1375_v23 = vld [vmem:[#allocation8 + $0x180] sm:$0xff] }
  0xb0   : > { %416 = vst [vmem:[#allocation2 + $0xc1] sm:$0xff] %v300_v11 }
  0xb1   : > { %383 = vst [vmem:[#allocation2 + $0x1e0] sm:$0xff] %v300_v11  ;;  %v482_v37 = vld [vmem:[#allocation2 + $0xb8] sm:$0xff] }
  0xb2   : > { %1509 = vmatmul.f32.gmra.mxu0 %v5605_v25  ;;  %449 = vst [vmem:[#allocation2 + $0x2ff] sm:$0xfe] %v300_v11  ;;  %v1376_v11 = vld [vmem:[#allocation8 + $0x188] sm:$0xff] }
  0xb3   : > { %401 = vst [vmem:[#allocation2 + $0x49] sm:$0x7f] %v5594_v22  ;;  %1688 = vmatmul.f32.gmra.mxu3 %v304_v40 }
  0xb4   : > { %368 = vst [vmem:[#allocation2 + $0x168] sm:$0xff] %v5594_v22  ;;  %v5628_v39 = vld [vmem:[#allocation2 + $0x40] sm:$0xff]  ;;  %1828 = vmatpush.msrb.mxu3 %v1376_v11 }
  0xb5   : > { %434 = vst [vmem:[#allocation2 + $0x287] sm:$0xff] %v5594_v22 }
  0xb6   : > { %417 = vst [vmem:[#allocation2 + $0xc9] sm:$0x7f] %v301_v18  ;;  %1829 = vmatpush.msrb.mxu3 %v1375_v23  ;;  %v783_v23 = vld [vmem:[#allocation2 + $0x268] sm:$0xff] }
  0xb7   : > { %1557 = vmatmul.f32.gmra.mxu2 %v481_v30  ;;  %384 = vst [vmem:[#allocation2 + $0x1e8] sm:$0xff] %v301_v18  ;;  %1640 = vmatmul.f32.gmra.mxu1 %v5633_v45  ;;  %v483_v46 = vld [vmem:[#allocation2 + $0xc0] sm:$0xff]  ;;  %v1413_v30 = vld [vmem:[#allocation8 + $0x2b0] sm:$0xff] }
  0xb8   : > { %450 = vst [vmem:[#allocation2 + $0x307] sm:$0xff] %v301_v18  ;;  %2049 = vmatpush.msrb.mxu1 %v1413_v30  ;;  %v1468_v30 = vld [vmem:[#allocation8 + $0x468] sm:$0xff] }
  0xb9   : > { %402 = vst [vmem:[#allocation2 + $0x51] sm:$0xff] %v5610_v29 }
  0xba   : > { %1512 = vmatmul.f32.gmra.mxu0 %v5616_v31  ;;  %369 = vst [vmem:[#allocation2 + $0x170] sm:$0xff] %v5610_v29  ;;  %v5641_v49 = vld [vmem:[#allocation2 + $0x48] sm:$0xff]  ;;  %2050 = vmatpush.msrb.mxu1 %v1412_v35 }
  0xbb   : > { %435 = vst [vmem:[#allocation2 + $0x28f] sm:$0xfe] %v5610_v29  ;;  %1691 = vmatmul.f32.gmra.mxu3 %v305_v47 }
  0xbc   : > { %418 = vst [vmem:[#allocation2 + $0xd1] sm:$0xff] %v302_v24  ;;  %2051 = vmatpush.msrb.mxu1 %v1411_v41 }
  0xbd   : > { %385 = vst [vmem:[#allocation2 + $0x1f0] sm:$0xff] %v302_v24  ;;  %v484_v55 = vld [vmem:[#allocation2 + $0xc8] sm:$0xff] }
  0xbe   : > { %451 = vst [vmem:[#allocation2 + $0x30f] sm:$0xfe] %v302_v24  ;;  %v1392_v24 = vld [vmem:[#allocation8 + $0x208] sm:$0xff]  ;;  %2052 = vmatpush.msrb.mxu1 %v1410_v42  ;;  %v1451_v42 = vld [vmem:[#allocation8 + $0x3e0] sm:$0xff] }
  0xbf   : > { %1560 = vmatmul.f32.gmra.mxu2 %v482_v37  ;;  %403 = vst [vmem:[#allocation2 + $0x59] sm:$0x7f] %v5621_v36  ;;  %1643 = vmatmul.f32.gmra.mxu1 %v5646_v53  ;;  %v1454_v37 = vld [vmem:[#allocation8 + $0x3f8] sm:$0xff] }
  0xc0   : > { %370 = vst [vmem:[#allocation2 + $0x178] sm:$0xff] %v5621_v36  ;;  %v5652_v56 = vld [vmem:[#allocation2 + $0x50] sm:$0xff]  ;;  %1941 = vmatpush.msrb.mxu0 %v1392_v24  ;;  %2266 = vmatpush.msra.mxu3 %v1454_v37 }
  0xc1   : > { %436 = vst [vmem:[#allocation2 + $0x297] sm:$0xff] %v5621_v36  ;;  %2053 = vmatpush.msrb.mxu1 %v1409_v44 }
  0xc2   : > { %1515 = vmatmul.f32.gmra.mxu0 %v5628_v39  ;;  %419 = vst [vmem:[#allocation2 + $0xd9] sm:$0x7f] %v303_v32  ;;  %2267 = vmatpush.msra.mxu3 %v1453_v62 }
  0xc3   : > { %386 = vst [vmem:[#allocation2 + $0x1f8] sm:$0xff] %v303_v32  ;;  %1694 = vmatmul.f32.gmra.mxu3 %v306_v58  ;;  %v485_v2 = vld [vmem:[#allocation2 + $0xd0] sm:$0xff]  ;;  %1942 = vmatpush.msrb.mxu0 %v1391_v28 }
  0xc4   : > { %452 = vst [vmem:[#allocation2 + $0x317] sm:$0xff] %v303_v32  ;;  %2054 = vmatpush.msrb.mxu1 %v1408_v50  ;;  %2268 = vmatpush.msra.mxu3 %v1452_v20  ;;  %v1466_v20 = vld [vmem:[#allocation8 + $0x458] sm:$0xff] }
  0xc5   : > { %404 = vst [vmem:[#allocation2 + $0x61] sm:$0xff] %v5633_v45  ;;  %2379 = vmatpush.msra.mxu0 %v1470_v51 }
  0xc6   : > { %371 = vst [vmem:[#allocation2 + $0x180] sm:$0xff] %v5633_v45  ;;  %v5664_v3 = vld [vmem:[#allocation2 + $0x58] sm:$0xff]  ;;  %2055 = vmatpush.msrb.mxu1 %v1407_v52  ;;  %2269 = vmatpush.msra.mxu3 %v1451_v42 }
  0xc7   : > { %1563 = vmatmul.f32.gmra.mxu2 %v483_v46  ;;  %437 = vst [vmem:[#allocation2 + $0x29f] sm:$0xfe] %v5633_v45  ;;  %1646 = vmatmul.f32.gmra.mxu1 %v5656_v57 }
  0xc8   : > { %420 = vst [vmem:[#allocation2 + $0xe1] sm:$0xff] %v304_v40  ;;  %2380 = vmatpush.msra.mxu0 %v1469_v9 }
  0xc9   : > { %387 = vst [vmem:[#allocation2 + $0x200] sm:$0xff] %v304_v40  ;;  %v486_v18 = vld [vmem:[#allocation2 + $0xd8] sm:$0xff] }
  0xca   : > { %1518 = vmatmul.f32.gmra.mxu0 %v5641_v49  ;;  %453 = vst [vmem:[#allocation2 + $0x31f] sm:$0xfe] %v304_v40 }
  0xcb   : > { %405 = vst [vmem:[#allocation2 + $0x69] sm:$0x7f] %v5646_v53  ;;  %1697 = vmatmul.f32.gmra.mxu3 %v307_v6  ;;  %2381 = vmatpush.msra.mxu0 %v1468_v30  ;;  %v1449_v30 = vld [vmem:[#allocation8 + $0x3d0] sm:$0xff] }
  0xcc   : > { %372 = vst [vmem:[#allocation2 + $0x188] sm:$0xff] %v5646_v53  ;;  %v5675_v19 = vld [vmem:[#allocation2 + $0x60] sm:$0xff] }
  0xcd   : > { %438 = vst [vmem:[#allocation2 + $0x2a7] sm:$0xff] %v5646_v53 }
  0xce   : > { %421 = vst [vmem:[#allocation2 + $0xe9] sm:$0x7f] %v305_v47 }
  0xcf   : > { %1566 = vmatmul.f32.gmra.mxu2 %v484_v55  ;;  %388 = vst [vmem:[#allocation2 + $0x208] sm:$0xff] %v305_v47  ;;  %1649 = vmatmul.f32.gmra.mxu1 %v5667_v5  ;;  %v487_v32 = vld [vmem:[#allocation2 + $0xe0] sm:$0xff] }
  0xd0   : > { %454 = vst [vmem:[#allocation2 + $0x327] sm:$0xff] %v305_v47 }
  0xd1   : > { %406 = vst [vmem:[#allocation2 + $0x71] sm:$0xff] %v5656_v57  ;;  %v5685_v47 = vpop.f32.mrf.mxu1 }
  0xd2   : > { %1521 = vmatmul.f32.gmra.mxu0 %v5652_v56  ;;  %373 = vst [vmem:[#allocation2 + $0x190] sm:$0xff] %v5656_v57  ;;  %v5679_v33 = vld [vmem:[#allocation2 + $0x68] sm:$0xff] }
  0xd3   : > { %439 = vst [vmem:[#allocation2 + $0x2af] sm:$0xfe] %v5656_v57  ;;  %1830 = vmatmul.f32.vlgmr.msrb.gmra.mxu3 %v5543_v1 }
  0xd4   : > { %422 = vst [vmem:[#allocation2 + $0xf1] sm:$0xff] %v306_v58 }
  0xd5   : > { %389 = vst [vmem:[#allocation2 + $0x210] sm:$0xff] %v306_v58  ;;  %v488_v1 = vld [vmem:[#allocation2 + $0xe8] sm:$0xff] }
  0xd6   : > { %455 = vst [vmem:[#allocation2 + $0x32f] sm:$0xfe] %v306_v58  ;;  %v1653_v40 = vpop.f32.mrf.mxu3  ;;  %v780_v58 = vld [vmem:[#allocation2 + $0x250] sm:$0xff] }
  0xd7   : > { %1569 = vmatmul.f32.gmra.mxu2 %v485_v2  ;;  %407 = vst [vmem:[#allocation2 + $0x79] sm:$0x7f] %v5667_v5  ;;  %2056 = vmatmul.f32.vlgmr.msrb.gmra.mxu1 %v780_v58  ;;  %v781_v2 = vld [vmem:[#allocation2 + $0x258] sm:$0xff] }
  0xd8   : > { %374 = vst [vmem:[#allocation2 + $0x198] sm:$0xff] %v5667_v5  ;;  %v5683_v46 = vld [vmem:[#allocation2 + $0x70] sm:$0xff] }
  0xd9   : > { %440 = vst [vmem:[#allocation2 + $0x2b7] sm:$0xff] %v5667_v5  ;;  %v5691_v61 = vpop.f32.mrf.mxu1 }
  0xda   : > { %1524 = vmatmul.f32.gmra.mxu0 %v5664_v3  ;;  %423 = vst [vmem:[#allocation2 + $0xf9] sm:$0x7f] %v307_v6 }
  0xdb   : > { %390 = vst [vmem:[#allocation2 + $0x218] sm:$0xff] %v307_v6  ;;  %1833 = vmatmul.f32.gmra.mxu3 %v5556_v4  ;;  %v489_v4 = vld [vmem:[#allocation2 + $0xf0] sm:$0xff] }
  0xdc   : > { %456 = vst [vmem:[#allocation2 + $0x337] sm:$0xff] %v307_v6  ;;  %v5694_v6 = vpop.f32.mrf.mxu0 }
  0xde   : > { %v1656_v55 = vpop.f32.mrf.mxu3  ;;  %v5689_v59 = vld [vmem:[#allocation2 + $0x78] sm:$0xff] }
  0xdf   : > { %1572 = vmatmul.f32.gmra.mxu2 %v486_v18  ;;  %2059 = vmatmul.f32.gmra.mxu1 %v781_v2 }
  0xe1   : > { %v5697_v7 = vpop.f32.mrf.mxu1 }
  0xe2   : > { %1527 = vmatmul.f32.gmra.mxu0 %v5675_v19 }
  0xe3   : > { %1836 = vmatmul.f32.gmra.mxu3 %v5571_v10  ;;  %v490_v10 = vld [vmem:[#allocation2 + $0xf8] sm:$0xff] }
  0xe4   : > { %v5706_v14 = vpop.f32.mrf.mxu0 }
  0xe6   : > { %v1659_v63 = vpop.f32.mrf.mxu3 }
  0xe7   : > { %1575 = vmatmul.f32.gmra.mxu2 %v487_v32  ;;  %2062 = vmatmul.f32.gmra.mxu1 %v782_v12 }
  0xe9   : > { %v5708_v18 = vpop.f32.mrf.mxu1 }
  0xea   : > { %1530 = vmatmul.f32.gmra.mxu0 %v5679_v33 }
  0xeb   : > { %1839 = vmatmul.f32.gmra.mxu3 %v5587_v17  ;;  %v5036_v17 = vld [vmem:[#allocation2 + $0x8] sm:$0xff] }
  0xee   : > { %v1662_v11 = vpop.f32.mrf.mxu3 }
  0xef   : > { %1578 = vmatmul.f32.gmra.mxu2 %v488_v1  ;;  %2065 = vmatmul.f32.gmra.mxu1 %v783_v23  ;;  %v785_v1 = vld [vmem:[#allocation2 + $0x278] sm:$0xff] }
  0xf1   : > { %v5717_v28 = vpop.f32.mrf.mxu1 }
  0xf2   : > { %1533 = vmatmul.f32.gmra.mxu0 %v5683_v46 }
  0xf3   : > { %1842 = vmatmul.f32.gmra.mxu3 %v5605_v25 }
  0xf6   : > { %v1665_v25 = vpop.f32.mrf.mxu3 }
  0xf7   : > { %1581 = vmatmul.f32.gmra.mxu2 %v489_v4  ;;  %v786_v4 = vld [vmem:[#allocation2 + $0x280] sm:$0xff] }
  0xf9   : > { %v5726_v41 = vpop.f32.mrf.mxu1 }
  0xfa   : > { %1536 = vmatmul.f32.gmra.mxu0 %v5689_v59 }
  0xfb   : > { %1845 = vmatmul.f32.gmra.mxu3 %v5616_v31 }
  0xfe   : > { %v1668_v34 = vpop.f32.mrf.mxu3 }
  0xff   : > { %1584 = vmatmul.f32.gmra.mxu2 %v490_v10  ;;  %v1450_v10 = vld [vmem:[#allocation8 + $0x3d8] sm:$0xff] }
 0x100   : > { %2270 = vmatpush.msra.mxu3 %v1450_v10  ;;  %v5783_v10 = vld [vmem:[#allocation2 + $0x2a8] sm:$0xff] }
 0x102   : > { %1943 = vmatmul.f32.vlgmr.msrb.gmra.mxu0 %v5472_v38  ;;  %2271 = vmatpush.msra.mxu3 %v1449_v30  ;;  %v1431_v30 = vld [vmem:[#allocation8 + $0x340] sm:$0xff] }
 0x103   : > { %1848 = vmatmul.f32.gmra.mxu3 %v5628_v39 }
 0x104   : > { %v5735_v52 = vpop.f32.mrf.mxu1 }
 0x107   : > { %1717 = vmatmul.f32.vlgmr.msrb.gmra.mxu2 %v5036_v17  ;;  %v787_v17 = vld [vmem:[#allocation2 + $0x288] sm:$0xff] }
 0x108   : > { %v1540_v21 = vpop.f32.mrf.mxu2 }
 0x109   : > { %v1541_v38 = vadd.f32 %v5704_v13, %v1540_v21 }
 0x10a   : > { %1946 = vmatmul.f32.gmra.mxu0 %v5488_v43  ;;  %v784_v43 = vld [vmem:[#allocation2 + $0x270] sm:$0xff] }
 0x10b   : > { %v5712_v24 = vadd.f32 %v1653_v40, %v1541_v38  ;;  %2068 = vmatmul.f32.gmra.mxu1 %v784_v43  ;;  %v1435_v40 = vld [vmem:[#allocation8 + $0x360] sm:$0xff]  ;;  %1851 = vmatmul.f32.gmra.mxu3 %v5641_v49  ;;  %v788_v38 = vld [vmem:[#allocation2 + $0x290] sm:$0xff] }
 0x10c   : > { %2156 = vmatpush.msra.mxu2 %v1435_v40  ;;  %v789_v40 = vld [vmem:[#allocation2 + $0x298] sm:$0xff] }
 0x10f   : > { %1720 = vmatmul.f32.gmra.mxu2 %v589_v26  ;;  %v5715_v27 = vpop.f32.mrf.mxu0 }
 0x112   : > { %v1543_v32 = vpop.f32.mrf.mxu2  ;;  %1949 = vmatmul.f32.gmra.mxu0 %v5504_v48  ;;  %v1671_v48 = vpop.f32.mrf.mxu3 }
 0x113   : > { %v1544_v35 = vadd.f32 %v5704_v13, %v1543_v32  ;;  %2071 = vmatmul.f32.gmra.mxu1 %v785_v1  ;;  %1854 = vmatmul.f32.gmra.mxu3 %v5652_v56 }
 0x115   : > { %v5722_v37 = vadd.f32 %v1656_v55, %v1544_v35  ;;  %v1467_v55 = vld [vmem:[#allocation8 + $0x460] sm:$0xff] }
 0x116   : > { %2382 = vmatpush.msra.mxu0 %v1467_v55  ;;  %v790_v55 = vld [vmem:[#allocation2 + $0x2a0] sm:$0xff] }
 0x117   : > { %1723 = vmatmul.f32.gmra.mxu2 %v780_v58  ;;  %v5724_v31 = vpop.f32.mrf.mxu0 }
 0x118   : > { %2383 = vmatpush.msra.mxu0 %v1466_v20 }
 0x11a   : > { %v1546_v44 = vpop.f32.mrf.mxu2  ;;  %1952 = vmatmul.f32.gmra.mxu0 %v5520_v54  ;;  %v1674_v54 = vpop.f32.mrf.mxu3 }
 0x11b   : > { %v1547_v50 = vadd.f32 %v5704_v13, %v1546_v44  ;;  %2074 = vmatmul.f32.gmra.mxu1 %v786_v4  ;;  %1857 = vmatmul.f32.gmra.mxu3 %v5664_v3 }
 0x11d   : > { %v5731_v39 = vadd.f32 %v1659_v63, %v1547_v50  ;;  %v1434_v63 = vld [vmem:[#allocation8 + $0x358] sm:$0xff] }
 0x11e   : > { %2157 = vmatpush.msra.mxu2 %v1434_v63 }
 0x11f   : > { %1726 = vmatmul.f32.gmra.mxu2 %v781_v2  ;;  %v5733_v51 = vpop.f32.mrf.mxu0  ;;  %v5744_v2 = vpop.f32.mrf.mxu1 }
 0x122   : > { %v1549_v58 = vpop.f32.mrf.mxu2  ;;  %1955 = vmatmul.f32.gmra.mxu0 %v5541_v0  ;;  %v1677_v0 = vpop.f32.mrf.mxu3 }
 0x123   : > { %v1550_v60 = vadd.f32 %v5704_v13, %v1549_v58  ;;  %2077 = vmatmul.f32.gmra.mxu1 %v787_v17  ;;  %1860 = vmatmul.f32.gmra.mxu3 %v5675_v19 }
 0x125   : > { %v5740_v49 = vadd.f32 %v1662_v11, %v1550_v60  ;;  %v1448_v60 = vld [vmem:[#allocation8 + $0x3c8] sm:$0xff] }
 0x126   : > { %2272 = vmatpush.msra.mxu3 %v1448_v60 }
 0x127   : > { %1729 = vmatmul.f32.gmra.mxu2 %v782_v12  ;;  %v5742_v62 = vpop.f32.mrf.mxu0  ;;  %v5753_v12 = vpop.f32.mrf.mxu1 }
 0x12a   : > { %v1552_v9 = vpop.f32.mrf.mxu2  ;;  %1958 = vmatmul.f32.gmra.mxu0 %v5562_v8  ;;  %v1680_v8 = vpop.f32.mrf.mxu3 }
 0x12b   : > { %v1553_v16 = vadd.f32 %v5704_v13, %v1552_v9  ;;  %2080 = vmatmul.f32.gmra.mxu1 %v788_v38  ;;  %1863 = vmatmul.f32.gmra.mxu3 %v5679_v33 }
 0x12d   : > { %v5749_v56 = vadd.f32 %v1665_v25, %v1553_v16  ;;  %v1464_v16 = vld [vmem:[#allocation8 + $0x448] sm:$0xff] }
 0x12f   : > { %1732 = vmatmul.f32.gmra.mxu2 %v783_v23  ;;  %v5751_v11 = vpop.f32.mrf.mxu0  ;;  %v1433_v23 = vld [vmem:[#allocation8 + $0x350] sm:$0xff]  ;;  %v5762_v32 = vpop.f32.mrf.mxu1 }
 0x130   : > { %2158 = vmatpush.msra.mxu2 %v1433_v23 }
 0x132   : > { %v1555_v21 = vpop.f32.mrf.mxu2  ;;  %1961 = vmatmul.f32.gmra.mxu0 %v5578_v15  ;;  %v1683_v15 = vpop.f32.mrf.mxu3 }
 0x133   : > { %v1556_v26 = vadd.f32 %v5704_v13, %v1555_v21  ;;  %2083 = vmatmul.f32.gmra.mxu1 %v789_v40  ;;  %1866 = vmatmul.f32.gmra.mxu3 %v5683_v46  ;;  %v5797_v21 = vld [vmem:[#allocation2 + $0x2b0] sm:$0xff] }
 0x135   : > { %v5758_v3 = vadd.f32 %v1668_v34, %v1556_v26 }
 0x137   : > { %1735 = vmatmul.f32.gmra.mxu2 %v784_v43  ;;  %v5760_v25 = vpop.f32.mrf.mxu0  ;;  %v1465_v43 = vld [vmem:[#allocation8 + $0x450] sm:$0xff]  ;;  %v5773_v58 = vpop.f32.mrf.mxu1 }
 0x138   : > { %2384 = vmatpush.msra.mxu0 %v1465_v43  ;;  %v5810_v43 = vld [vmem:[#allocation2 + $0x2b8] sm:$0xff] }
 0x13a   : > { %v1558_v35 = vpop.f32.mrf.mxu2  ;;  %1964 = vmatmul.f32.gmra.mxu0 %v5594_v22  ;;  %v1686_v50 = vpop.f32.mrf.mxu3 }
 0x13b   : > { %v1559_v42 = vadd.f32 %v5704_v13, %v1558_v35  ;;  %2086 = vmatmul.f32.gmra.mxu1 %v790_v55  ;;  %1869 = vmatmul.f32.gmra.mxu3 %v5689_v59  ;;  %v1447_v35 = vld [vmem:[#allocation8 + $0x3c0] sm:$0xff] }
 0x13c   : > { %2385 = vmatpush.msra.mxu0 %v1464_v16  ;;  %2273 = vmatpush.msra.mxu3 %v1447_v35  ;;  %v5834_v35 = vld [vmem:[#allocation2 + $0x2c8] sm:$0xff] }
 0x13d   : > { %v5767_v19 = vadd.f32 %v1671_v48, %v1559_v42 }
 0x13f   : > { %7399 = vst [vmem:[#allocation15_spill] sm:$0xff] %v5767_v19  ;;  %1738 = vmatmul.f32.gmra.mxu2 %v785_v1  ;;  %v5769_v34 = vpop.f32.mrf.mxu0  ;;  %v1432_v1 = vld [vmem:[#allocation8 + $0x348] sm:$0xff] }
 0x140   : > { %2159 = vmatpush.msra.mxu2 %v1432_v1  ;;  %v1463_v1 = vld [vmem:[#allocation8 + $0x440] sm:$0xff] }
 0x141   : > { %2386 = vmatpush.msra.mxu0 %v1463_v1 }
 0x142   : > { %v1561_v44 = vpop.f32.mrf.mxu2  ;;  %1967 = vmatmul.f32.gmra.mxu0 %v5610_v29  ;;  %v5781_v29 = vpop.f32.mrf.mxu3  ;;  %2160 = vmatpush.msra.mxu2 %v1431_v30 }
 0x143   : > { %v1562_v22 = vadd.f32 %v5704_v13, %v1561_v44  ;;  %2089 = vmatmul.f32.gmra.mxu1 %v5783_v10  ;;  %v667_v44 = vld [vmem:[#allocation2 + $0x88] sm:$0xff] }
 0x145   : > { %v5776_v33 = vadd.f32 %v1674_v54, %v1562_v22  ;;  %v5790_v54 = vpop.f32.mrf.mxu1 }
 0x147   : > { %7400 = vst [vmem:[#allocation16_spill] sm:$0xff] %v5776_v33  ;;  %1741 = vmatmul.f32.gmra.mxu2 %v786_v4  ;;  %v5778_v48 = vpop.f32.mrf.mxu0 }
 0x14a   : > { %v1564_v63 = vpop.f32.mrf.mxu2  ;;  %1970 = vmatmul.f32.gmra.mxu0 %v5621_v36  ;;  %v5795_v20 = vpop.f32.mrf.mxu3 }
 0x14b   : > { %v1565_v9 = vadd.f32 %v5704_v13, %v1564_v63  ;;  %2092 = vmatmul.f32.gmra.mxu1 %v5797_v21 }
 0x14d   : > { %v5788_v46 = vadd.f32 %v1677_v0, %v1565_v9  ;;  %v666_v0 = vld [vmem:[#allocation2 + $0x80] sm:$0xff]  ;;  %v5805_v23 = vpop.f32.mrf.mxu1 }
 0x14e   : > { %1872 = vmatmul.f32.gmra.mxu3 %v666_v0  ;;  %v5823_v9 = vld [vmem:[#allocation2 + $0x2c0] sm:$0xff]  ;;  %v1446_v0 = vld [vmem:[#allocation8 + $0x3b8] sm:$0xff] }
 0x14f   : > { %7401 = vst [vmem:[#allocation17_spill] sm:$0xff] %v5788_v46  ;;  %1744 = vmatmul.f32.gmra.mxu2 %v787_v17  ;;  %v5792_v4 = vpop.f32.mrf.mxu0  ;;  %2274 = vmatpush.msra.mxu3 %v1446_v0 }
 0x152   : > { %v1567_v36 = vpop.f32.mrf.mxu2  ;;  %1973 = vmatmul.f32.gmra.mxu0 %v5633_v45  ;;  %v5808_v42 = vpop.f32.mrf.mxu3 }
 0x153   : > { %v1568_v26 = vadd.f32 %v5704_v13, %v1567_v36  ;;  %2095 = vmatmul.f32.gmra.mxu1 %v5810_v43 }
 0x155   : > { %v5801_v59 = vadd.f32 %v1680_v8, %v1568_v26  ;;  %v5818_v60 = vpop.f32.mrf.mxu1  ;;  %v1430_v26 = vld [vmem:[#allocation8 + $0x338] sm:$0xff] }
 0x156   : > { %1875 = vmatmul.f32.gmra.mxu3 %v667_v44  ;;  %2161 = vmatpush.msra.mxu2 %v1430_v26  ;;  %v669_v44 = vld [vmem:[#allocation2 + $0x98] sm:$0xff]  ;;  %v5848_v26 = vld [vmem:[#allocation2 + $0x2d0] sm:$0xff] }
 0x157   : > { %7402 = vst [vmem:[#allocation18_spill] sm:$0xff] %v5801_v59  ;;  %1747 = vmatmul.f32.gmra.mxu2 %v788_v38  ;;  %v5803_v17 = vpop.f32.mrf.mxu0 }
 0x15a   : > { %v1570_v45 = vpop.f32.mrf.mxu2  ;;  %1976 = vmatmul.f32.gmra.mxu0 %v5646_v53  ;;  %v5821_v63 = vpop.f32.mrf.mxu3 }
 0x15b   : > { %v1571_v8 = vadd.f32 %v5704_v13, %v1570_v45  ;;  %2098 = vmatmul.f32.gmra.mxu1 %v5823_v9 }
 0x15d   : > { %v5814_v38 = vadd.f32 %v1683_v15, %v1571_v8  ;;  %v3556_v8 = vld [vmem:[#allocation10 + $0x78] sm:$0xff] }
 0x15e   : > { %3689 = vmatpush.msra.mxu1 %v3556_v8  ;;  %v731_v8 = vld [vmem:[#allocation2 + $0x1a8] sm:$0xff] }
 0x15f   : > { %7403 = vst [vmem:[#allocation19_spill] sm:$0xff] %v5814_v38  ;;  %1750 = vmatmul.f32.gmra.mxu2 %v789_v40  ;;  %v5816_v22 = vpop.f32.mrf.mxu0  ;;  %v668_v40 = vld [vmem:[#allocation2 + $0x90] sm:$0xff] }
 0x160   : > { %1878 = vmatmul.f32.gmra.mxu3 %v668_v40 }
 0x162   : > { %v1573_v53 = vpop.f32.mrf.mxu2  ;;  %1979 = vmatmul.f32.gmra.mxu0 %v5656_v57  ;;  %v5832_v30 = vpop.f32.mrf.mxu3 }
 0x163   : > { %v1574_v16 = vadd.f32 %v5704_v13, %v1573_v53  ;;  %2101 = vmatmul.f32.gmra.mxu1 %v5834_v35  ;;  %v1462_v53 = vld [vmem:[#allocation8 + $0x438] sm:$0xff] }
 0x164   : > { %2387 = vmatpush.msra.mxu0 %v1462_v53 }
 0x165   : > { %v5827_v15 = vadd.f32 %v1686_v50, %v1574_v16  ;;  %v5837_v50 = vpop.f32.mrf.mxu1 }
 0x167   : > { %7404 = vst [vmem:[#allocation20_spill] sm:$0xff] %v5827_v15  ;;  %1753 = vmatmul.f32.gmra.mxu2 %v790_v55  ;;  %v5829_v36 = vpop.f32.mrf.mxu0 }
 0x168   : > { %1881 = vmatmul.f32.gmra.mxu3 %v669_v44  ;;  %v1429_v44 = vld [vmem:[#allocation8 + $0x330] sm:$0xff] }
 0x169   : > { %2162 = vmatpush.msra.mxu2 %v1429_v44 }
 0x16a   : > { %v1576_v57 = vpop.f32.mrf.mxu2  ;;  %1982 = vmatmul.f32.gmra.mxu0 %v5667_v5  ;;  %v730_v5 = vld [vmem:[#allocation2 + $0x1a0] sm:$0xff]  ;;  %v5846_v40 = vpop.f32.mrf.mxu3 }
 0x16b   : > { %v1577_v45 = vadd.f32 %v5704_v13, %v1576_v57  ;;  %2104 = vmatmul.f32.gmra.mxu1 %v5848_v26  ;;  %v670_v57 = vld [vmem:[#allocation2 + $0xa0] sm:$0xff] }
 0x16d   : > { %v5841_v55 = vadd.f32 %v5781_v29, %v1577_v45 }
 0x16f   : > { %7405 = vst [vmem:[#allocation21_spill] sm:$0xff] %v5841_v55  ;;  %1756 = vmatmul.f32.gmra.mxu2 %v5783_v10  ;;  %v5844_v1 = vpop.f32.mrf.mxu0  ;;  %v5855_v10 = vpop.f32.mrf.mxu1 }
 0x170   : > { %1884 = vmatmul.f32.gmra.mxu3 %v670_v57  ;;  %v671_v57 = vld [vmem:[#allocation2 + $0xa8] sm:$0xff] }
 0x172   : > { %v1579_v16 = vpop.f32.mrf.mxu2  ;;  %1985 = vmatmul.f32.gmra.mxu0 %v730_v5  ;;  %v1445_v5 = vld [vmem:[#allocation8 + $0x3b0] sm:$0xff]  ;;  %v5860_v53 = vpop.f32.mrf.mxu3 }
 0x173   : > { %v1580_v0 = vadd.f32 %v5704_v13, %v1579_v16  ;;  %2275 = vmatpush.msra.mxu3 %v1445_v5  ;;  %v5862_v16 = vld [vmem:[#allocation2 + $0x2d8] sm:$0xff]  ;;  %v1461_v5 = vld [vmem:[#allocation8 + $0x430] sm:$0xff] }
 0x174   : > { %2107 = vmatmul.f32.gmra.mxu1 %v5862_v16  ;;  %2388 = vmatpush.msra.mxu0 %v1461_v5  ;;  %v1444_v5 = vld [vmem:[#allocation8 + $0x3a8] sm:$0xff] }
 0x175   : > { %v5853_v29 = vadd.f32 %v5795_v20, %v1580_v0  ;;  %v3555_v0 = vld [vmem:[#allocation10 + $0x70] sm:$0xff]  ;;  %2276 = vmatpush.msra.mxu3 %v1444_v5 }
 0x176   : > { %3690 = vmatpush.msra.mxu1 %v3555_v0 }
 0x177   : > { %7406 = vst [vmem:[#allocation22_spill] sm:$0xff] %v5853_v29  ;;  %1759 = vmatmul.f32.gmra.mxu2 %v5797_v21  ;;  %v5858_v45 = vpop.f32.mrf.mxu0  ;;  %v732_v29 = vld [vmem:[#allocation2 + $0x1b0] sm:$0xff] }
 0x178   : > { %1887 = vmatmul.f32.gmra.mxu3 %v671_v57  ;;  %v1428_v57 = vld [vmem:[#allocation8 + $0x328] sm:$0xff] }
 0x179   : > { %2163 = vmatpush.msra.mxu2 %v1428_v57  ;;  %v734_v57 = vld [vmem:[#allocation2 + $0x1c0] sm:$0xff] }
 0x17a   : > { %v1582_v55 = vpop.f32.mrf.mxu2  ;;  %1988 = vmatmul.f32.gmra.mxu0 %v731_v8  ;;  %v2057_v8 = vpop.f32.mrf.mxu1 }
 0x17b   : > { %v1583_v20 = vadd.f32 %v5704_v13, %v1582_v55  ;;  %v5870_v38 = vpop.f32.mrf.mxu3  ;;  %v5872_v55 = vld [vmem:[#allocation2 + $0x2e0] sm:$0xff] }
 0x17c   : > { %2110 = vmatmul.f32.gmra.mxu1 %v5872_v55 }
 0x17d   : > { %v5867_v21 = vadd.f32 %v5808_v42, %v1583_v20  ;;  %v1493_v42 = vadd.f32 %v5704_v13, %v5694_v6  ;;  %v672_v20 = vld [vmem:[#allocation2 + $0xb0] sm:$0xff]  ;;  %v5885_v6 = vld [vmem:[#allocation2 + $0x2e8] sm:$0xff] }
 0x17f   : > { %7407 = vst [vmem:[#allocation23_spill] sm:$0xff] %v5867_v21  ;;  %1762 = vmatmul.f32.gmra.mxu2 %v5810_v43  ;;  %v1944_v44 = vpop.f32.mrf.mxu0  ;;  %v1606_v21 = vadd.f32 %v5685_v47, %v1493_v42  ;;  %v673_v47 = vld [vmem:[#allocation2 + $0xb8] sm:$0xff] }
 0x180   : > { %1890 = vmatmul.f32.gmra.mxu3 %v672_v20  ;;  %v3554_v20 = vld [vmem:[#allocation10 + $0x68] sm:$0xff] }
 0x181   : > { %3691 = vmatpush.msra.mxu1 %v3554_v20  ;;  %v1427_v20 = vld [vmem:[#allocation8 + $0x320] sm:$0xff] }
 0x182   : > { %v1585_v15 = vpop.f32.mrf.mxu2  ;;  %1991 = vmatmul.f32.gmra.mxu0 %v732_v29  ;;  %v733_v29 = vld [vmem:[#allocation2 + $0x1b8] sm:$0xff]  ;;  %2164 = vmatpush.msra.mxu2 %v1427_v20 }
 0x183   : > { %v1586_v59 = vadd.f32 %v5704_v13, %v1585_v15  ;;  %v2060_v15 = vpop.f32.mrf.mxu1  ;;  %v5883_v33 = vpop.f32.mrf.mxu3 }
 0x184   : > { %2113 = vmatmul.f32.gmra.mxu1 %v5885_v6 }
 0x185   : > { %v5879_v43 = vadd.f32 %v5821_v63, %v1586_v59  ;;  %v1496_v63 = vadd.f32 %v5704_v13, %v5706_v14  ;;  %v5897_v14 = vld [vmem:[#allocation2 + $0x2f0] sm:$0xff] }
 0x187   : > { %7408 = vst [vmem:[#allocation24_spill] sm:$0xff] %v5879_v43  ;;  %1765 = vmatmul.f32.gmra.mxu2 %v5823_v9  ;;  %v1947_v0 = vpop.f32.mrf.mxu0  ;;  %v1609_v5 = vadd.f32 %v5691_v61, %v1496_v63  ;;  %v674_v61 = vld [vmem:[#allocation2 + $0xc0] sm:$0xff] }
 0x188   : > { %1893 = vmatmul.f32.gmra.mxu3 %v673_v47 }
 0x18a   : > { %v1718_v46 = vpop.f32.mrf.mxu2  ;;  %1994 = vmatmul.f32.gmra.mxu0 %v733_v29 }
 0x18b   : > { %v1719_v59 = vadd.f32 %v1718_v46, %v1606_v21  ;;  %v1460_v46 = vld [vmem:[#allocation8 + $0x428] sm:$0xff]  ;;  %v5895_v19 = vpop.f32.mrf.mxu3 }
 0x18c   : > { %2389 = vmatpush.msra.mxu0 %v1460_v46  ;;  %2116 = vmatmul.f32.gmra.mxu1 %v5897_v14 }
 0x18d   : > { %v1832_v9 = vadd.f32 %v5832_v30, %v1719_v59  ;;  %v2063_v59 = vpop.f32.mrf.mxu1 }
 0x18f   : > { %1768 = vmatmul.f32.gmra.mxu2 %v5834_v35  ;;  %v1945_v42 = vadd.f32 %v1944_v44, %v1832_v9  ;;  %v1950_v29 = vpop.f32.mrf.mxu0  ;;  %v1499_v35 = vadd.f32 %v5704_v13, %v5715_v27  ;;  %v735_v9 = vld [vmem:[#allocation2 + $0x1c8] sm:$0xff] }
 0x190   : > { %1896 = vmatmul.f32.gmra.mxu3 %v674_v61 }
 0x191   : > { %v5893_v43 = vadd.f32 %v2057_v8, %v1945_v42  ;;  %v1612_v47 = vadd.f32 %v5697_v7, %v1499_v35  ;;  %v3553_v7 = vld [vmem:[#allocation10 + $0x60] sm:$0xff] }
 0x192   : > { %v1721_v21 = vpop.f32.mrf.mxu2  ;;  %1997 = vmatmul.f32.gmra.mxu0 %v734_v57  ;;  %v1443_v57 = vld [vmem:[#allocation8 + $0x3a0] sm:$0xff]  ;;  %3692 = vmatpush.msra.mxu1 %v3553_v7 }
 0x193   : > { %v1722_v30 = vadd.f32 %v1721_v21, %v1609_v5  ;;  %2277 = vmatpush.msra.mxu3 %v1443_v57  ;;  %v5907_v27 = vpop.f32.mrf.mxu3  ;;  %v676_v57 = vld [vmem:[#allocation2 + $0xd0] sm:$0xff] }
 0x195   : > { %v1835_v44 = vadd.f32 %v5846_v40, %v1722_v30  ;;  %v5909_v40 = vld [vmem:[#allocation2 + $0x2f8] sm:$0xff]  ;;  %v2066_v21 = vpop.f32.mrf.mxu1 }
 0x196   : > { %2119 = vmatmul.f32.gmra.mxu1 %v5909_v40 }
 0x197   : > { %1771 = vmatmul.f32.gmra.mxu2 %v5848_v26  ;;  %v1948_v8 = vadd.f32 %v1947_v0, %v1835_v44  ;;  %v1953_v63 = vpop.f32.mrf.mxu0  ;;  %v1502_v26 = vadd.f32 %v5704_v13, %v5724_v31  ;;  %v736_v44 = vld [vmem:[#allocation2 + $0x1d0] sm:$0xff] }
 0x199   : > { %v5905_v42 = vadd.f32 %v2060_v15, %v1948_v8  ;;  %v675_v15 = vld [vmem:[#allocation2 + $0xc8] sm:$0xff]  ;;  %v1615_v61 = vadd.f32 %v5708_v18, %v1502_v26  ;;  %v1426_v26 = vld [vmem:[#allocation8 + $0x318] sm:$0xff] }
 0x19a   : > { %v1724_v5 = vpop.f32.mrf.mxu2  ;;  %2000 = vmatmul.f32.gmra.mxu0 %v735_v9  ;;  %1899 = vmatmul.f32.gmra.mxu3 %v675_v15  ;;  %v1459_v9 = vld [vmem:[#allocation8 + $0x420] sm:$0xff]  ;;  %v1442_v15 = vld [vmem:[#allocation8 + $0x398] sm:$0xff] }
 0x19b   : > { %v1725_v46 = vadd.f32 %v1724_v5, %v1612_v47  ;;  %v5919_v31 = vpop.f32.mrf.mxu3  ;;  %2390 = vmatpush.msra.mxu0 %v1459_v9  ;;  %v737_v5 = vld [vmem:[#allocation2 + $0x1d8] sm:$0xff]  ;;  %2165 = vmatpush.msra.mxu2 %v1426_v26 }
 0x19c   : > { %2278 = vmatpush.msra.mxu3 %v1442_v15  ;;  %v1425_v15 = vld [vmem:[#allocation8 + $0x310] sm:$0xff] }
 0x19d   : > { %v1838_v0 = vadd.f32 %v5860_v53, %v1725_v46  ;;  %v5921_v53 = vld [vmem:[#allocation2 + $0x300] sm:$0xff]  ;;  %v2069_v46 = vpop.f32.mrf.mxu1  ;;  %2166 = vmatpush.msra.mxu2 %v1425_v15  ;;  %v741_v15 = vld [vmem:[#allocation2 + $0x1f8] sm:$0xff] }
 0x19e   : > { %2122 = vmatmul.f32.gmra.mxu1 %v5921_v53 }
 0x19f   : > { %1774 = vmatmul.f32.gmra.mxu2 %v5862_v16  ;;  %v1951_v30 = vadd.f32 %v1950_v29, %v1838_v0  ;;  %v1956_v35 = vpop.f32.mrf.mxu0  ;;  %v1505_v16 = vadd.f32 %v5704_v13, %v5733_v51 }
 0x1a1   : > { %v5917_v8 = vadd.f32 %v2063_v59, %v1951_v30  ;;  %v1618_v0 = vadd.f32 %v5717_v28, %v1505_v16  ;;  %v677_v28 = vld [vmem:[#allocation2 + $0xd8] sm:$0xff] }
 0x1a2   : > { %v1727_v20 = vpop.f32.mrf.mxu2  ;;  %2003 = vmatmul.f32.gmra.mxu0 %v736_v44  ;;  %1902 = vmatmul.f32.gmra.mxu3 %v676_v57  ;;  %v1458_v57 = vld [vmem:[#allocation8 + $0x418] sm:$0xff] }
 0x1a3   : > { %v1728_v47 = vadd.f32 %v1727_v20, %v1615_v61  ;;  %v5931_v51 = vpop.f32.mrf.mxu3  ;;  %v3552_v61 = vld [vmem:[#allocation10 + $0x58] sm:$0xff]  ;;  %v738_v20 = vld [vmem:[#allocation2 + $0x1e0] sm:$0xff]  ;;  %2391 = vmatpush.msra.mxu0 %v1458_v57 }
 0x1a4   : > { %3693 = vmatpush.msra.mxu1 %v3552_v61 }
 0x1a5   : > { %v1841_v29 = vadd.f32 %v5870_v38, %v1728_v47  ;;  %v5933_v38 = vld [vmem:[#allocation2 + $0x308] sm:$0xff] }
 0x1a6   : > { %2125 = vmatmul.f32.gmra.mxu1 %v5933_v38 }
 0x1a7   : > { %1777 = vmatmul.f32.gmra.mxu2 %v5872_v55  ;;  %v1954_v18 = vadd.f32 %v1953_v63, %v1841_v29  ;;  %v1959_v59 = vpop.f32.mrf.mxu0  ;;  %v1508_v63 = vadd.f32 %v5704_v13, %v5742_v62  ;;  %v2072_v29 = vpop.f32.mrf.mxu1 }
 0x1a9   : > { %v5929_v7 = vadd.f32 %v2066_v21, %v1954_v18  ;;  %v1621_v47 = vadd.f32 %v5726_v41, %v1508_v63  ;;  %v678_v41 = vld [vmem:[#allocation2 + $0xe0] sm:$0xff]  ;;  %v1441_v63 = vld [vmem:[#allocation8 + $0x390] sm:$0xff] }
 0x1aa   : > { %v1730_v30 = vpop.f32.mrf.mxu2  ;;  %2006 = vmatmul.f32.gmra.mxu0 %v737_v5  ;;  %1905 = vmatmul.f32.gmra.mxu3 %v677_v28 }
 0x1ab   : > { %v1731_v55 = vadd.f32 %v1730_v30, %v1618_v0  ;;  %v5943_v62 = vpop.f32.mrf.mxu3  ;;  %v739_v0 = vld [vmem:[#allocation2 + $0x1e8] sm:$0xff]  ;;  %2279 = vmatpush.msra.mxu3 %v1441_v63 }
 0x1ad   : > { %v1844_v44 = vadd.f32 %v5883_v33, %v1731_v55  ;;  %v5945_v33 = vld [vmem:[#allocation2 + $0x310] sm:$0xff] }
 0x1ae   : > { %2128 = vmatmul.f32.gmra.mxu1 %v5945_v33 }
 0x1af   : > { %1780 = vmatmul.f32.gmra.mxu2 %v5885_v6  ;;  %v1957_v21 = vadd.f32 %v1956_v35, %v1844_v44  ;;  %v1962_v9 = vpop.f32.mrf.mxu0  ;;  %v1511_v6 = vadd.f32 %v5704_v13, %v5751_v11 }
 0x1b1   : > { %v5941_v16 = vadd.f32 %v2069_v46, %v1957_v21  ;;  %v1624_v30 = vadd.f32 %v5735_v52, %v1511_v6  ;;  %v3551_v52 = vld [vmem:[#allocation10 + $0x50] sm:$0xff]  ;;  %v679_v21 = vld [vmem:[#allocation2 + $0xe8] sm:$0xff] }
 0x1b2   : > { %v1733_v18 = vpop.f32.mrf.mxu2  ;;  %2009 = vmatmul.f32.gmra.mxu0 %v738_v20  ;;  %1908 = vmatmul.f32.gmra.mxu3 %v678_v41 }
 0x1b3   : > { %v1734_v5 = vadd.f32 %v1733_v18, %v1621_v47  ;;  %v5955_v11 = vpop.f32.mrf.mxu3  ;;  %3694 = vmatpush.msra.mxu1 %v3551_v52  ;;  %v5988_v52 = vld [vmem:[%s5390_s28 + $0xf0] sm:$0xff] }
 0x1b4   : > { %424 = vst [vmem:[#allocation2 + $0x101] sm:$0xff] %v5988_v52 }
 0x1b5   : > { %v1847_v35 = vadd.f32 %v5895_v19, %v1734_v5  ;;  %v5957_v19 = vld [vmem:[#allocation2 + $0x318] sm:$0xff]  ;;  %v1457_v5 = vld [vmem:[#allocation8 + $0x410] sm:$0xff]  ;;  %391 = vst [vmem:[#allocation2 + $0x220] sm:$0xff] %v5988_v52 }
 0x1b6   : > { %2131 = vmatmul.f32.gmra.mxu1 %v5957_v19  ;;  %2392 = vmatpush.msra.mxu0 %v1457_v5  ;;  %457 = vst [vmem:[#allocation2 + $0x33f] sm:$0xfe] %v5988_v52 }
 0x1b7   : > { %1783 = vmatmul.f32.gmra.mxu2 %v5897_v14  ;;  %v1960_v46 = vadd.f32 %v1959_v59, %v1847_v35  ;;  %v1965_v26 = vpop.f32.mrf.mxu0  ;;  %v2075_v14 = vpop.f32.mrf.mxu1  ;;  %v1514_v59 = vadd.f32 %v5704_v13, %v5760_v25  ;;  %v5969_v25 = vld [vmem:[#allocation2 + $0x320] sm:$0xff] }
 0x1b9   : > { %v5953_v55 = vadd.f32 %v2072_v29, %v1960_v46  ;;  %v740_v29 = vld [vmem:[#allocation2 + $0x1f0] sm:$0xff]  ;;  %v1627_v57 = vadd.f32 %v5744_v2, %v1514_v59 }
 0x1ba   : > { %v1736_v44 = vpop.f32.mrf.mxu2  ;;  %2012 = vmatmul.f32.gmra.mxu0 %v739_v0  ;;  %1911 = vmatmul.f32.gmra.mxu3 %v679_v21  ;;  %v680_v2 = vld [vmem:[#allocation2 + $0xf0] sm:$0xff] }
 0x1bb   : > { %v1737_v61 = vadd.f32 %v1736_v44, %v1624_v30  ;;  %v5967_v35 = vpop.f32.mrf.mxu3  ;;  %v1424_v30 = vld [vmem:[#allocation8 + $0x308] sm:$0xff] }
 0x1bc   : > { %2167 = vmatpush.msra.mxu2 %v1424_v30 }
 0x1bd   : > { %v1850_v28 = vadd.f32 %v5907_v27, %v1737_v61  ;;  %v1440_v61 = vld [vmem:[#allocation8 + $0x388] sm:$0xff] }
 0x1be   : > { %2134 = vmatmul.f32.gmra.mxu1 %v5969_v25  ;;  %2280 = vmatpush.msra.mxu3 %v1440_v61 }
 0x1bf   : > { %1786 = vmatmul.f32.gmra.mxu2 %v5909_v40  ;;  %v1963_v20 = vadd.f32 %v1962_v9, %v1850_v28  ;;  %v1968_v47 = vpop.f32.mrf.mxu0  ;;  %v1517_v40 = vadd.f32 %v5704_v13, %v5769_v34  ;;  %v2078_v41 = vpop.f32.mrf.mxu1  ;;  %v3550_v28 = vld [vmem:[#allocation10 + $0x48] sm:$0xff] }
 0x1c0   : > { %3695 = vmatpush.msra.mxu1 %v3550_v28 }
 0x1c1   : > { %v5965_v18 = vadd.f32 %v2075_v14, %v1963_v20  ;;  %v1630_v63 = vadd.f32 %v5753_v12, %v1517_v40  ;;  %v681_v12 = vld [vmem:[#allocation2 + $0xf8] sm:$0xff]  ;;  %v682_v40 = vld [vmem:[#allocation2 + $0x100] sm:$0xff] }
 0x1c2   : > { %v1739_v6 = vpop.f32.mrf.mxu2  ;;  %2015 = vmatmul.f32.gmra.mxu0 %v740_v29  ;;  %1914 = vmatmul.f32.gmra.mxu3 %v680_v2  ;;  %v742_v29 = vld [vmem:[#allocation2 + $0x200] sm:$0xff]  ;;  %v743_v2 = vld [vmem:[#allocation2 + $0x208] sm:$0xff] }
 0x1c3   : > { %v1740_v27 = vadd.f32 %v1739_v6, %v1627_v57  ;;  %v5979_v34 = vpop.f32.mrf.mxu3  ;;  %v1523_v6 = vadd.f32 %v5704_v13, %v5792_v4 }
 0x1c5   : > { %v1853_v9 = vadd.f32 %v5919_v31, %v1740_v27  ;;  %v5981_v31 = vld [vmem:[#allocation2 + $0x328] sm:$0xff]  ;;  %v1636_v4 = vadd.f32 %v5773_v58, %v1523_v6 }
 0x1c6   : > { %2137 = vmatmul.f32.gmra.mxu1 %v5981_v31 }
 0x1c7   : > { %1789 = vmatmul.f32.gmra.mxu2 %v5921_v53  ;;  %v1966_v46 = vadd.f32 %v1965_v26, %v1853_v9  ;;  %v1971_v0 = vpop.f32.mrf.mxu0  ;;  %v1520_v26 = vadd.f32 %v5704_v13, %v5778_v48 }
 0x1c9   : > { %v5977_v44 = vadd.f32 %v2078_v41, %v1966_v46  ;;  %v1633_v48 = vadd.f32 %v5762_v32, %v1520_v26  ;;  %v6006_v32 = vld [vmem:[%s5390_s28 + $0xf8] sm:$0xff]  ;;  %v1423_v46 = vld [vmem:[#allocation8 + $0x300] sm:$0xff]  ;;  %s4817_s28 = sshll.u32 %s4814_s10, 4  ;;  %s4818_s28 = int_to_ptr.hbm [resolvable:$true] %s4817_s28 }
 0x1ca   : > { %v1742_v14 = vpop.f32.mrf.mxu2  ;;  %2018 = vmatmul.f32.gmra.mxu0 %v741_v15  ;;  %1917 = vmatmul.f32.gmra.mxu3 %v681_v12  ;;  %425 = vst [vmem:[#allocation2 + $0x109] sm:$0x7f] %v6006_v32  ;;  %v1439_v15 = vld [vmem:[#allocation8 + $0x380] sm:$0xff]  ;;  %s5184_s24 = sshra.s32 %s4818_s28, 4  ;;  %s5185_s24 = int_to_ptr.hbm [resolvable:$true] %s5184_s24 }
 0x1cb   : > { %v1743_v53 = vadd.f32 %v1742_v14, %v1630_v63  ;;  %v5997_v5 = vpop.f32.mrf.mxu3  ;;  %2168 = vmatpush.msra.mxu2 %v1423_v46  ;;  %392 = vst [vmem:[#allocation2 + $0x228] sm:$0xff] %v6006_v32  ;;  %2281 = vmatpush.msra.mxu3 %v1439_v15  ;;  %v1526_v63 = vadd.f32 %v5704_v13, %v5803_v17  ;;  %v3549_v14 = vld [vmem:[#allocation10 + $0x40] sm:$0xff]  ;;  %s5186_s29 = scalar_lea.hbm %s5185_s24, 256  ;;  %p5191_p11 = scmp.lt.s32.totalorder %s5185_s24, %s7386_s5 }
 0x1cc   : > { %458 = vst [vmem:[#allocation2 + $0x347] sm:$0xff] %v6006_v32  ;;  %3696 = vmatpush.msra.mxu1 %v3549_v14  ;;  %v1455_v12 = vld [vmem:[#allocation8 + $0x400] sm:$0xff]  ;;  %p5187_p1 = scmp.ne.s32.totalorder %s5185_s24, %s5186_s29  ;;  %p5192_p2 = scmp.lt.s32.totalorder %s5190_s12, %s5186_s29 }
 0x1cd   : > { %v1856_v59 = vadd.f32 %v5931_v51, %v1743_v53  ;;  %v1456_v51 = vld [vmem:[#allocation8 + $0x408] sm:$0xff]  ;;  %v1639_v28 = vadd.f32 %v5790_v54, %v1526_v63 }
 0x1ce   : > { %2393 = vmatpush.msra.mxu0 %v1456_v51  ;;  %p5188_p4 = pnand %p5187_p1, %p5351_p3  ;;  %p5193_p9 = por %p5192_p2, %p5191_p11 }
 0x1cf   : > { %1792 = vmatmul.f32.gmra.mxu2 %v5933_v38  ;;  %v5991_v21 = vadd.f32 %v1968_v47, %v1856_v59  ;;  %v1974_v20 = vpop.f32.mrf.mxu0  ;;  %v5999_v38 = vld [vmem:[#allocation2 + $0x330] sm:$0xff] }
 0x1d0   : > { %2140 = vmatmul.f32.gmra.mxu1 %v5999_v38  ;;  %v744_v59 = vld [vmem:[#allocation2 + $0x210] sm:$0xff]  ;;  %2394 = vmatpush.msra.mxu0 %v1455_v12  ;;  %p5189_p8 = pneg %p5188_p4 }
 0x1d1   : > { %v683_v58 = vld [vmem:[#allocation2 + $0x108] sm:$0xff] }
 0x1d2   : > { %v1745_v57 = vpop.f32.mrf.mxu2  ;;  %2021 = vmatmul.f32.gmra.mxu0 %v742_v29  ;;  %1920 = vmatmul.f32.gmra.mxu3 %v682_v40  ;;  %p5194_p10 = pnand %p5193_p9, %p5189_p8 }
 0x1d3   : > { %v1746_v47 = vadd.f32 %v1745_v57, %v1633_v48  ;;  %v810_v17 = vld [vmem:[#allocation2 + $0x340] sm:$0xff] }
 0x1d5   : > { %v1859_v27 = vadd.f32 %v5943_v62, %v1746_v47  ;;  %v745_v47 = vld [vmem:[#allocation2 + $0x218] sm:$0xff] }
 0x1d7   : > { %1795 = vmatmul.f32.gmra.mxu2 %v5945_v33  ;;  %v6009_v9 = vadd.f32 %v1971_v0, %v1859_v27  ;;  %v1977_v41 = vpop.f32.mrf.mxu0  ;;  %v6015_v33 = vpop.f32.mrf.mxu3  ;;  %v6017_v0 = vld [vmem:[#allocation2 + $0x338] sm:$0xff] }
 0x1d8   : > { %2143 = vmatmul.f32.gmra.mxu1 %v6017_v0 }
 0x1da   : > { %v1748_v62 = vpop.f32.mrf.mxu2  ;;  %2024 = vmatmul.f32.gmra.mxu0 %v743_v2  ;;  %1923 = vmatmul.f32.gmra.mxu3 %v683_v58  ;;  %v811_v2 = vld [vmem:[#allocation2 + $0x348] sm:$0xff] }
 0x1db   : > { %v1749_v30 = vadd.f32 %v1748_v62, %v1636_v4  ;;  %v3548_v4 = vld [vmem:[#allocation10 + $0x38] sm:$0xff] }
 0x1dc   : > { %3697 = vmatpush.msra.mxu1 %v3548_v4 }
 0x1dd   : > { %v1862_v61 = vadd.f32 %v5955_v11, %v1749_v30  ;;  %v1529_v11 = vadd.f32 %v5704_v13, %v5816_v22  ;;  %v1532_v22 = vadd.f32 %v5704_v13, %v5829_v36  ;;  %v5037_v13 = vld [vmem:[%s7383_s2] ss:$0 sm:$0xff] }
 0x1de   : > { %v1535_v36 = vadd.f32 %v5037_v13, %v5844_v1 }
 0x1df   : > { %1798 = vmatmul.f32.gmra.mxu2 %v5957_v19  ;;  %v6024_v53 = vadd.f32 %v1974_v20, %v1862_v61  ;;  %v1980_v26 = vpop.f32.mrf.mxu0  ;;  %v6027_v48 = vpop.f32.mrf.mxu3  ;;  %v910_v20 = vld [vmem:[#allocation2 + $0x140] sm:$0xff]  ;;  %v1642_v6 = vadd.f32 %v5805_v23, %v1529_v11  ;;  %v1645_v23 = vadd.f32 %v5818_v60, %v1532_v22 }
 0x1e0   : > { %2146 = vmatmul.f32.gmra.mxu1 %v810_v17  ;;  %v1648_v60 = vadd.f32 %v5837_v50, %v1535_v36  ;;  %v845_v11 = vld [vmem:[#allocation2 + $0x20] sm:$0xff]  ;;  %v978_v36 = vld [vmem:[#allocation2 + $0x278] sm:$0xff] }
 0x1e2   : > { %v1751_v29 = vpop.f32.mrf.mxu2  ;;  %2027 = vmatmul.f32.gmra.mxu0 %v744_v59  ;;  %2282 = vmatmul.f32.vlgmr.msra.gmra.mxu3 %v910_v20  ;;  %v1538_v59 = vadd.f32 %v5037_v13, %v5858_v45 }
 0x1e3   : > { %v1752_v51 = vadd.f32 %v1751_v29, %v1639_v28  ;;  %v3547_v28 = vld [vmem:[#allocation10 + $0x30] sm:$0xff]  ;;  %v975_v29 = vld [vmem:[#allocation2 + $0x260] sm:$0xff] }
 0x1e4   : > { %3698 = vmatpush.msra.mxu1 %v3547_v28  ;;  %v1651_v50 = vadd.f32 %v5855_v10, %v1538_v59  ;;  %v846_v10 = vld [vmem:[#allocation2 + $0x28] sm:$0xff] }
 0x1e5   : > { %v1865_v19 = vadd.f32 %v5967_v35, %v1752_v51 }
 0x1e7   : > { %1801 = vmatmul.f32.gmra.mxu2 %v5969_v25  ;;  %v6033_v57 = vadd.f32 %v1977_v41, %v1865_v19  ;;  %v1983_v54 = vpop.f32.mrf.mxu0  ;;  %v1879_v40 = vpop.f32.mrf.mxu3  ;;  %v911_v25 = vld [vmem:[#allocation2 + $0x148] sm:$0xff] }
 0x1e8   : > { %2149 = vmatmul.f32.gmra.mxu1 %v811_v2  ;;  %v3546_v2 = vld [vmem:[#allocation10 + $0x28] sm:$0xff] }
 0x1e9   : > { %3699 = vmatpush.msra.mxu1 %v3546_v2  ;;  %v981_v2 = vld [vmem:[#allocation2 + $0x290] sm:$0xff] }
 0x1ea   : > { %v1754_v27 = vpop.f32.mrf.mxu2  ;;  %2030 = vmatmul.f32.gmra.mxu0 %v745_v47  ;;  %2285 = vmatmul.f32.gmra.mxu3 %v911_v25 }
 0x1eb   : > { %v1755_v46 = vadd.f32 %v1754_v27, %v1642_v6 }
 0x1ed   : > { %v1868_v35 = vadd.f32 %v5979_v34, %v1755_v46  ;;  %v915_v46 = vld [vmem:[#allocation2 + $0x168] sm:$0xff] }
 0x1ef   : > { %1804 = vmatmul.f32.gmra.mxu2 %v5981_v31  ;;  %v6040_v41 = vadd.f32 %v1980_v26, %v1868_v35  ;;  %v1986_v15 = vpop.f32.mrf.mxu0  ;;  %v1882_v30 = vpop.f32.mrf.mxu3  ;;  %v912_v31 = vld [vmem:[#allocation2 + $0x150] sm:$0xff] }
 0x1f0   : > { %v977_v35 = vld [vmem:[#allocation2 + $0x270] sm:$0xff] }
 0x1f2   : > { %v1757_v62 = vpop.f32.mrf.mxu2  ;;  %2033 = vmatmul.f32.gmra.mxu0 %v5988_v52  ;;  %2288 = vmatmul.f32.gmra.mxu3 %v912_v31 }
 0x1f3   : > { %v1758_v63 = vadd.f32 %v1757_v62, %v1645_v23  ;;  %v847_v23 = vld [vmem:[#allocation2 + $0x30] sm:$0xff] }
 0x1f5   : > { %v1871_v34 = vadd.f32 %v5997_v5, %v1758_v63  ;;  %v913_v5 = vld [vmem:[#allocation2 + $0x158] sm:$0xff]  ;;  %v916_v63 = vld [vmem:[#allocation2 + $0x170] sm:$0xff] }
 0x1f7   : > { %1807 = vmatmul.f32.gmra.mxu2 %v5999_v38  ;;  %v6050_v61 = vadd.f32 %v1983_v54, %v1871_v34  ;;  %v1989_v14 = vpop.f32.mrf.mxu0  ;;  %v1885_v58 = vpop.f32.mrf.mxu3 }
 0x1fa   : > { %v1760_v52 = vpop.f32.mrf.mxu2  ;;  %2036 = vmatmul.f32.gmra.mxu0 %v6006_v32  ;;  %2291 = vmatmul.f32.gmra.mxu3 %v913_v5 }
 0x1fb   : > { %v1761_v26 = vadd.f32 %v1760_v52, %v1648_v60  ;;  %v848_v60 = vld [vmem:[#allocation2 + $0x38] sm:$0xff] }
 0x1fd   : > { %v1874_v1 = vadd.f32 %v6015_v33, %v1761_v26  ;;  %v914_v33 = vld [vmem:[#allocation2 + $0x160] sm:$0xff] }
 0x1fe   : > { %v3545_v26 = vld [vmem:[#allocation10 + $0x20] sm:$0xff] }
 0x1ff   : > { %1810 = vmatmul.f32.gmra.mxu2 %v6017_v0  ;;  %v6057_v38 = vadd.f32 %v1986_v15, %v1874_v1  ;;  %v1992_v12 = vpop.f32.mrf.mxu0  ;;  %v1888_v32 = vpop.f32.mrf.mxu3  ;;  %v976_v0 = vld [vmem:[#allocation2 + $0x268] sm:$0xff]  ;;  %3700 = vmatpush.msra.mxu1 %v3545_v26  ;;  %v979_v1 = vld [vmem:[#allocation2 + $0x280] sm:$0xff]  ;;  %v3543_v26 = vld [vmem:[#allocation10 + $0x10] sm:$0xff] }
 0x202   : > { %v1763_v17 = vpop.f32.mrf.mxu2  ;;  %2395 = vmatmul.f32.vlgmr.msra.gmra.mxu0 %v975_v29  ;;  %2294 = vmatmul.f32.gmra.mxu3 %v914_v33 }
 0x203   : > { %v1764_v51 = vadd.f32 %v1763_v17, %v1651_v50  ;;  %v849_v50 = vld [vmem:[#allocation2 + $0x40] sm:$0xff] }
 0x204   : > { %v918_v17 = vld [vmem:[#allocation2 + $0x180] sm:$0xff] }
 0x205   : > { %v1877_v45 = vadd.f32 %v6027_v48, %v1764_v51 }
 0x207   : > { %2169 = vmatmul.f32.vlgmr.msra.gmra.mxu2 %v845_v11  ;;  %v6061_v19 = vadd.f32 %v1989_v14, %v1877_v45  ;;  %v1995_v20 = vpop.f32.mrf.mxu0  ;;  %v1891_v47 = vpop.f32.mrf.mxu3  ;;  %v980_v11 = vld [vmem:[#allocation2 + $0x288] sm:$0xff] }
 0x20a   : > { %v1766_v54 = vpop.f32.mrf.mxu2  ;;  %2398 = vmatmul.f32.gmra.mxu0 %v976_v0  ;;  %2297 = vmatmul.f32.gmra.mxu3 %v915_v46 }
 0x20b   : > { %v1767_v6 = vadd.f32 %v1766_v54, %v5712_v24  ;;  %v6067_v24 = vpop.f32.mrf.mxu1  ;;  %v850_v54 = vld [vmem:[#allocation2 + $0x48] sm:$0xff] }
 0x20d   : > { %v1880_v27 = vadd.f32 %v1879_v40, %v1767_v6 }
 0x20f   : > { %2172 = vmatmul.f32.gmra.mxu2 %v846_v10  ;;  %v6064_v22 = vadd.f32 %v1992_v12, %v1880_v27  ;;  %v1998_v48 = vpop.f32.mrf.mxu0  ;;  %v1894_v25 = vpop.f32.mrf.mxu3  ;;  %v3544_v10 = vld [vmem:[#allocation10 + $0x18] sm:$0xff] }
 0x210   : > { %3701 = vmatpush.msra.mxu1 %v3544_v10 }
 0x212   : > { %v1769_v4 = vpop.f32.mrf.mxu2  ;;  %2401 = vmatmul.f32.gmra.mxu0 %v977_v35  ;;  %2300 = vmatmul.f32.gmra.mxu3 %v916_v63  ;;  %v982_v63 = vld [vmem:[#allocation2 + $0x298] sm:$0xff] }
 0x213   : > { %v1770_v15 = vadd.f32 %v1769_v4, %v5722_v37  ;;  %v917_v37 = vld [vmem:[#allocation2 + $0x178] sm:$0xff]  ;;  %v6074_v28 = vpop.f32.mrf.mxu1  ;;  %v851_v4 = vld [vmem:[#allocation2 + $0x50] sm:$0xff]  ;;  %3702 = vmatpush.msra.mxu1 %v3543_v26 }
 0x215   : > { %v1883_v62 = vadd.f32 %v1882_v30, %v1770_v15 }
 0x217   : > { %2175 = vmatmul.f32.gmra.mxu2 %v847_v23  ;;  %v6069_v40 = vadd.f32 %v1995_v20, %v1883_v62  ;;  %v2001_v13 = vpop.f32.mrf.mxu0  ;;  %v1897_v31 = vpop.f32.mrf.mxu3  ;;  %v920_v23 = vld [vmem:[#allocation2 + $0x190] sm:$0xff] }
 0x21a   : > { %v1772_v34 = vpop.f32.mrf.mxu2  ;;  %2404 = vmatmul.f32.gmra.mxu0 %v978_v36  ;;  %2303 = vmatmul.f32.gmra.mxu3 %v917_v37 }
 0x21b   : > { %v1773_v14 = vadd.f32 %v1772_v34, %v5731_v39  ;;  %v6079_v20 = vpop.f32.mrf.mxu1  ;;  %v7409_v34 = vld [vmem:[#allocation15_spill] sm:$0xff] }
 0x21d   : > { %v1886_v52 = vadd.f32 %v1885_v58, %v1773_v14 }
 0x21f   : > { %2178 = vmatmul.f32.gmra.mxu2 %v848_v60  ;;  %v6072_v30 = vadd.f32 %v1998_v48, %v1886_v52  ;;  %v2004_v59 = vpop.f32.mrf.mxu0  ;;  %v1900_v12 = vpop.f32.mrf.mxu3  ;;  %v852_v60 = vld [vmem:[#allocation2 + $0x58] sm:$0xff] }
 0x222   : > { %v1775_v5 = vpop.f32.mrf.mxu2  ;;  %2407 = vmatmul.f32.gmra.mxu0 %v979_v1  ;;  %2306 = vmatmul.f32.gmra.mxu3 %v918_v17  ;;  %v983_v1 = vld [vmem:[#allocation2 + $0x2a0] sm:$0xff] }
 0x223   : > { %v1776_v29 = vadd.f32 %v1775_v5, %v5740_v49  ;;  %v919_v49 = vld [vmem:[#allocation2 + $0x188] sm:$0xff]  ;;  %v6085_v15 = vpop.f32.mrf.mxu1  ;;  %v853_v17 = vld [vmem:[#allocation2 + $0x60] sm:$0xff] }
 0x225   : > { %v1889_v39 = vadd.f32 %v1888_v32, %v1776_v29 }
 0x227   : > { %2181 = vmatmul.f32.gmra.mxu2 %v849_v50  ;;  %v6077_v58 = vadd.f32 %v2001_v13, %v1889_v39  ;;  %v2007_v51 = vpop.f32.mrf.mxu0  ;;  %v1903_v33 = vpop.f32.mrf.mxu3  ;;  %v7410_v50 = vld [vmem:[#allocation16_spill] sm:$0xff] }
 0x22a   : > { %v1778_v45 = vpop.f32.mrf.mxu2  ;;  %2410 = vmatmul.f32.gmra.mxu0 %v980_v11  ;;  %2309 = vmatmul.f32.gmra.mxu3 %v919_v49  ;;  %v922_v11 = vld [vmem:[#allocation2 + $0x1a0] sm:$0xff]  ;;  %v7411_v49 = vld [vmem:[#allocation17_spill] sm:$0xff] }
 0x22b   : > { %v1779_v0 = vadd.f32 %v1778_v45, %v5749_v56  ;;  %v6090_v37 = vpop.f32.mrf.mxu1 }
 0x22d   : > { %v1892_v6 = vadd.f32 %v1891_v47, %v1779_v0  ;;  %v984_v0 = vld [vmem:[#allocation2 + $0x2a8] sm:$0xff] }
 0x22f   : > { %2184 = vmatmul.f32.gmra.mxu2 %v850_v54  ;;  %v6082_v32 = vadd.f32 %v2004_v59, %v1892_v6  ;;  %v2010_v27 = vpop.f32.mrf.mxu0  ;;  %v1906_v48 = vpop.f32.mrf.mxu3 }
 0x232   : > { %v1781_v46 = vpop.f32.mrf.mxu2  ;;  %2413 = vmatmul.f32.gmra.mxu0 %v981_v2  ;;  %2312 = vmatmul.f32.gmra.mxu3 %v920_v23  ;;  %v854_v2 = vld [vmem:[#allocation2 + $0x68] sm:$0xff]  ;;  %v985_v23 = vld [vmem:[#allocation2 + $0x2b0] sm:$0xff] }
 0x233   : > { %v1782_v35 = vadd.f32 %v1781_v46, %v5758_v3  ;;  %v921_v3 = vld [vmem:[#allocation2 + $0x198] sm:$0xff]  ;;  %v6097_v54 = vpop.f32.mrf.mxu1 }
 0x235   : > { %v1895_v56 = vadd.f32 %v1894_v25, %v1782_v35  ;;  %v3542_v35 = vld [vmem:[#allocation10 + $0x8] sm:$0xff] }
 0x236   : > { %3703 = vmatpush.msra.mxu1 %v3542_v35 }
 0x237   : > { %2187 = vmatmul.f32.gmra.mxu2 %v851_v4  ;;  %v6087_v47 = vadd.f32 %v2007_v51, %v1895_v56  ;;  %v2013_v62 = vpop.f32.mrf.mxu0  ;;  %v1909_v36 = vpop.f32.mrf.mxu3 }
 0x23a   : > { %v1784_v13 = vpop.f32.mrf.mxu2  ;;  %2416 = vmatmul.f32.gmra.mxu0 %v982_v63  ;;  %2315 = vmatmul.f32.gmra.mxu3 %v921_v3 }
 0x23b   : > { %v1785_v14 = vadd.f32 %v1784_v13, %v7409_v34  ;;  %v6106_v13 = vpop.f32.mrf.mxu1  ;;  %v7413_v34 = vld [vmem:[#allocation18_spill] sm:$0xff] }
 0x23d   : > { %v1898_v52 = vadd.f32 %v1897_v31, %v1785_v14 }
 0x23f   : > { %2190 = vmatmul.f32.gmra.mxu2 %v852_v60  ;;  %v6092_v25 = vadd.f32 %v2010_v27, %v1898_v52  ;;  %v2016_v59 = vpop.f32.mrf.mxu0  ;;  %v1912_v29 = vpop.f32.mrf.mxu3  ;;  %v855_v60 = vld [vmem:[#allocation2 + $0x70] sm:$0xff] }
 0x242   : > { %v1787_v5 = vpop.f32.mrf.mxu2  ;;  %2419 = vmatmul.f32.gmra.mxu0 %v983_v1  ;;  %2318 = vmatmul.f32.gmra.mxu3 %v922_v11 }
 0x243   : > { %v1788_v39 = vadd.f32 %v1787_v5, %v7410_v50  ;;  %v7415_v50 = vld [vmem:[#allocation19_spill] sm:$0xff] }
 0x245   : > { %v1901_v51 = vadd.f32 %v1900_v12, %v1788_v39  ;;  %v923_v12 = vld [vmem:[#allocation2 + $0x1a8] sm:$0xff] }
 0x247   : > { %2193 = vmatmul.f32.gmra.mxu2 %v853_v17  ;;  %v6095_v31 = vadd.f32 %v2013_v62, %v1901_v51  ;;  %v2019_v45 = vpop.f32.mrf.mxu0  ;;  %v6099_v10 = vpop.f32.mrf.mxu3  ;;  %v856_v17 = vld [vmem:[#allocation2 + $0x78] sm:$0xff] }
 0x248   : > { %v6114_v51 = vpop.f32.mrf.mxu1 }
 0x24a   : > { %v1790_v6 = vpop.f32.mrf.mxu2  ;;  %2422 = vmatmul.f32.gmra.mxu0 %v984_v0  ;;  %2321 = vmatmul.f32.gmra.mxu3 %v923_v12  ;;  %v3541_v0 = vld [vmem:[#allocation10] sm:$0xff]  ;;  %v7417_v12 = vld [vmem:[#allocation20_spill] sm:$0xff] }
 0x24b   : > { %v1791_v27 = vadd.f32 %v1790_v6, %v7411_v49  ;;  %3704 = vmatpush.msra.mxu1 %v3541_v0  ;;  %v987_v49 = vld [vmem:[#allocation2 + $0x2c0] sm:$0xff] }
 0x24d   : > { %v1904_v46 = vadd.f32 %v1903_v33, %v1791_v27  ;;  %v924_v33 = vld [vmem:[#allocation2 + $0x1b0] sm:$0xff]  ;;  %v3572_v27 = vld [vmem:[#allocation10 + $0xf8] sm:$0xff] }
 0x24e   : > { %3802 = vmatpush.msrb.mxu2 %v3572_v27 }
 0x24f   : > { %2196 = vmatmul.f32.gmra.mxu2 %v854_v2  ;;  %v6102_v4 = vadd.f32 %v2016_v59, %v1904_v46  ;;  %v2022_v56 = vpop.f32.mrf.mxu0  ;;  %v6104_v63 = vpop.f32.mrf.mxu3  ;;  %v986_v59 = vld [vmem:[#allocation2 + $0x2b8] sm:$0xff] }
 0x250   : > { %v3588_v2 = vld [vmem:[#allocation10 + $0x178] sm:$0xff] }
 0x251   : > { %7412 = vst [vmem:[#allocation15_spill] sm:$0xff] %v6102_v4  ;;  %3915 = vmatpush.msrb.mxu3 %v3588_v2  ;;  %v5038_v2 = vld [vmem:[#allocation2 + $0x2d0] sm:$0xff] }
 0x252   : > { %v1793_v62 = vpop.f32.mrf.mxu2  ;;  %2425 = vmatmul.f32.gmra.mxu0 %v985_v23  ;;  %2324 = vmatmul.f32.gmra.mxu3 %v924_v33  ;;  %v3604_v33 = vld [vmem:[#allocation10 + $0x1f8] sm:$0xff] }
 0x253   : > { %v1794_v14 = vadd.f32 %v1793_v62, %v7413_v34  ;;  %v926_v34 = vld [vmem:[#allocation2 + $0x1c0] sm:$0xff]  ;;  %4028 = vmatpush.msrb.mxu0 %v3604_v33 }
 0x255   : > { %v1907_v52 = vadd.f32 %v1906_v48, %v1794_v14  ;;  %v925_v48 = vld [vmem:[#allocation2 + $0x1b8] sm:$0xff]  ;;  %v6121_v14 = vpop.f32.mrf.mxu1 }
 0x257   : > { %2199 = vmatmul.f32.gmra.mxu2 %v855_v60  ;;  %v6109_v26 = vadd.f32 %v2019_v45, %v1907_v52  ;;  %v2025_v3 = vpop.f32.mrf.mxu0  ;;  %v6111_v5 = vpop.f32.mrf.mxu3  ;;  %v988_v52 = vld [vmem:[#allocation2 + $0x2c8] sm:$0xff] }
 0x259   : > { %7414 = vst [vmem:[#allocation16_spill] sm:$0xff] %v6109_v26 }
 0x25a   : > { %v1796_v1 = vpop.f32.mrf.mxu2  ;;  %2428 = vmatmul.f32.gmra.mxu0 %v986_v59  ;;  %2327 = vmatmul.f32.gmra.mxu3 %v925_v48  ;;  %v927_v48 = vld [vmem:[#allocation2 + $0x1c8] sm:$0xff] }
 0x25b   : > { %v1797_v39 = vadd.f32 %v1796_v1, %v7415_v50  ;;  %v7419_v50 = vld [vmem:[#allocation21_spill] sm:$0xff] }
 0x25d   : > { %v1910_v11 = vadd.f32 %v1909_v36, %v1797_v39  ;;  %v857_v36 = vld [vmem:[#allocation2 + $0x80] sm:$0xff] }
 0x25f   : > { %2202 = vmatmul.f32.gmra.mxu2 %v856_v17  ;;  %v6116_v6 = vadd.f32 %v2022_v56, %v1910_v11  ;;  %v2028_v45 = vpop.f32.mrf.mxu0  ;;  %v6118_v35 = vpop.f32.mrf.mxu3  ;;  %v858_v17 = vld [vmem:[#allocation2 + $0x88] sm:$0xff]  ;;  %v2673_v11 = vld [vmem:[#allocation3] sm:$0xff] }
 0x260   : > { %3705 = vmatmul.f32.vlgmr.msra.gmra.mxu1 %v2673_v11  ;;  %v7423_v11 = vld [vmem:[#allocation23_spill] sm:$0xff] }
 0x261   : > { %7416 = vst [vmem:[#allocation17_spill] sm:$0xff] %v6116_v6 }
 0x262   : > { %v1799_v46 = vpop.f32.mrf.mxu2  ;;  %2431 = vmatmul.f32.gmra.mxu0 %v987_v49  ;;  %2330 = vmatmul.f32.gmra.mxu3 %v926_v34  ;;  %v6131_v49 = vpop.f32.mrf.mxu1  ;;  %v3571_v34 = vld [vmem:[#allocation10 + $0xf0] sm:$0xff] }
 0x263   : > { %v1800_v23 = vadd.f32 %v1799_v46, %v7417_v12  ;;  %v7421_v46 = vld [vmem:[#allocation22_spill] sm:$0xff]  ;;  %3803 = vmatpush.msrb.mxu2 %v3571_v34  ;;  %v7425_v34 = vld [vmem:[#allocation24_spill] sm:$0xff] }
 0x265   : > { %v1913_v62 = vadd.f32 %v1912_v29, %v1800_v23  ;;  %v859_v23 = vld [vmem:[#allocation2 + $0x90] sm:$0xff] }
 0x267   : > { %2205 = vmatmul.f32.gmra.mxu2 %v857_v36  ;;  %v6123_v56 = vadd.f32 %v2025_v3, %v1913_v62  ;;  %v2031_v60 = vpop.f32.mrf.mxu0  ;;  %v6125_v1 = vpop.f32.mrf.mxu3 }
 0x269   : > { %7418 = vst [vmem:[#allocation18_spill] sm:$0xff] %v6123_v56 }
 0x26a   : > { %v1802_v59 = vpop.f32.mrf.mxu2  ;;  %2434 = vmatmul.f32.gmra.mxu0 %v988_v52  ;;  %2333 = vmatmul.f32.gmra.mxu3 %v927_v48  ;;  %v3587_v52 = vld [vmem:[#allocation10 + $0x170] sm:$0xff]  ;;  %v860_v48 = vld [vmem:[#allocation2 + $0x98] sm:$0xff] }
 0x26b   : > { %v1803_v39 = vadd.f32 %v1802_v59, %v7419_v50  ;;  %3916 = vmatpush.msrb.mxu3 %v3587_v52  ;;  %v928_v50 = vld [vmem:[#allocation2 + $0x1d0] sm:$0xff] }
 0x26d   : > { %v1916_v29 = vadd.f32 %v6099_v10, %v1803_v39  ;;  %v3620_v10 = vld [vmem:[#allocation10 + $0x278] sm:$0xff] }
 0x26e   : > { %4141 = vmatpush.msrb.mxu1 %v3620_v10  ;;  %v5041_v10 = vld [vmem:[#allocation2 + $0x2e0] sm:$0xff] }
 0x26f   : > { %2208 = vmatmul.f32.gmra.mxu2 %v858_v17  ;;  %v6129_v0 = vadd.f32 %v2028_v45, %v1916_v29  ;;  %v2034_v3 = vpop.f32.mrf.mxu0  ;;  %v6134_v36 = vpop.f32.mrf.mxu3  ;;  %v6137_v45 = vld [vmem:[#allocation2 + $0x8] sm:$0xff]  ;;  %v5040_v17 = vld [vmem:[#allocation2 + $0x2d8] sm:$0xff] }
 0x270   : > { %3708 = vmatmul.f32.gmra.mxu1 %v6137_v45 }
 0x271   : > { %7420 = vst [vmem:[#allocation19_spill] sm:$0xff] %v6129_v0 }
 0x272   : > { %v1805_v27 = vpop.f32.mrf.mxu2  ;;  %2437 = vmatmul.f32.gmra.mxu0 %v5038_v2  ;;  %2336 = vmatmul.f32.gmra.mxu3 %v928_v50  ;;  %v861_v50 = vld [vmem:[#allocation2 + $0xa0] sm:$0xff] }
 0x273   : > { %v1806_v12 = vadd.f32 %v1805_v27, %v7421_v46  ;;  %v3603_v46 = vld [vmem:[#allocation10 + $0x1f0] sm:$0xff] }
 0x274   : > { %4029 = vmatpush.msrb.mxu0 %v3603_v46  ;;  %v930_v46 = vld [vmem:[#allocation2 + $0x1e0] sm:$0xff] }
 0x275   : > { %v1919_v62 = vadd.f32 %v6104_v63, %v1806_v12  ;;  %v6142_v63 = vpop.f32.mrf.mxu1 }
 0x277   : > { %2211 = vmatmul.f32.gmra.mxu2 %v859_v23  ;;  %v6140_v33 = vadd.f32 %v2031_v60, %v1919_v62  ;;  %v2037_v59 = vpop.f32.mrf.mxu0  ;;  %v6145_v27 = vpop.f32.mrf.mxu3  ;;  %v929_v23 = vld [vmem:[#allocation2 + $0x1d8] sm:$0xff] }
 0x279   : > { %7422 = vst [vmem:[#allocation20_spill] sm:$0xff] %v6140_v33 }
 0x27a   : > { %v1808_v39 = vpop.f32.mrf.mxu2  ;;  %2440 = vmatmul.f32.gmra.mxu0 %v5040_v17  ;;  %2339 = vmatmul.f32.gmra.mxu3 %v929_v23 }
 0x27b   : > { %v1809_v29 = vadd.f32 %v1808_v39, %v7423_v11  ;;  %v3619_v11 = vld [vmem:[#allocation10 + $0x270] sm:$0xff] }
 0x27c   : > { %4142 = vmatpush.msrb.mxu1 %v3619_v11 }
 0x27d   : > { %v1922_v2 = vadd.f32 %v6111_v5, %v1809_v29  ;;  %v6153_v17 = vpop.f32.mrf.mxu1  ;;  %v3570_v29 = vld [vmem:[#allocation10 + $0xe8] sm:$0xff] }
 0x27e   : > { %3804 = vmatpush.msrb.mxu2 %v3570_v29 }
 0x27f   : > { %2214 = vmatmul.f32.gmra.mxu2 %v860_v48  ;;  %v6148_v60 = vadd.f32 %v2034_v3, %v1922_v2  ;;  %v2396_v12 = vpop.f32.mrf.mxu0  ;;  %v6151_v39 = vpop.f32.mrf.mxu3  ;;  %v3586_v48 = vld [vmem:[#allocation10 + $0x168] sm:$0xff] }
 0x280   : > { %3917 = vmatpush.msrb.mxu3 %v3586_v48 }
 0x281   : > { %7424 = vst [vmem:[#allocation21_spill] sm:$0xff] %v6148_v60 }
 0x282   : > { %v1811_v62 = vpop.f32.mrf.mxu2  ;;  %2443 = vmatmul.f32.gmra.mxu0 %v5041_v10  ;;  %2342 = vmatmul.f32.gmra.mxu3 %v930_v46  ;;  %v5043_v46 = vld [vmem:[#allocation2 + $0x2f0] sm:$0xff] }
 0x283   : > { %v1812_v52 = vadd.f32 %v1811_v62, %v7425_v34  ;;  %v5042_v62 = vld [vmem:[#allocation2 + $0x2e8] sm:$0xff] }
 0x284   : > { %v862_v34 = vld [vmem:[#allocation2 + $0xa8] sm:$0xff] }
 0x285   : > { %v1925_v5 = vadd.f32 %v6118_v35, %v1812_v52  ;;  %v3602_v52 = vld [vmem:[#allocation10 + $0x1e8] sm:$0xff]  ;;  %v6162_v11 = vpop.f32.mrf.mxu1 }
 0x286   : > { %4030 = vmatpush.msrb.mxu0 %v3602_v52 }
 0x287   : > { %2217 = vmatmul.f32.gmra.mxu2 %v861_v50  ;;  %v6156_v3 = vadd.f32 %v2037_v59, %v1925_v5  ;;  %v2399_v2 = vpop.f32.mrf.mxu0  ;;  %v6159_v60 = vpop.f32.mrf.mxu3  ;;  %v931_v5 = vld [vmem:[#allocation2 + $0x1e8] sm:$0xff] }
 0x289   : > { %7426 = vst [vmem:[#allocation22_spill] sm:$0xff] %v6156_v3 }
 0x28a   : > { %v2170_v23 = vpop.f32.mrf.mxu2  ;;  %2446 = vmatmul.f32.gmra.mxu0 %v5042_v62  ;;  %2345 = vmatmul.f32.gmra.mxu3 %v931_v5  ;;  %v3618_v62 = vld [vmem:[#allocation10 + $0x268] sm:$0xff] }
 0x28b   : > { %v2171_v10 = vadd.f32 %v2170_v23, %v5893_v43  ;;  %4143 = vmatpush.msrb.mxu1 %v3618_v62  ;;  %v3601_v62 = vld [vmem:[#allocation10 + $0x1e0] sm:$0xff] }
 0x28c   : > { %4031 = vmatpush.msrb.mxu0 %v3601_v62  ;;  %v3584_v62 = vld [vmem:[#allocation10 + $0x158] sm:$0xff] }
 0x28d   : > { %v2284_v35 = vadd.f32 %v6125_v1, %v2171_v10  ;;  %v863_v1 = vld [vmem:[#allocation2 + $0xb0] sm:$0xff]  ;;  %v3569_v10 = vld [vmem:[#allocation10 + $0xe0] sm:$0xff] }
 0x28e   : > { %3805 = vmatpush.msrb.mxu2 %v3569_v10 }
 0x28f   : > { %v2397_v59 = vadd.f32 %v2396_v12, %v2284_v35  ;;  %2220 = vmatmul.f32.gmra.mxu2 %v862_v34  ;;  %v2402_v50 = vpop.f32.mrf.mxu0  ;;  %v6169_v23 = vpop.f32.mrf.mxu3  ;;  %v3585_v34 = vld [vmem:[#allocation10 + $0x160] sm:$0xff] }
 0x290   : > { %3918 = vmatpush.msrb.mxu3 %v3585_v34 }
 0x291   : > { %v6164_v29 = vmax.f32 %v2397_v59, 0.0  ;;  %v932_v59 = vld [vmem:[#allocation2 + $0x1f0] sm:$0xff] }
 0x292   : > { %v2173_v48 = vpop.f32.mrf.mxu2  ;;  %2449 = vmatmul.f32.gmra.mxu0 %v5043_v46  ;;  %2348 = vmatmul.f32.gmra.mxu3 %v932_v59  ;;  %v5044_v46 = vld [vmem:[#allocation2 + $0x2f8] sm:$0xff] }
 0x293   : > { %2575 = vst [vmem:[#allocation3 + $0x130] sm:$0xff] %v6164_v29  ;;  %v2174_v43 = vadd.f32 %v2173_v48, %v5905_v42  ;;  %v6173_v42 = vpop.f32.mrf.mxu1  ;;  %3919 = vmatpush.msrb.mxu3 %v3584_v62 }
 0x294   : > { %2608 = vst [vmem:[#allocation3 + $0x11] sm:$0xff] %v6164_v29 }
 0x295   : > { %2641 = vst [vmem:[#allocation3 + $0x24f] sm:$0xfe] %v6164_v29  ;;  %v2287_v12 = vadd.f32 %v6134_v36, %v2174_v43 }
 0x297   : > { %v2400_v35 = vadd.f32 %v2399_v2, %v2287_v12  ;;  %2223 = vmatmul.f32.gmra.mxu2 %v863_v1  ;;  %v2405_v52 = vpop.f32.mrf.mxu0  ;;  %v864_v2 = vld [vmem:[#allocation2 + $0xb8] sm:$0xff]  ;;  %v6183_v1 = vpop.f32.mrf.mxu3 }
 0x299   : > { %v6175_v5 = vmax.f32 %v2400_v35, 0.0  ;;  %v933_v35 = vld [vmem:[#allocation2 + $0x1f8] sm:$0xff] }
 0x29a   : > { %v2176_v48 = vpop.f32.mrf.mxu2  ;;  %2452 = vmatmul.f32.gmra.mxu0 %v5044_v46  ;;  %2351 = vmatmul.f32.gmra.mxu3 %v933_v35  ;;  %v996_v35 = vld [vmem:[#allocation2 + $0x308] sm:$0xff] }
 0x29b   : > { %2576 = vst [vmem:[#allocation3 + $0x138] sm:$0xff] %v6175_v5  ;;  %v2177_v36 = vadd.f32 %v2176_v48, %v5917_v8  ;;  %v6179_v43 = vld [vmem:[#allocation3 + $0x10] sm:$0xff]  ;;  %v5045_v48 = vld [vmem:[#allocation2 + $0x300] sm:$0xff]  ;;  %v6189_v46 = vpop.f32.mrf.mxu1 }
 0x29c   : > { %2609 = vst [vmem:[#allocation3 + $0x19] sm:$0x7f] %v6175_v5  ;;  %3711 = vmatmul.f32.gmra.mxu1 %v6179_v43 }
 0x29d   : > { %2642 = vst [vmem:[#allocation3 + $0x257] sm:$0xff] %v6175_v5  ;;  %v2290_v12 = vadd.f32 %v6145_v27, %v2177_v36  ;;  %v865_v27 = vld [vmem:[#allocation2 + $0xc0] sm:$0xff] }
 0x29f   : > { %v2403_v10 = vadd.f32 %v2402_v50, %v2290_v12  ;;  %2226 = vmatmul.f32.gmra.mxu2 %v864_v2  ;;  %v2408_v34 = vpop.f32.mrf.mxu0  ;;  %v6197_v50 = vpop.f32.mrf.mxu3  ;;  %v3617_v2 = vld [vmem:[#allocation10 + $0x260] sm:$0xff]  ;;  %v3568_v12 = vld [vmem:[#allocation10 + $0xd8] sm:$0xff] }
 0x2a0   : > { %4144 = vmatpush.msrb.mxu1 %v3617_v2  ;;  %3806 = vmatpush.msrb.mxu2 %v3568_v12  ;;  %v3600_v12 = vld [vmem:[#allocation10 + $0x1d8] sm:$0xff] }
 0x2a1   : > { %v6187_v8 = vmax.f32 %v2403_v10, 0.0  ;;  %4032 = vmatpush.msrb.mxu0 %v3600_v12  ;;  %v3583_v12 = vld [vmem:[#allocation10 + $0x150] sm:$0xff] }
 0x2a2   : > { %v2179_v59 = vpop.f32.mrf.mxu2  ;;  %2455 = vmatmul.f32.gmra.mxu0 %v5045_v48  ;;  %3920 = vmatpush.msrb.mxu3 %v3583_v12 }
 0x2a3   : > { %2577 = vst [vmem:[#allocation3 + $0x140] sm:$0xff] %v6187_v8  ;;  %v2180_v3 = vadd.f32 %v2179_v59, %v5929_v7  ;;  %v6193_v33 = vld [vmem:[#allocation3 + $0x18] sm:$0xff]  ;;  %v934_v59 = vld [vmem:[#allocation2 + $0x200] sm:$0xff] }
 0x2a4   : > { %2610 = vst [vmem:[#allocation3 + $0x21] sm:$0xff] %v6187_v8  ;;  %3714 = vmatmul.f32.gmra.mxu1 %v6193_v33  ;;  %2354 = vmatmul.f32.gmra.mxu3 %v934_v59 }
 0x2a5   : > { %2643 = vst [vmem:[#allocation3 + $0x25f] sm:$0xfe] %v6187_v8  ;;  %v2293_v36 = vadd.f32 %v6151_v39, %v2180_v3 }
 0x2a7   : > { %v2406_v10 = vadd.f32 %v2405_v52, %v2293_v36  ;;  %2229 = vmatmul.f32.gmra.mxu2 %v865_v27  ;;  %v2411_v7 = vpop.f32.mrf.mxu0  ;;  %v866_v52 = vld [vmem:[#allocation2 + $0xc8] sm:$0xff]  ;;  %v6209_v27 = vpop.f32.mrf.mxu3 }
 0x2a8   : > { %v6211_v36 = vpop.f32.mrf.mxu1 }
 0x2a9   : > { %v6201_v48 = vmax.f32 %v2406_v10, 0.0  ;;  %7427 = vst [vmem:[#allocation23_spill] sm:$0xff] %v6211_v36  ;;  %v935_v10 = vld [vmem:[#allocation2 + $0x208] sm:$0xff] }
 0x2aa   : > { %v2182_v0 = vpop.f32.mrf.mxu2  ;;  %2458 = vmatmul.f32.gmra.mxu0 %v996_v35 }
 0x2ab   : > { %2578 = vst [vmem:[#allocation3 + $0x148] sm:$0xff] %v6201_v48  ;;  %v2183_v39 = vadd.f32 %v2182_v0, %v5941_v16  ;;  %v6205_v3 = vld [vmem:[#allocation3 + $0x20] sm:$0xff]  ;;  %v997_v0 = vld [vmem:[#allocation2 + $0x310] sm:$0xff] }
 0x2ac   : > { %2611 = vst [vmem:[#allocation3 + $0x29] sm:$0x7f] %v6201_v48  ;;  %3717 = vmatmul.f32.gmra.mxu1 %v6205_v3  ;;  %2357 = vmatmul.f32.gmra.mxu3 %v935_v10  ;;  %v998_v10 = vld [vmem:[#allocation2 + $0x318] sm:$0xff] }
 0x2ad   : > { %2644 = vst [vmem:[#allocation3 + $0x267] sm:$0xff] %v6201_v48  ;;  %v2296_v2 = vadd.f32 %v6159_v60, %v2183_v39  ;;  %v867_v60 = vld [vmem:[#allocation2 + $0xd0] sm:$0xff] }
 0x2af   : > { %v2409_v62 = vadd.f32 %v2408_v34, %v2296_v2  ;;  %2232 = vmatmul.f32.gmra.mxu2 %v866_v52  ;;  %v2414_v16 = vpop.f32.mrf.mxu0  ;;  %v6223_v34 = vpop.f32.mrf.mxu3  ;;  %v3616_v52 = vld [vmem:[#allocation10 + $0x258] sm:$0xff]  ;;  %v3567_v2 = vld [vmem:[#allocation10 + $0xd0] sm:$0xff] }
 0x2b0   : > { %4145 = vmatpush.msrb.mxu1 %v3616_v52  ;;  %3807 = vmatpush.msrb.mxu2 %v3567_v2  ;;  %v3599_v52 = vld [vmem:[#allocation10 + $0x1d0] sm:$0xff] }
 0x2b1   : > { %v6215_v35 = vmax.f32 %v2409_v62, 0.0  ;;  %v6227_v62 = vpop.f32.mrf.mxu1  ;;  %4033 = vmatpush.msrb.mxu0 %v3599_v52  ;;  %v3582_v52 = vld [vmem:[#allocation10 + $0x148] sm:$0xff] }
 0x2b2   : > { %v2185_v59 = vpop.f32.mrf.mxu2  ;;  %2461 = vmatmul.f32.gmra.mxu0 %v997_v0  ;;  %7428 = vst [vmem:[#allocation24_spill] sm:$0xff] %v6227_v62  ;;  %3921 = vmatpush.msrb.mxu3 %v3582_v52  ;;  %v1001_v52 = vld [vmem:[#allocation2 + $0x330] sm:$0xff] }
 0x2b3   : > { %2579 = vst [vmem:[#allocation3 + $0x150] sm:$0xff] %v6215_v35  ;;  %v2186_v56 = vadd.f32 %v2185_v59, %v5953_v55  ;;  %v6219_v6 = vld [vmem:[#allocation3 + $0x28] sm:$0xff]  ;;  %v936_v59 = vld [vmem:[#allocation2 + $0x210] sm:$0xff] }
 0x2b4   : > { %2612 = vst [vmem:[#allocation3 + $0x31] sm:$0xff] %v6215_v35  ;;  %3720 = vmatmul.f32.gmra.mxu1 %v6219_v6  ;;  %2360 = vmatmul.f32.gmra.mxu3 %v936_v59 }
 0x2b5   : > { %2645 = vst [vmem:[#allocation3 + $0x26f] sm:$0xfe] %v6215_v35  ;;  %v2299_v39 = vadd.f32 %v6169_v23, %v2186_v56 }
 0x2b7   : > { %v2412_v55 = vadd.f32 %v2411_v7, %v2299_v39  ;;  %2235 = vmatmul.f32.gmra.mxu2 %v867_v60  ;;  %v2417_v0 = vpop.f32.mrf.mxu0  ;;  %v868_v7 = vld [vmem:[#allocation2 + $0xd8] sm:$0xff]  ;;  %v6237_v60 = vpop.f32.mrf.mxu3 }
 0x2b9   : > { %v6229_v26 = vmax.f32 %v2412_v55, 0.0  ;;  %v999_v55 = vld [vmem:[#allocation2 + $0x320] sm:$0xff] }
 0x2ba   : > { %v2188_v4 = vpop.f32.mrf.mxu2  ;;  %2464 = vmatmul.f32.gmra.mxu0 %v998_v10 }
 0x2bb   : > { %2580 = vst [vmem:[#allocation3 + $0x158] sm:$0xff] %v6229_v26  ;;  %v2189_v56 = vadd.f32 %v2188_v4, %v5965_v18  ;;  %v6233_v23 = vld [vmem:[#allocation3 + $0x30] sm:$0xff]  ;;  %v937_v18 = vld [vmem:[#allocation2 + $0x218] sm:$0xff]  ;;  %v6241_v4 = vpop.f32.mrf.mxu1 }
 0x2bc   : > { %2613 = vst [vmem:[#allocation3 + $0x39] sm:$0x7f] %v6229_v26  ;;  %3723 = vmatmul.f32.gmra.mxu1 %v6233_v23  ;;  %2363 = vmatmul.f32.gmra.mxu3 %v937_v18  ;;  %v938_v18 = vld [vmem:[#allocation2 + $0x220] sm:$0xff] }
 0x2bd   : > { %2646 = vst [vmem:[#allocation3 + $0x277] sm:$0xff] %v6229_v26  ;;  %v2302_v39 = vadd.f32 %v6183_v1, %v2189_v56  ;;  %v869_v1 = vld [vmem:[#allocation2 + $0xe0] sm:$0xff] }
 0x2be   : > { %7429 = vst [vmem:[#allocation25_spill] sm:$0xff] %v6241_v4 }
 0x2bf   : > { %v2415_v2 = vadd.f32 %v2414_v16, %v2302_v39  ;;  %2238 = vmatmul.f32.gmra.mxu2 %v868_v7  ;;  %v2420_v12 = vpop.f32.mrf.mxu0  ;;  %v6251_v16 = vpop.f32.mrf.mxu3  ;;  %v3615_v7 = vld [vmem:[#allocation10 + $0x250] sm:$0xff]  ;;  %v3566_v39 = vld [vmem:[#allocation10 + $0xc8] sm:$0xff] }
 0x2c0   : > { %4146 = vmatpush.msrb.mxu1 %v3615_v7  ;;  %3808 = vmatpush.msrb.mxu2 %v3566_v39 }
 0x2c1   : > { %v6243_v10 = vmax.f32 %v2415_v2, 0.0 }
 0x2c2   : > { %v2191_v59 = vpop.f32.mrf.mxu2  ;;  %2467 = vmatmul.f32.gmra.mxu0 %v999_v55  ;;  %v1000_v55 = vld [vmem:[#allocation2 + $0x328] sm:$0xff] }
 0x2c3   : > { %7430 = vst [vmem:[#allocation26_spill] sm:$0xff] %v6243_v10  ;;  %v2192_v62 = vadd.f32 %v2191_v59, %v5977_v44  ;;  %v6247_v36 = vld [vmem:[#allocation3 + $0x38] sm:$0xff]  ;;  %v2082_v59 = vadd.f32 %v6067_v24, %v5991_v21  ;;  %v3598_v24 = vld [vmem:[#allocation10 + $0x1c8] sm:$0xff] }
 0x2c4   : > { %2581 = vst [vmem:[#allocation3 + $0x160] sm:$0xff] %v6243_v10  ;;  %3726 = vmatmul.f32.gmra.mxu1 %v6247_v36  ;;  %2366 = vmatmul.f32.gmra.mxu3 %v938_v18 }
 0x2c5   : > { %2614 = vst [vmem:[#allocation3 + $0x41] sm:$0xff] %v6243_v10  ;;  %v2305_v56 = vadd.f32 %v6197_v50, %v2192_v62  ;;  %v6259_v50 = vpop.f32.mrf.mxu1  ;;  %4034 = vmatpush.msrb.mxu0 %v3598_v24 }
 0x2c6   : > { %2647 = vst [vmem:[#allocation3 + $0x27f] sm:$0xfe] %v6243_v10 }
 0x2c7   : > { %v2418_v2 = vadd.f32 %v2417_v0, %v2305_v56  ;;  %2241 = vmatmul.f32.gmra.mxu2 %v869_v1  ;;  %v2423_v44 = vpop.f32.mrf.mxu0  ;;  %7432 = vst [vmem:[#allocation28_spill] sm:$0xff] %v6259_v50  ;;  %v870_v0 = vld [vmem:[#allocation2 + $0xe8] sm:$0xff]  ;;  %v6266_v1 = vpop.f32.mrf.mxu3 }
 0x2c9   : > { %v6257_v4 = vmax.f32 %v2418_v2, 0.0  ;;  %v2085_v2 = vadd.f32 %v6074_v28, %v6009_v9  ;;  %v3614_v28 = vld [vmem:[#allocation10 + $0x248] sm:$0xff] }
 0x2ca   : > { %v2194_v10 = vpop.f32.mrf.mxu2  ;;  %2470 = vmatmul.f32.gmra.mxu0 %v1000_v55  ;;  %4147 = vmatpush.msrb.mxu1 %v3614_v28 }
 0x2cb   : > { %7431 = vst [vmem:[#allocation27_spill] sm:$0xff] %v6257_v4  ;;  %v2195_v62 = vadd.f32 %v2194_v10, %v2082_v59  ;;  %v939_v10 = vld [vmem:[#allocation2 + $0x228] sm:$0xff] }
 0x2cc   : > { %2582 = vst [vmem:[#allocation3 + $0x168] sm:$0xff] %v6257_v4  ;;  %v6262_v7 = vld [vmem:[#allocation3 + $0x40] sm:$0xff]  ;;  %2369 = vmatmul.f32.gmra.mxu3 %v939_v10 }
 0x2cd   : > { %2615 = vst [vmem:[#allocation3 + $0x49] sm:$0x7f] %v6257_v4  ;;  %3729 = vmatmul.f32.gmra.mxu1 %v6262_v7  ;;  %v2308_v21 = vadd.f32 %v6209_v27, %v2195_v62  ;;  %v871_v27 = vld [vmem:[#allocation2 + $0xf0] sm:$0xff]  ;;  %v6281_v62 = vpop.f32.mrf.mxu1  ;;  %v3597_v10 = vld [vmem:[#allocation10 + $0x1c0] sm:$0xff] }
 0x2ce   : > { %2648 = vst [vmem:[#allocation3 + $0x287] sm:$0xff] %v6257_v4  ;;  %4035 = vmatpush.msrb.mxu0 %v3597_v10  ;;  %v3578_v10 = vld [vmem:[#allocation10 + $0x128] sm:$0xff]  ;;  %v3589_v4 = vld [vmem:[#allocation10 + $0x180] sm:$0xff] }
 0x2cf   : > { %v2421_v56 = vadd.f32 %v2420_v12, %v2308_v21  ;;  %2244 = vmatmul.f32.gmra.mxu2 %v870_v0  ;;  %v2426_v39 = vpop.f32.mrf.mxu0  ;;  %v6279_v12 = vpop.f32.mrf.mxu3  ;;  %7434 = vst [vmem:[#allocation30_spill] sm:$0xff] %v6281_v62  ;;  %v3565_v0 = vld [vmem:[#allocation10 + $0xc0] sm:$0xff]  ;;  %v3596_v62 = vld [vmem:[#allocation10 + $0x1b8] sm:$0xff] }
 0x2d0   : > { %v3581_v21 = vld [vmem:[#allocation10 + $0x140] sm:$0xff]  ;;  %3809 = vmatpush.msrb.mxu2 %v3565_v0  ;;  %4036 = vmatpush.msrb.mxu0 %v3596_v62  ;;  %v3579_v0 = vld [vmem:[#allocation10 + $0x130] sm:$0xff]  ;;  %v3594_v62 = vld [vmem:[#allocation10 + $0x1a8] sm:$0xff] }
 0x2d1   : > { %v6272_v55 = vmax.f32 %v2421_v56, 0.0  ;;  %3922 = vmatpush.msrb.mxu3 %v3581_v21  ;;  %v3595_v21 = vld [vmem:[#allocation10 + $0x1b0] sm:$0xff] }
 0x2d2   : > { %v2197_v18 = vpop.f32.mrf.mxu2  ;;  %2473 = vmatmul.f32.gmra.mxu0 %v1001_v52  ;;  %v1002_v52 = vld [vmem:[#allocation2 + $0x338] sm:$0xff] }
 0x2d3   : > { %7433 = vst [vmem:[#allocation29_spill] sm:$0xff] %v6272_v55  ;;  %v2198_v59 = vadd.f32 %v2197_v18, %v2085_v2  ;;  %v2088_v2 = vadd.f32 %v6079_v20, %v6024_v53  ;;  %v872_v53 = vld [vmem:[#allocation2 + $0xf8] sm:$0xff]  ;;  %4037 = vmatpush.msrb.mxu0 %v3595_v21 }
 0x2d4   : > { %2583 = vst [vmem:[#allocation3 + $0x170] sm:$0xff] %v6272_v55  ;;  %v6275_v50 = vld [vmem:[#allocation3 + $0x48] sm:$0xff]  ;;  %2372 = vmatmul.f32.gmra.mxu3 %v6137_v45  ;;  %v3576_v21 = vld [vmem:[#allocation10 + $0x118] sm:$0xff] }
 0x2d5   : > { %2616 = vst [vmem:[#allocation3 + $0x51] sm:$0xff] %v6272_v55  ;;  %3732 = vmatmul.f32.gmra.mxu1 %v6275_v50  ;;  %v2311_v9 = vadd.f32 %v6223_v34, %v2198_v59  ;;  %v3564_v34 = vld [vmem:[#allocation10 + $0xb8] sm:$0xff]  ;;  %4038 = vmatpush.msrb.mxu0 %v3594_v62  ;;  %v3575_v62 = vld [vmem:[#allocation10 + $0x110] sm:$0xff] }
 0x2d6   : > { %2649 = vst [vmem:[#allocation3 + $0x28f] sm:$0xfe] %v6272_v55  ;;  %v3580_v59 = vld [vmem:[#allocation10 + $0x138] sm:$0xff]  ;;  %3810 = vmatpush.msrb.mxu2 %v3564_v34  ;;  %v3577_v55 = vld [vmem:[#allocation10 + $0x120] sm:$0xff] }
 0x2d7   : > { %v2424_v24 = vadd.f32 %v2423_v44, %v2311_v9  ;;  %2247 = vmatmul.f32.gmra.mxu2 %v871_v27  ;;  %v6285_v56 = vpop.f32.mrf.mxu0  ;;  %3923 = vmatpush.msrb.mxu3 %v3580_v59  ;;  %v3563_v9 = vld [vmem:[#allocation10 + $0xb0] sm:$0xff]  ;;  %v6297_v20 = vpop.f32.mrf.mxu3 }
 0x2d8   : > { %3811 = vmatpush.msrb.mxu2 %v3563_v9  ;;  %v3561_v9 = vld [vmem:[#allocation10 + $0xa0] sm:$0xff] }
 0x2d9   : > { %v6289_v18 = vmax.f32 %v2424_v24, 0.0  ;;  %3924 = vmatpush.msrb.mxu3 %v3579_v0  ;;  %v3560_v0 = vld [vmem:[#allocation10 + $0x98] sm:$0xff] }
 0x2da   : > { %v2200_v28 = vpop.f32.mrf.mxu2  ;;  %2476 = vmatmul.f32.gmra.mxu0 %v1002_v52  ;;  %v3562_v52 = vld [vmem:[#allocation10 + $0xa8] sm:$0xff] }
 0x2db   : > { %7435 = vst [vmem:[#allocation31_spill] sm:$0xff] %v6289_v18  ;;  %v2201_v44 = vadd.f32 %v2200_v28, %v2088_v2  ;;  %3812 = vmatpush.msrb.mxu2 %v3562_v52  ;;  %v6301_v2 = vpop.f32.mrf.mxu1  ;;  %v1003_v28 = vld [vmem:[#allocation2 + $0x340] sm:$0xff]  ;;  %3925 = vmatpush.msrb.mxu3 %v3578_v10  ;;  %v3559_v10 = vld [vmem:[#allocation10 + $0x90] sm:$0xff] }
 0x2dc   : > { %2584 = vst [vmem:[#allocation3 + $0x178] sm:$0xff] %v6289_v18  ;;  %v6293_v27 = vld [vmem:[#allocation3 + $0x50] sm:$0xff]  ;;  %2375 = vmatmul.f32.gmra.mxu3 %v6137_v45 }
 0x2dd   : > { %2617 = vst [vmem:[#allocation3 + $0x59] sm:$0x7f] %v6289_v18  ;;  %3735 = vmatmul.f32.gmra.mxu1 %v6293_v27  ;;  %v2314_v24 = vadd.f32 %v6237_v60, %v2201_v44  ;;  %3813 = vmatpush.msrb.mxu2 %v3561_v9  ;;  %v2091_v60 = vadd.f32 %v6085_v15, %v6033_v57  ;;  %v873_v57 = vld [vmem:[#allocation2 + $0x100] sm:$0xff]  ;;  %v3574_v9 = vld [vmem:[#allocation10 + $0x108] sm:$0xff] }
 0x2de   : > { %2650 = vst [vmem:[#allocation3 + $0x297] sm:$0xff] %v6289_v18  ;;  %v3593_v18 = vld [vmem:[#allocation10 + $0x1a0] sm:$0xff]  ;;  %3926 = vmatpush.msrb.mxu3 %v3577_v55  ;;  %v3591_v55 = vld [vmem:[#allocation10 + $0x190] sm:$0xff] }
 0x2df   : > { %7436 = vst [vmem:[#allocation32_spill] sm:$0xff] %v6301_v2  ;;  %v2427_v34 = vadd.f32 %v2426_v39, %v2314_v24  ;;  %2250 = vmatmul.f32.gmra.mxu2 %v872_v53  ;;  %v6303_v59 = vpop.f32.mrf.mxu0  ;;  %v3592_v39 = vld [vmem:[#allocation10 + $0x198] sm:$0xff]  ;;  %4039 = vmatpush.msrb.mxu0 %v3593_v18  ;;  %v6315_v15 = vpop.f32.mrf.mxu3  ;;  %v3558_v18 = vld [vmem:[#allocation10 + $0x88] sm:$0xff]  ;;  %v3557_v2 = vld [vmem:[#allocation10 + $0x80] sm:$0xff] }
 0x2e0   : > { %3814 = vmatpush.msrb.mxu2 %v3560_v0  ;;  %3927 = vmatpush.msrb.mxu3 %v3576_v21  ;;  %v1004_v21 = vld [vmem:[#allocation2 + $0x348] sm:$0xff] }
 0x2e1   : > { %v6307_v44 = vmax.f32 %v2427_v34, 0.0  ;;  %4040 = vmatpush.msrb.mxu0 %v3592_v39 }
 0x2e2   : > { %v2203_v52 = vpop.f32.mrf.mxu2  ;;  %2479 = vmatmul.f32.gmra.mxu0 %v1003_v28  ;;  %v3613_v28 = vld [vmem:[#allocation10 + $0x240] sm:$0xff]  ;;  %3815 = vmatpush.msrb.mxu2 %v3559_v10 }
 0x2e3   : > { %7437 = vst [vmem:[#allocation33_spill] sm:$0xff] %v6307_v44  ;;  %v2204_v53 = vadd.f32 %v2203_v52, %v2091_v60  ;;  %4148 = vmatpush.msrb.mxu1 %v3613_v28  ;;  %3928 = vmatpush.msrb.mxu3 %v3575_v62  ;;  %v3590_v60 = vld [vmem:[#allocation10 + $0x188] sm:$0xff]  ;;  %v6322_v39 = vpop.f32.mrf.mxu1 }
 0x2e4   : > { %2585 = vst [vmem:[#allocation3 + $0x180] sm:$0xff] %v6307_v44  ;;  %v6311_v24 = vld [vmem:[#allocation3 + $0x58] sm:$0xff]  ;;  %4041 = vmatpush.msrb.mxu0 %v3591_v55  ;;  %3816 = vmatpush.msrb.mxu2 %v3558_v18 }
 0x2e5   : > { %2618 = vst [vmem:[#allocation3 + $0x61] sm:$0xff] %v6307_v44  ;;  %3738 = vmatmul.f32.gmra.mxu1 %v6311_v24  ;;  %v2317_v34 = vadd.f32 %v6251_v16, %v2204_v53  ;;  %3929 = vmatpush.msrb.mxu3 %v3574_v9  ;;  %v2094_v16 = vadd.f32 %v6090_v37, %v6040_v41  ;;  %v874_v41 = vld [vmem:[#allocation2 + $0x108] sm:$0xff] }
 0x2e6   : > { %2651 = vst [vmem:[#allocation3 + $0x29f] sm:$0xfe] %v6307_v44  ;;  %v3573_v44 = vld [vmem:[#allocation10 + $0x100] sm:$0xff]  ;;  %4042 = vmatpush.msrb.mxu0 %v3590_v60  ;;  %3817 = vmatpush.msrb.mxu2 %v3557_v2 }
 0x2e7   : > { %v2430_v0 = vadd.f32 %v6285_v56, %v2317_v34  ;;  %2253 = vmatmul.f32.gmra.mxu2 %v873_v57  ;;  %v2435_v52 = vpop.f32.mrf.mxu0  ;;  %3930 = vmatpush.msrb.mxu3 %v3573_v44  ;;  %v6332_v37 = vpop.f32.mrf.mxu3  ;;  %v2803_v34 = vld [vmem:[#allocation3 + $0x248] sm:$0xff] }
 0x2e8   : > { %4043 = vmatpush.msrb.mxu0 %v3589_v4  ;;  %3931 = vmatmul.f32.vlgmr.msrb.gmra.mxu3 %v6137_v45  ;;  %v2097_v4 = vadd.f32 %v6097_v54, %v6050_v61 }
 0x2e9   : > { %v6324_v53 = vmax.f32 %v2430_v0, 0.0 }
 0x2ea   : > { %v2206_v10 = vpop.f32.mrf.mxu2  ;;  %2482 = vmatmul.f32.gmra.mxu0 %v1004_v21 }
 0x2eb   : > { %2586 = vst [vmem:[#allocation3 + $0x188] sm:$0xff] %v6324_v53  ;;  %v2207_v56 = vadd.f32 %v2206_v10, %v2094_v16  ;;  %v6342_v18 = vpop.f32.mrf.mxu1  ;;  %v1006_v16 = vld [vmem:[#allocation2 + $0x358] sm:$0xff]  ;;  %v2100_v10 = vadd.f32 %v6106_v13, %v6057_v38 }
 0x2ec   : > { %v6327_v62 = vld [vmem:[#allocation3 + $0x60] sm:$0xff]  ;;  %2619 = vst [vmem:[#allocation3 + $0x69] sm:$0x7f] %v6324_v53 }
 0x2ed   : > { %3741 = vmatmul.f32.gmra.mxu1 %v6327_v62  ;;  %2652 = vst [vmem:[#allocation3 + $0x2a7] sm:$0xff] %v6324_v53  ;;  %v2320_v2 = vadd.f32 %v6266_v1, %v2207_v56  ;;  %v875_v1 = vld [vmem:[#allocation2 + $0x110] sm:$0xff] }
 0x2ef   : > { %v2433_v57 = vadd.f32 %v6303_v59, %v2320_v2  ;;  %2256 = vmatmul.f32.gmra.mxu2 %v874_v41  ;;  %v2438_v55 = vpop.f32.mrf.mxu0  ;;  %v6349_v61 = vpop.f32.mrf.mxu3  ;;  %v3612_v59 = vld [vmem:[#allocation10 + $0x238] sm:$0xff] }
 0x2f0   : > { %3934 = vmatmul.f32.gmra.mxu3 %v2803_v34  ;;  %4149 = vmatpush.msrb.mxu1 %v3612_v59 }
 0x2f1   : > { %v6339_v44 = vmax.f32 %v2433_v57, 0.0 }
 0x2f2   : > { %v2209_v28 = vpop.f32.mrf.mxu2  ;;  %2485 = vmatmul.f32.gmra.mxu0 %v6137_v45 }
 0x2f3   : > { %2587 = vst [vmem:[#allocation3 + $0x190] sm:$0xff] %v6339_v44  ;;  %v2210_v9 = vadd.f32 %v2209_v28, %v2097_v4  ;;  %v6345_v60 = vld [vmem:[#allocation3 + $0x68] sm:$0xff]  ;;  %v2804_v4 = vld [vmem:[#allocation3 + $0x250] sm:$0xff]  ;;  %v2103_v28 = vadd.f32 %v6114_v51, %v6061_v19 }
 0x2f4   : > { %2620 = vst [vmem:[#allocation3 + $0x71] sm:$0xff] %v6339_v44 }
 0x2f5   : > { %3744 = vmatmul.f32.gmra.mxu1 %v6345_v60  ;;  %2653 = vst [vmem:[#allocation3 + $0x2af] sm:$0xfe] %v6339_v44  ;;  %v2323_v54 = vadd.f32 %v6279_v12, %v2210_v9 }
 0x2f7   : > { %v2436_v0 = vadd.f32 %v2435_v52, %v2323_v54  ;;  %2259 = vmatmul.f32.gmra.mxu2 %v875_v1  ;;  %v2441_v21 = vpop.f32.mrf.mxu0  ;;  %v6362_v12 = vpop.f32.mrf.mxu3 }
 0x2f8   : > { %3937 = vmatmul.f32.gmra.mxu3 %v2804_v4  ;;  %v6364_v52 = vpop.f32.mrf.mxu1 }
 0x2f9   : > { %v6355_v56 = vmax.f32 %v2436_v0, 0.0  ;;  %v2805_v0 = vld [vmem:[#allocation3 + $0x258] sm:$0xff] }
 0x2fa   : > { %v2212_v41 = vpop.f32.mrf.mxu2  ;;  %2488 = vmatmul.f32.gmra.mxu0 %v1006_v16 }
 0x2fb   : > { %2588 = vst [vmem:[#allocation3 + $0x198] sm:$0xff] %v6355_v56  ;;  %v2213_v2 = vadd.f32 %v2212_v41, %v2100_v10  ;;  %v6358_v57 = vld [vmem:[#allocation3 + $0x70] sm:$0xff]  ;;  %v2106_v10 = vadd.f32 %v6121_v14, %v6064_v22 }
 0x2fc   : > { %2621 = vst [vmem:[#allocation3 + $0x79] sm:$0x7f] %v6355_v56 }
 0x2fd   : > { %3747 = vmatmul.f32.gmra.mxu1 %v6358_v57  ;;  %2654 = vst [vmem:[#allocation3 + $0x2b7] sm:$0xff] %v6355_v56  ;;  %v2326_v38 = vadd.f32 %v6297_v20, %v2213_v2 }
 0x2ff   : > { %v2439_v13 = vadd.f32 %v2438_v55, %v2326_v38  ;;  %2262 = vmatmul.f32.gmra.mxu2 %v6137_v45  ;;  %v2444_v34 = vpop.f32.mrf.mxu0  ;;  %v6379_v20 = vpop.f32.mrf.mxu3  ;;  %v2806_v38 = vld [vmem:[#allocation3 + $0x260] sm:$0xff] }
 0x300   : > { %3940 = vmatmul.f32.gmra.mxu3 %v2805_v0  ;;  %v6383_v51 = vpop.f32.mrf.mxu1 }
 0x301   : > { %v6371_v9 = vmax.f32 %v2439_v13, 0.0 }
 0x302   : > { %v2215_v1 = vpop.f32.mrf.mxu2  ;;  %4044 = vmatmul.f32.vlgmr.msrb.gmra.mxu0 %v6179_v43  ;;  %v3611_v43 = vld [vmem:[#allocation10 + $0x230] sm:$0xff] }
 0x303   : > { %2589 = vst [vmem:[#allocation3 + $0x1a0] sm:$0xff] %v6371_v9  ;;  %v2216_v54 = vadd.f32 %v2215_v1, %v2103_v28  ;;  %v6375_v59 = vld [vmem:[#allocation3 + $0x78] sm:$0xff]  ;;  %4150 = vmatpush.msrb.mxu1 %v3611_v43  ;;  %v2109_v28 = vadd.f32 %v6131_v49, %v6069_v40  ;;  %v3610_v49 = vld [vmem:[#allocation10 + $0x228] sm:$0xff]  ;;  %v2112_v43 = vadd.f32 %v6142_v63, %v6072_v30 }
 0x304   : > { %2622 = vst [vmem:[#allocation3 + $0x81] sm:$0xff] %v6371_v9 }
 0x305   : > { %3750 = vmatmul.f32.gmra.mxu1 %v6375_v59  ;;  %2655 = vst [vmem:[#allocation3 + $0x2bf] sm:$0xfe] %v6371_v9  ;;  %v2329_v19 = vadd.f32 %v6315_v15, %v2216_v54 }
 0x306   : > { %4151 = vmatpush.msrb.mxu1 %v3610_v49 }
 0x307   : > { %v2442_v55 = vadd.f32 %v2441_v21, %v2329_v19  ;;  %3818 = vmatmul.f32.vlgmr.msrb.gmra.mxu2 %v6137_v45  ;;  %v2447_v16 = vpop.f32.mrf.mxu0  ;;  %v6396_v21 = vpop.f32.mrf.mxu3 }
 0x308   : > { %3943 = vmatmul.f32.gmra.mxu3 %v2806_v38  ;;  %v2808_v38 = vld [vmem:[#allocation3 + $0x270] sm:$0xff] }
 0x309   : > { %v6388_v41 = vmax.f32 %v2442_v55, 0.0 }
 0x30a   : > { %v2218_v2 = vpop.f32.mrf.mxu2  ;;  %4047 = vmatmul.f32.gmra.mxu0 %v6193_v33  ;;  %v6401_v33 = vpop.f32.mrf.mxu1 }
 0x30b   : > { %2590 = vst [vmem:[#allocation3 + $0x1a8] sm:$0xff] %v6388_v41  ;;  %v2219_v4 = vadd.f32 %v2218_v2, %v2106_v10  ;;  %v6392_v15 = vld [vmem:[#allocation3 + $0x80] sm:$0xff] }
 0x30c   : > { %2623 = vst [vmem:[#allocation3 + $0x89] sm:$0x7f] %v6388_v41 }
 0x30d   : > { %3753 = vmatmul.f32.gmra.mxu1 %v6392_v15  ;;  %2656 = vst [vmem:[#allocation3 + $0x2c7] sm:$0xff] %v6388_v41  ;;  %v2332_v22 = vadd.f32 %v6332_v37, %v2219_v4  ;;  %v2807_v37 = vld [vmem:[#allocation3 + $0x268] sm:$0xff] }
 0x30f   : > { %v2445_v14 = vadd.f32 %v2444_v34, %v2332_v22  ;;  %3821 = vmatmul.f32.gmra.mxu2 %v6137_v45  ;;  %v2450_v13 = vpop.f32.mrf.mxu0  ;;  %v6413_v45 = vpop.f32.mrf.mxu3 }
 0x310   : > { %3946 = vmatmul.f32.gmra.mxu3 %v2807_v37  ;;  %v2118_v37 = vadd.f32 %v6162_v11, %v6082_v32 }
 0x311   : > { %v6405_v1 = vmax.f32 %v2445_v14, 0.0 }
 0x312   : > { %v2221_v54 = vpop.f32.mrf.mxu2  ;;  %4050 = vmatmul.f32.gmra.mxu0 %v6205_v3 }
 0x313   : > { %2591 = vst [vmem:[#allocation3 + $0x1b0] sm:$0xff] %v6405_v1  ;;  %v2222_v0 = vadd.f32 %v2221_v54, %v2109_v28  ;;  %v6409_v19 = vld [vmem:[#allocation3 + $0x88] sm:$0xff] }
 0x314   : > { %2624 = vst [vmem:[#allocation3 + $0x91] sm:$0xff] %v6405_v1 }
 0x315   : > { %3756 = vmatmul.f32.gmra.mxu1 %v6409_v19  ;;  %2657 = vst [vmem:[#allocation3 + $0x2cf] sm:$0xfe] %v6405_v1  ;;  %v2335_v40 = vadd.f32 %v6349_v61, %v2222_v0 }
 0x317   : > { %v2448_v3 = vadd.f32 %v2447_v16, %v2335_v40  ;;  %3824 = vmatmul.f32.gmra.mxu2 %v6164_v29  ;;  %v2453_v34 = vpop.f32.mrf.mxu0  ;;  %v6430_v29 = vpop.f32.mrf.mxu3  ;;  %v2115_v16 = vadd.f32 %v6153_v17, %v6077_v58  ;;  %v3609_v17 = vld [vmem:[#allocation10 + $0x220] sm:$0xff] }
 0x318   : > { %3949 = vmatmul.f32.gmra.mxu3 %v2808_v38  ;;  %4152 = vmatpush.msrb.mxu1 %v3609_v17 }
 0x319   : > { %v6420_v55 = vmax.f32 %v2448_v3, 0.0  ;;  %v6422_v10 = vpop.f32.mrf.mxu1 }
 0x31a   : > { %v2224_v2 = vpop.f32.mrf.mxu2  ;;  %4053 = vmatmul.f32.gmra.mxu0 %v6219_v6 }
 0x31b   : > { %2592 = vst [vmem:[#allocation3 + $0x1b8] sm:$0xff] %v6420_v55  ;;  %v2225_v4 = vadd.f32 %v2224_v2, %v2112_v43  ;;  %v6426_v61 = vld [vmem:[#allocation3 + $0x90] sm:$0xff]  ;;  %v2810_v2 = vld [vmem:[#allocation3 + $0x280] sm:$0xff] }
 0x31c   : > { %2625 = vst [vmem:[#allocation3 + $0x99] sm:$0x7f] %v6420_v55 }
 0x31d   : > { %3759 = vmatmul.f32.gmra.mxu1 %v6426_v61  ;;  %2658 = vst [vmem:[#allocation3 + $0x2d7] sm:$0xff] %v6420_v55  ;;  %v2338_v30 = vadd.f32 %v6362_v12, %v2225_v4  ;;  %v2809_v12 = vld [vmem:[#allocation3 + $0x278] sm:$0xff] }
 0x31f   : > { %v2451_v63 = vadd.f32 %v2450_v13, %v2338_v30  ;;  %3827 = vmatmul.f32.gmra.mxu2 %v6175_v5  ;;  %v2456_v6 = vpop.f32.mrf.mxu0  ;;  %v6447_v5 = vpop.f32.mrf.mxu3 }
 0x320   : > { %3952 = vmatmul.f32.gmra.mxu3 %v2809_v12 }
 0x321   : > { %v6437_v22 = vmax.f32 %v2451_v63, 0.0  ;;  %v6439_v14 = vpop.f32.mrf.mxu1 }
 0x322   : > { %v2227_v28 = vpop.f32.mrf.mxu2  ;;  %4056 = vmatmul.f32.gmra.mxu0 %v6233_v23 }
 0x323   : > { %2593 = vst [vmem:[#allocation3 + $0x1c0] sm:$0xff] %v6437_v22  ;;  %v2228_v54 = vadd.f32 %v2227_v28, %v2115_v16  ;;  %v6443_v0 = vld [vmem:[#allocation3 + $0x98] sm:$0xff]  ;;  %v2124_v28 = vadd.f32 %v6189_v46, %v6092_v25 }
 0x324   : > { %2626 = vst [vmem:[#allocation3 + $0xa1] sm:$0xff] %v6437_v22 }
 0x325   : > { %3762 = vmatmul.f32.gmra.mxu1 %v6443_v0  ;;  %2659 = vst [vmem:[#allocation3 + $0x2df] sm:$0xfe] %v6437_v22  ;;  %v2341_v58 = vadd.f32 %v6379_v20, %v2228_v54 }
 0x327   : > { %v2454_v23 = vadd.f32 %v2453_v34, %v2341_v58  ;;  %3830 = vmatmul.f32.gmra.mxu2 %v6187_v8  ;;  %v2459_v13 = vpop.f32.mrf.mxu0  ;;  %v6464_v8 = vpop.f32.mrf.mxu3  ;;  %v2121_v34 = vadd.f32 %v6173_v42, %v6087_v47  ;;  %v3608_v42 = vld [vmem:[#allocation10 + $0x218] sm:$0xff] }
 0x328   : > { %3955 = vmatmul.f32.gmra.mxu3 %v2810_v2  ;;  %4153 = vmatpush.msrb.mxu1 %v3608_v42 }
 0x329   : > { %v6454_v40 = vmax.f32 %v2454_v23, 0.0  ;;  %v6456_v49 = vpop.f32.mrf.mxu1  ;;  %v2812_v23 = vld [vmem:[#allocation3 + $0x290] sm:$0xff] }
 0x32a   : > { %v2230_v3 = vpop.f32.mrf.mxu2  ;;  %4059 = vmatmul.f32.gmra.mxu0 %v6247_v36 }
 0x32b   : > { %2594 = vst [vmem:[#allocation3 + $0x1c8] sm:$0xff] %v6454_v40  ;;  %v2231_v43 = vadd.f32 %v2230_v3, %v2118_v37  ;;  %v6460_v20 = vld [vmem:[#allocation3 + $0xa0] sm:$0xff] }
 0x32c   : > { %2627 = vst [vmem:[#allocation3 + $0xa9] sm:$0x7f] %v6454_v40 }
 0x32d   : > { %3765 = vmatmul.f32.gmra.mxu1 %v6460_v20  ;;  %2660 = vst [vmem:[#allocation3 + $0x2e7] sm:$0xff] %v6454_v40  ;;  %v2344_v32 = vadd.f32 %v6396_v21, %v2231_v43  ;;  %v2811_v21 = vld [vmem:[#allocation3 + $0x288] sm:$0xff] }
 0x32f   : > { %v2457_v11 = vadd.f32 %v2456_v6, %v2344_v32  ;;  %3833 = vmatmul.f32.gmra.mxu2 %v6201_v48  ;;  %v2462_v36 = vpop.f32.mrf.mxu0  ;;  %v6481_v48 = vpop.f32.mrf.mxu3 }
 0x330   : > { %3958 = vmatmul.f32.gmra.mxu3 %v2811_v21  ;;  %v7441_v21 = vld [vmem:[#allocation24_spill] sm:$0xff] }
 0x331   : > { %v6471_v4 = vmax.f32 %v2457_v11, 0.0  ;;  %v6473_v38 = vpop.f32.mrf.mxu1 }
 0x332   : > { %v2233_v30 = vpop.f32.mrf.mxu2  ;;  %4062 = vmatmul.f32.gmra.mxu0 %v6262_v7 }
 0x333   : > { %2595 = vst [vmem:[#allocation3 + $0x1d0] sm:$0xff] %v6471_v4  ;;  %v2234_v63 = vadd.f32 %v2233_v30, %v2121_v34  ;;  %v6477_v16 = vld [vmem:[#allocation3 + $0xa8] sm:$0xff]  ;;  %v7439_v34 = vld [vmem:[#allocation26_spill] sm:$0xff] }
 0x334   : > { %2628 = vst [vmem:[#allocation3 + $0xb1] sm:$0xff] %v6471_v4 }
 0x335   : > { %3768 = vmatmul.f32.gmra.mxu1 %v6477_v16  ;;  %2661 = vst [vmem:[#allocation3 + $0x2ef] sm:$0xfe] %v6471_v4  ;;  %v2347_v47 = vadd.f32 %v6413_v45, %v2234_v63  ;;  %v7440_v63 = vld [vmem:[#allocation15_spill] sm:$0xff] }
 0x337   : > { %v2460_v7 = vadd.f32 %v2459_v13, %v2347_v47  ;;  %3836 = vmatmul.f32.gmra.mxu2 %v6215_v35  ;;  %v2465_v6 = vpop.f32.mrf.mxu0  ;;  %v6498_v35 = vpop.f32.mrf.mxu3  ;;  %v7438_v13 = vld [vmem:[#allocation23_spill] sm:$0xff]  ;;  %v2130_v47 = vadd.f32 %v7441_v21, %v7440_v63  ;;  %v3606_v63 = vld [vmem:[#allocation10 + $0x208] sm:$0xff]  ;;  %v7445_v21 = vld [vmem:[#allocation29_spill] sm:$0xff] }
 0x338   : > { %3961 = vmatmul.f32.gmra.mxu3 %v2812_v23  ;;  %v2127_v37 = vadd.f32 %v7438_v13, %v6095_v31  ;;  %v7443_v13 = vld [vmem:[#allocation16_spill] sm:$0xff] }
 0x339   : > { %v6488_v54 = vmax.f32 %v2460_v7, 0.0  ;;  %v6490_v12 = vpop.f32.mrf.mxu1 }
 0x33a   : > { %v2236_v58 = vpop.f32.mrf.mxu2  ;;  %4065 = vmatmul.f32.gmra.mxu0 %v6275_v50 }
 0x33b   : > { %2596 = vst [vmem:[#allocation3 + $0x1d8] sm:$0xff] %v6488_v54  ;;  %v2237_v17 = vadd.f32 %v2236_v58, %v2124_v28  ;;  %v6494_v45 = vld [vmem:[#allocation3 + $0xb0] sm:$0xff] }
 0x33c   : > { %2629 = vst [vmem:[#allocation3 + $0xb9] sm:$0x7f] %v6488_v54 }
 0x33d   : > { %3771 = vmatmul.f32.gmra.mxu1 %v6494_v45  ;;  %2662 = vst [vmem:[#allocation3 + $0x2f7] sm:$0xff] %v6488_v54  ;;  %v2350_v25 = vadd.f32 %v6430_v29, %v2237_v17  ;;  %v2813_v29 = vld [vmem:[#allocation3 + $0x298] sm:$0xff]  ;;  %v2814_v17 = vld [vmem:[#allocation3 + $0x2a0] sm:$0xff] }
 0x33f   : > { %v2463_v46 = vadd.f32 %v2462_v36, %v2350_v25  ;;  %3839 = vmatmul.f32.gmra.mxu2 %v6229_v26  ;;  %v2468_v50 = vpop.f32.mrf.mxu0  ;;  %v6515_v26 = vpop.f32.mrf.mxu3  ;;  %v3607_v36 = vld [vmem:[#allocation10 + $0x210] sm:$0xff] }
 0x340   : > { %3964 = vmatmul.f32.gmra.mxu3 %v2813_v29  ;;  %4154 = vmatpush.msrb.mxu1 %v3607_v36 }
 0x341   : > { %v6505_v3 = vmax.f32 %v2463_v46, 0.0  ;;  %v6507_v43 = vpop.f32.mrf.mxu1  ;;  %v7442_v46 = vld [vmem:[#allocation27_spill] sm:$0xff] }
 0x342   : > { %v2239_v2 = vpop.f32.mrf.mxu2  ;;  %4068 = vmatmul.f32.gmra.mxu0 %v6293_v27  ;;  %4155 = vmatpush.msrb.mxu1 %v3606_v63 }
 0x343   : > { %2597 = vst [vmem:[#allocation3 + $0x1e0] sm:$0xff] %v6505_v3  ;;  %v2240_v32 = vadd.f32 %v2239_v2, %v2127_v37  ;;  %v6511_v11 = vld [vmem:[#allocation3 + $0xb8] sm:$0xff]  ;;  %v7444_v37 = vld [vmem:[#allocation25_spill] sm:$0xff] }
 0x344   : > { %2630 = vst [vmem:[#allocation3 + $0xc1] sm:$0xff] %v6505_v3  ;;  %v2133_v2 = vadd.f32 %v7444_v37, %v7443_v13  ;;  %v2816_v37 = vld [vmem:[#allocation3 + $0x2b0] sm:$0xff] }
 0x345   : > { %3774 = vmatmul.f32.gmra.mxu1 %v6511_v11  ;;  %2663 = vst [vmem:[#allocation3 + $0x2ff] sm:$0xfe] %v6505_v3  ;;  %v2353_v31 = vadd.f32 %v6447_v5, %v2240_v32 }
 0x347   : > { %v2466_v27 = vadd.f32 %v2465_v6, %v2353_v31  ;;  %3842 = vmatmul.f32.gmra.mxu2 %v7439_v34  ;;  %v2471_v30 = vpop.f32.mrf.mxu0  ;;  %v6532_v6 = vpop.f32.mrf.mxu3 }
 0x348   : > { %3967 = vmatmul.f32.gmra.mxu3 %v2814_v17 }
 0x349   : > { %v6522_v42 = vmax.f32 %v2466_v27, 0.0 }
 0x34a   : > { %v6524_v7 = vpop.f32.mrf.mxu1  ;;  %v2242_v28 = vpop.f32.mrf.mxu2  ;;  %4071 = vmatmul.f32.gmra.mxu0 %v6311_v24 }
 0x34b   : > { %2598 = vst [vmem:[#allocation3 + $0x1e8] sm:$0xff] %v6522_v42  ;;  %v2243_v58 = vadd.f32 %v2242_v28, %v2130_v47  ;;  %v6528_v5 = vld [vmem:[#allocation3 + $0xc0] sm:$0xff]  ;;  %v7446_v28 = vld [vmem:[#allocation17_spill] sm:$0xff] }
 0x34c   : > { %2631 = vst [vmem:[#allocation3 + $0xc9] sm:$0x7f] %v6522_v42 }
 0x34d   : > { %3777 = vmatmul.f32.gmra.mxu1 %v6528_v5  ;;  %2664 = vst [vmem:[#allocation3 + $0x307] sm:$0xff] %v6522_v42  ;;  %v2356_v23 = vadd.f32 %v6464_v8, %v2243_v58  ;;  %v2815_v8 = vld [vmem:[#allocation3 + $0x2a8] sm:$0xff] }
 0x34e   : > { %v7447_v58 = vld [vmem:[#allocation28_spill] sm:$0xff] }
 0x34f   : > { %v2469_v25 = vadd.f32 %v2468_v50, %v2356_v23  ;;  %3845 = vmatmul.f32.gmra.mxu2 %v7442_v46  ;;  %v2474_v24 = vpop.f32.mrf.mxu0  ;;  %v6549_v50 = vpop.f32.mrf.mxu3  ;;  %v2136_v17 = vadd.f32 %v7447_v58, %v7446_v28 }
 0x350   : > { %3970 = vmatmul.f32.gmra.mxu3 %v2815_v8  ;;  %v7449_v8 = vld [vmem:[#allocation18_spill] sm:$0xff] }
 0x351   : > { %v6539_v32 = vmax.f32 %v2469_v25, 0.0 }
 0x352   : > { %v6541_v29 = vpop.f32.mrf.mxu1  ;;  %v2245_v31 = vpop.f32.mrf.mxu2  ;;  %4074 = vmatmul.f32.gmra.mxu0 %v6327_v62 }
 0x353   : > { %2599 = vst [vmem:[#allocation3 + $0x1f0] sm:$0xff] %v6539_v32  ;;  %v2246_v36 = vadd.f32 %v2245_v31, %v2133_v2  ;;  %v6545_v27 = vld [vmem:[#allocation3 + $0xc8] sm:$0xff] }
 0x354   : > { %2632 = vst [vmem:[#allocation3 + $0xd1] sm:$0xff] %v6539_v32 }
 0x355   : > { %3780 = vmatmul.f32.gmra.mxu1 %v6545_v27  ;;  %2665 = vst [vmem:[#allocation3 + $0x30f] sm:$0xfe] %v6539_v32  ;;  %v2359_v34 = vadd.f32 %v6481_v48, %v2246_v36  ;;  %v7448_v36 = vld [vmem:[#allocation31_spill] sm:$0xff] }
 0x357   : > { %v2472_v62 = vadd.f32 %v2471_v30, %v2359_v34  ;;  %3848 = vmatmul.f32.gmra.mxu2 %v7445_v21  ;;  %v2477_v47 = vpop.f32.mrf.mxu0  ;;  %v6566_v30 = vpop.f32.mrf.mxu3  ;;  %v7450_v34 = vld [vmem:[#allocation30_spill] sm:$0xff] }
 0x358   : > { %3973 = vmatmul.f32.gmra.mxu3 %v2816_v37  ;;  %v2139_v63 = vadd.f32 %v7450_v34, %v7449_v8  ;;  %v3652_v37 = vld [vmem:[#allocation10 + $0x378] sm:$0xff]  ;;  %v7452_v8 = vld [vmem:[#allocation19_spill] sm:$0xff]  ;;  %v7453_v34 = vld [vmem:[#allocation32_spill] sm:$0xff] }
 0x359   : > { %v6556_v23 = vmax.f32 %v2472_v62, 0.0  ;;  %4367 = vmatpush.msra.mxu3 %v3652_v37  ;;  %v3684_v37 = vld [vmem:[#allocation10 + $0x478] sm:$0xff] }
 0x35a   : > { %v6558_v25 = vpop.f32.mrf.mxu1  ;;  %v2248_v46 = vpop.f32.mrf.mxu2  ;;  %4077 = vmatmul.f32.gmra.mxu0 %v6345_v60 }
 0x35b   : > { %2600 = vst [vmem:[#allocation3 + $0x1f8] sm:$0xff] %v6556_v23  ;;  %v2249_v13 = vadd.f32 %v2248_v46, %v2136_v17  ;;  %v6562_v48 = vld [vmem:[#allocation3 + $0xd0] sm:$0xff]  ;;  %v3605_v46 = vld [vmem:[#allocation10 + $0x200] sm:$0xff] }
 0x35c   : > { %2633 = vst [vmem:[#allocation3 + $0xd9] sm:$0x7f] %v6556_v23  ;;  %4156 = vmatpush.msrb.mxu1 %v3605_v46 }
 0x35d   : > { %3783 = vmatmul.f32.gmra.mxu1 %v6562_v48  ;;  %2666 = vst [vmem:[#allocation3 + $0x317] sm:$0xff] %v6556_v23  ;;  %v2362_v2 = vadd.f32 %v6498_v35, %v2249_v13  ;;  %v2817_v35 = vld [vmem:[#allocation3 + $0x2b8] sm:$0xff] }
 0x35e   : > { %v3636_v13 = vld [vmem:[#allocation10 + $0x2f8] sm:$0xff]  ;;  %4593 = vmatpush.msra.mxu1 %v3684_v37 }
 0x35f   : > { %v2475_v31 = vadd.f32 %v2474_v24, %v2362_v2  ;;  %3851 = vmatmul.f32.gmra.mxu2 %v7448_v36  ;;  %v2480_v60 = vpop.f32.mrf.mxu0  ;;  %v6585_v2 = vpop.f32.mrf.mxu3 }
 0x360   : > { %3976 = vmatmul.f32.gmra.mxu3 %v2817_v35  ;;  %4254 = vmatpush.msra.mxu2 %v3636_v13  ;;  %v3668_v13 = vld [vmem:[#allocation10 + $0x3f8] sm:$0xff] }
 0x361   : > { %v6573_v62 = vmax.f32 %v2475_v31, 0.0  ;;  %v7451_v31 = vld [vmem:[#allocation33_spill] sm:$0xff]  ;;  %4480 = vmatpush.msra.mxu0 %v3668_v13 }
 0x362   : > { %v6575_v21 = vpop.f32.mrf.mxu1  ;;  %v2251_v28 = vpop.f32.mrf.mxu2  ;;  %4080 = vmatmul.f32.gmra.mxu0 %v6358_v57 }
 0x363   : > { %2601 = vst [vmem:[#allocation3 + $0x200] sm:$0xff] %v6573_v62  ;;  %v2252_v58 = vadd.f32 %v2251_v28, %v2139_v63  ;;  %v6579_v17 = vld [vmem:[#allocation3 + $0xd8] sm:$0xff]  ;;  %v2142_v63 = vadd.f32 %v7453_v34, %v7452_v8  ;;  %v3635_v8 = vld [vmem:[#allocation10 + $0x2f0] sm:$0xff]  ;;  %v7454_v34 = vld [vmem:[#allocation20_spill] sm:$0xff] }
 0x364   : > { %2634 = vst [vmem:[#allocation3 + $0xe1] sm:$0xff] %v6573_v62  ;;  %4255 = vmatpush.msra.mxu2 %v3635_v8 }
 0x365   : > { %3786 = vmatmul.f32.gmra.mxu1 %v6579_v17  ;;  %2667 = vst [vmem:[#allocation3 + $0x31f] sm:$0xfe] %v6573_v62  ;;  %v2365_v24 = vadd.f32 %v6515_v26, %v2252_v58 }
 0x367   : > { %v2478_v57 = vadd.f32 %v2477_v47, %v2365_v24  ;;  %3854 = vmatmul.f32.gmra.mxu2 %v7451_v31  ;;  %v2483_v36 = vpop.f32.mrf.mxu0  ;;  %v2818_v47 = vld [vmem:[#allocation3 + $0x2c0] sm:$0xff] }
 0x368   : > { %3979 = vmatmul.f32.gmra.mxu3 %v2818_v47 }
 0x369   : > { %v6590_v28 = vmax.f32 %v2478_v57, 0.0 }
 0x36a   : > { %v6592_v35 = vpop.f32.mrf.mxu1  ;;  %v2254_v26 = vpop.f32.mrf.mxu2  ;;  %4083 = vmatmul.f32.gmra.mxu0 %v6375_v59 }
 0x36b   : > { %2602 = vst [vmem:[#allocation3 + $0x208] sm:$0xff] %v6590_v28  ;;  %v2255_v58 = vadd.f32 %v2254_v26, %v2142_v63  ;;  %v6596_v46 = vld [vmem:[#allocation3 + $0xe0] sm:$0xff]  ;;  %v6603_v31 = vpop.f32.mrf.mxu3  ;;  %v2145_v63 = vadd.f32 %v6322_v39, %v7454_v34 }
 0x36c   : > { %2635 = vst [vmem:[#allocation3 + $0xe9] sm:$0x7f] %v6590_v28 }
 0x36d   : > { %3789 = vmatmul.f32.gmra.mxu1 %v6596_v46  ;;  %2668 = vst [vmem:[#allocation3 + $0x327] sm:$0xff] %v6590_v28  ;;  %v2368_v24 = vadd.f32 %v6532_v6, %v2255_v58  ;;  %v3651_v58 = vld [vmem:[#allocation10 + $0x370] sm:$0xff] }
 0x36e   : > { %4368 = vmatpush.msra.mxu3 %v3651_v58  ;;  %v3667_v58 = vld [vmem:[#allocation10 + $0x3f0] sm:$0xff] }
 0x36f   : > { %v2481_v59 = vadd.f32 %v2480_v60, %v2368_v24  ;;  %3857 = vmatmul.f32.gmra.mxu2 %v6324_v53  ;;  %v2486_v57 = vpop.f32.mrf.mxu0  ;;  %v2819_v24 = vld [vmem:[#allocation3 + $0x2c8] sm:$0xff]  ;;  %4481 = vmatpush.msra.mxu0 %v3667_v58 }
 0x370   : > { %3982 = vmatmul.f32.gmra.mxu3 %v2819_v24 }
 0x371   : > { %v6607_v26 = vmax.f32 %v2481_v59, 0.0  ;;  %v7455_v59 = vld [vmem:[#allocation21_spill] sm:$0xff] }
 0x372   : > { %v6609_v47 = vpop.f32.mrf.mxu1  ;;  %v2257_v6 = vpop.f32.mrf.mxu2  ;;  %4086 = vmatmul.f32.gmra.mxu0 %v6392_v15  ;;  %v2148_v8 = vadd.f32 %v6342_v18, %v7455_v59  ;;  %v7456_v59 = vld [vmem:[#allocation22_spill] sm:$0xff] }
 0x373   : > { %2603 = vst [vmem:[#allocation3 + $0x210] sm:$0xff] %v6607_v26  ;;  %v2258_v60 = vadd.f32 %v2257_v6, %v2145_v63  ;;  %v6613_v53 = vld [vmem:[#allocation3 + $0xe8] sm:$0xff]  ;;  %v6620_v37 = vpop.f32.mrf.mxu3 }
 0x374   : > { %2636 = vst [vmem:[#allocation3 + $0xf1] sm:$0xff] %v6607_v26 }
 0x375   : > { %3792 = vmatmul.f32.gmra.mxu1 %v6613_v53  ;;  %2669 = vst [vmem:[#allocation3 + $0x32f] sm:$0xfe] %v6607_v26  ;;  %v2371_v39 = vadd.f32 %v6549_v50, %v2258_v60  ;;  %v3683_v60 = vld [vmem:[#allocation10 + $0x470] sm:$0xff] }
 0x376   : > { %4594 = vmatpush.msra.mxu1 %v3683_v60 }
 0x377   : > { %v2484_v13 = vadd.f32 %v2483_v36, %v2371_v39  ;;  %3860 = vmatmul.f32.gmra.mxu2 %v6339_v44  ;;  %v2489_v15 = vpop.f32.mrf.mxu0  ;;  %v2820_v44 = vld [vmem:[#allocation3 + $0x2d0] sm:$0xff] }
 0x378   : > { %3985 = vmatmul.f32.gmra.mxu3 %v2820_v44 }
 0x379   : > { %v6624_v34 = vmax.f32 %v2484_v13, 0.0  ;;  %v3634_v13 = vld [vmem:[#allocation10 + $0x2e8] sm:$0xff] }
 0x37a   : > { %v6626_v63 = vpop.f32.mrf.mxu1  ;;  %v2260_v6 = vpop.f32.mrf.mxu2  ;;  %4089 = vmatmul.f32.gmra.mxu0 %v6409_v19  ;;  %4256 = vmatpush.msra.mxu2 %v3634_v13 }
 0x37b   : > { %2604 = vst [vmem:[#allocation3 + $0x218] sm:$0xff] %v6624_v34  ;;  %v2261_v50 = vadd.f32 %v2260_v6, %v2148_v8  ;;  %v6630_v36 = vld [vmem:[#allocation3 + $0xf0] sm:$0xff]  ;;  %v6637_v39 = vpop.f32.mrf.mxu3  ;;  %v2151_v8 = vadd.f32 %v6364_v52, %v7456_v59  ;;  %v6650_v52 = vld [vmem:[%s7385_s4] ss:$0 sm:$0xff] }
 0x37c   : > { %2637 = vst [vmem:[#allocation3 + $0xf9] sm:$0x7f] %v6624_v34  ;;  %v3707_v13 = vadd.f32 %v6650_v52, %v6383_v51 }
 0x37d   : > { %3795 = vmatmul.f32.gmra.mxu1 %v6630_v36  ;;  %2670 = vst [vmem:[#allocation3 + $0x337] sm:$0xff] %v6624_v34  ;;  %v2374_v18 = vadd.f32 %v6566_v30, %v2261_v50  ;;  %v3650_v30 = vld [vmem:[#allocation10 + $0x368] sm:$0xff] }
 0x37e   : > { %4369 = vmatpush.msra.mxu3 %v3650_v30  ;;  %v3666_v30 = vld [vmem:[#allocation10 + $0x3e8] sm:$0xff] }
 0x37f   : > { %v2487_v19 = vadd.f32 %v2486_v57, %v2374_v18  ;;  %3863 = vmatmul.f32.gmra.mxu2 %v6355_v56  ;;  %v4045_v24 = vpop.f32.mrf.mxu0  ;;  %v2821_v56 = vld [vmem:[#allocation3 + $0x2d8] sm:$0xff]  ;;  %4482 = vmatpush.msra.mxu0 %v3666_v30 }
 0x380   : > { %3988 = vmatmul.f32.gmra.mxu3 %v2821_v56  ;;  %v2930_v56 = vld [vmem:[#allocation3 + $0x130] sm:$0xff]  ;;  %v2931_v30 = vld [vmem:[#allocation3 + $0x138] sm:$0xff] }
 0x381   : > { %v2522_v6 = vmax.f32 %v2487_v19, 0.0 }
 0x382   : > { %v6641_v58 = vpop.f32.mrf.mxu1  ;;  %v2263_v44 = vpop.f32.mrf.mxu2  ;;  %4092 = vmatmul.f32.gmra.mxu0 %v6426_v61 }
 0x383   : > { %2605 = vst [vmem:[#allocation3 + $0x220] sm:$0xff] %v2522_v6  ;;  %v2264_v50 = vadd.f32 %v2263_v44, %v2151_v8  ;;  %v6644_v57 = vld [vmem:[#allocation3 + $0xf8] sm:$0xff]  ;;  %v6654_v19 = vpop.f32.mrf.mxu3 }
 0x384   : > { %2638 = vst [vmem:[#allocation3 + $0x101] sm:$0xff] %v2522_v6 }
 0x385   : > { %3798 = vmatmul.f32.gmra.mxu1 %v6644_v57  ;;  %2671 = vst [vmem:[#allocation3 + $0x33f] sm:$0xfe] %v2522_v6  ;;  %v2377_v18 = vadd.f32 %v6585_v2, %v2264_v50  ;;  %v2822_v2 = vld [vmem:[#allocation3 + $0x2e0] sm:$0xff] }
 0x387   : > { %v2490_v61 = vadd.f32 %v2489_v15, %v2377_v18  ;;  %3866 = vmatmul.f32.gmra.mxu2 %v6371_v9  ;;  %v4048_v60 = vpop.f32.mrf.mxu0  ;;  %v3682_v15 = vld [vmem:[#allocation10 + $0x468] sm:$0xff] }
 0x388   : > { %3991 = vmatmul.f32.gmra.mxu3 %v2822_v2  ;;  %4595 = vmatpush.msra.mxu1 %v3682_v15  ;;  %v3713_v2 = vadd.f32 %v6650_v52, %v6422_v10  ;;  %v3665_v15 = vld [vmem:[#allocation10 + $0x3e0] sm:$0xff] }
 0x389   : > { %v2523_v59 = vmax.f32 %v2490_v61, 0.0  ;;  %v3710_v61 = vadd.f32 %v6650_v52, %v6401_v33  ;;  %4483 = vmatpush.msra.mxu0 %v3665_v15 }
 0x38a   : > { %v6658_v8 = vpop.f32.mrf.mxu1  ;;  %v3819_v44 = vpop.f32.mrf.mxu2  ;;  %4095 = vmatmul.f32.gmra.mxu0 %v6443_v0  ;;  %v3633_v0 = vld [vmem:[#allocation10 + $0x2e0] sm:$0xff] }
 0x38b   : > { %2606 = vst [vmem:[#allocation3 + $0x228] sm:$0xff] %v2523_v59  ;;  %v3820_v6 = vadd.f32 %v3819_v44, %v3707_v13  ;;  %v6663_v50 = vpop.f32.mrf.mxu3  ;;  %4257 = vmatpush.msra.mxu2 %v3633_v0 }
 0x38c   : > { %2639 = vst [vmem:[#allocation3 + $0x109] sm:$0x7f] %v2523_v59 }
 0x38d   : > { %4157 = vmatmul.f32.vlgmr.msrb.gmra.mxu1 %v2930_v56  ;;  %2672 = vst [vmem:[#allocation3 + $0x347] sm:$0xff] %v2523_v59  ;;  %v3933_v9 = vadd.f32 %v6603_v31, %v3820_v6  ;;  %v3649_v31 = vld [vmem:[#allocation10 + $0x360] sm:$0xff]  ;;  %v2823_v6 = vld [vmem:[#allocation3 + $0x2e8] sm:$0xff] }
 0x38e   : > { %4370 = vmatpush.msra.mxu3 %v3649_v31  ;;  %v3632_v31 = vld [vmem:[#allocation10 + $0x2d8] sm:$0xff] }
 0x38f   : > { %3869 = vmatmul.f32.gmra.mxu2 %v6388_v41  ;;  %v4051_v51 = vpop.f32.mrf.mxu0  ;;  %v6665_v18 = vadd.f32 %v4045_v24, %v3933_v9 }
 0x390   : > { %3994 = vmatmul.f32.gmra.mxu3 %v2823_v6  ;;  %4258 = vmatpush.msra.mxu2 %v3632_v31  ;;  %v6711_v31 = vld [vmem:[#allocation3 + $0x150] sm:$0xff] }
 0x392   : > { %v6669_v13 = vpop.f32.mrf.mxu1  ;;  %v3822_v44 = vpop.f32.mrf.mxu2  ;;  %4098 = vmatmul.f32.gmra.mxu0 %v6460_v20 }
 0x393   : > { %v3823_v59 = vadd.f32 %v3822_v44, %v3710_v61  ;;  %v6674_v56 = vpop.f32.mrf.mxu3  ;;  %v6683_v61 = vld [vmem:[#allocation3 + $0x140] sm:$0xff] }
 0x395   : > { %4160 = vmatmul.f32.gmra.mxu1 %v2931_v30  ;;  %v3936_v41 = vadd.f32 %v6620_v37, %v3823_v59  ;;  %v2824_v37 = vld [vmem:[#allocation3 + $0x2f0] sm:$0xff]  ;;  %v3716_v59 = vadd.f32 %v6650_v52, %v6439_v14 }
 0x397   : > { %3872 = vmatmul.f32.gmra.mxu2 %v6405_v1  ;;  %v4054_v24 = vpop.f32.mrf.mxu0  ;;  %v6676_v33 = vadd.f32 %v4048_v60, %v3936_v41  ;;  %v3681_v60 = vld [vmem:[#allocation10 + $0x460] sm:$0xff] }
 0x398   : > { %3997 = vmatmul.f32.gmra.mxu3 %v2824_v37  ;;  %4596 = vmatpush.msra.mxu1 %v3681_v60 }
 0x39a   : > { %v6680_v20 = vpop.f32.mrf.mxu1  ;;  %v3825_v9 = vpop.f32.mrf.mxu2  ;;  %4101 = vmatmul.f32.gmra.mxu0 %v6477_v16 }
 0x39b   : > { %v3826_v0 = vadd.f32 %v3825_v9, %v3713_v2  ;;  %v6688_v44 = vpop.f32.mrf.mxu3  ;;  %v6697_v2 = vld [vmem:[#allocation3 + $0x148] sm:$0xff] }
 0x39d   : > { %4163 = vmatmul.f32.gmra.mxu1 %v6683_v61  ;;  %v3939_v1 = vadd.f32 %v6637_v39, %v3826_v0  ;;  %v3648_v39 = vld [vmem:[#allocation10 + $0x358] sm:$0xff] }
 0x39e   : > { %4371 = vmatpush.msra.mxu3 %v3648_v39  ;;  %v3722_v39 = vadd.f32 %v6650_v52, %v6473_v38 }
 0x39f   : > { %3875 = vmatmul.f32.gmra.mxu2 %v6420_v55  ;;  %v4057_v10 = vpop.f32.mrf.mxu0  ;;  %v6690_v16 = vadd.f32 %v4051_v51, %v3939_v1  ;;  %v2825_v55 = vld [vmem:[#allocation3 + $0x2f8] sm:$0xff] }
 0x3a0   : > { %4000 = vmatmul.f32.gmra.mxu3 %v2825_v55  ;;  %v3664_v1 = vld [vmem:[#allocation10 + $0x3d8] sm:$0xff] }
 0x3a1   : > { %4484 = vmatpush.msra.mxu0 %v3664_v1 }
 0x3a2   : > { %v6694_v30 = vpop.f32.mrf.mxu1  ;;  %v3828_v6 = vpop.f32.mrf.mxu2  ;;  %4104 = vmatmul.f32.gmra.mxu0 %v6494_v45  ;;  %v3719_v45 = vadd.f32 %v6650_v52, %v6456_v49 }
 0x3a3   : > { %v3829_v41 = vadd.f32 %v3828_v6, %v3716_v59  ;;  %v6702_v14 = vpop.f32.mrf.mxu3  ;;  %v3631_v6 = vld [vmem:[#allocation10 + $0x2d0] sm:$0xff] }
 0x3a4   : > { %4259 = vmatpush.msra.mxu2 %v3631_v6  ;;  %v6739_v6 = vld [vmem:[#allocation3 + $0x160] sm:$0xff] }
 0x3a5   : > { %4166 = vmatmul.f32.gmra.mxu1 %v6697_v2  ;;  %v3942_v51 = vadd.f32 %v6654_v19, %v3829_v41  ;;  %v2826_v19 = vld [vmem:[#allocation3 + $0x300] sm:$0xff] }
 0x3a7   : > { %3878 = vmatmul.f32.gmra.mxu2 %v6437_v22  ;;  %v4060_v9 = vpop.f32.mrf.mxu0  ;;  %v6704_v15 = vadd.f32 %v4054_v24, %v3942_v51  ;;  %v3680_v24 = vld [vmem:[#allocation10 + $0x458] sm:$0xff] }
 0x3a8   : > { %4003 = vmatmul.f32.gmra.mxu3 %v2826_v19  ;;  %4597 = vmatpush.msra.mxu1 %v3680_v24 }
 0x3aa   : > { %v6708_v0 = vpop.f32.mrf.mxu1  ;;  %v3831_v37 = vpop.f32.mrf.mxu2  ;;  %4107 = vmatmul.f32.gmra.mxu0 %v6511_v11 }
 0x3ab   : > { %v3832_v60 = vadd.f32 %v3831_v37, %v3719_v45  ;;  %v6716_v59 = vpop.f32.mrf.mxu3  ;;  %v6725_v45 = vld [vmem:[#allocation3 + $0x158] sm:$0xff] }
 0x3ad   : > { %4169 = vmatmul.f32.gmra.mxu1 %v6711_v31  ;;  %v3945_v22 = vadd.f32 %v6663_v50, %v3832_v60  ;;  %v3647_v50 = vld [vmem:[#allocation10 + $0x350] sm:$0xff] }
 0x3ae   : > { %4372 = vmatpush.msra.mxu3 %v3647_v50  ;;  %v3728_v50 = vadd.f32 %v6650_v52, %v6507_v43 }
 0x3af   : > { %3881 = vmatmul.f32.gmra.mxu2 %v6454_v40  ;;  %v4063_v49 = vpop.f32.mrf.mxu0  ;;  %v6718_v11 = vadd.f32 %v4057_v10, %v3945_v22  ;;  %v2827_v40 = vld [vmem:[#allocation3 + $0x308] sm:$0xff]  ;;  %v3663_v22 = vld [vmem:[#allocation10 + $0x3d0] sm:$0xff] }
 0x3b0   : > { %4006 = vmatmul.f32.gmra.mxu3 %v2827_v40  ;;  %4485 = vmatpush.msra.mxu0 %v3663_v22 }
 0x3b2   : > { %v6722_v41 = vpop.f32.mrf.mxu1  ;;  %v3834_v55 = vpop.f32.mrf.mxu2  ;;  %4110 = vmatmul.f32.gmra.mxu0 %v6528_v5  ;;  %v3725_v5 = vadd.f32 %v6650_v52, %v6490_v12 }
 0x3b3   : > { %v3835_v51 = vadd.f32 %v3834_v55, %v3722_v39  ;;  %v6730_v38 = vpop.f32.mrf.mxu3  ;;  %v3630_v55 = vld [vmem:[#allocation10 + $0x2c8] sm:$0xff] }
 0x3b4   : > { %4260 = vmatpush.msra.mxu2 %v3630_v55  ;;  %v6767_v55 = vld [vmem:[#allocation3 + $0x170] sm:$0xff] }
 0x3b5   : > { %4172 = vmatmul.f32.gmra.mxu1 %v6725_v45  ;;  %v3948_v10 = vadd.f32 %v6674_v56, %v3835_v51  ;;  %v2828_v56 = vld [vmem:[#allocation3 + $0x310] sm:$0xff] }
 0x3b7   : > { %3884 = vmatmul.f32.gmra.mxu2 %v6471_v4  ;;  %v4066_v37 = vpop.f32.mrf.mxu0  ;;  %v6732_v1 = vadd.f32 %v4060_v9, %v3948_v10  ;;  %v3679_v9 = vld [vmem:[#allocation10 + $0x450] sm:$0xff] }
 0x3b8   : > { %4009 = vmatmul.f32.gmra.mxu3 %v2828_v56  ;;  %4598 = vmatpush.msra.mxu1 %v3679_v9 }
 0x3ba   : > { %v6736_v60 = vpop.f32.mrf.mxu1  ;;  %v3837_v19 = vpop.f32.mrf.mxu2  ;;  %4113 = vmatmul.f32.gmra.mxu0 %v6545_v27 }
 0x3bb   : > { %v3838_v24 = vadd.f32 %v3837_v19, %v3725_v5  ;;  %v6744_v39 = vpop.f32.mrf.mxu3  ;;  %v6753_v5 = vld [vmem:[#allocation3 + $0x168] sm:$0xff] }
 0x3bd   : > { %4175 = vmatmul.f32.gmra.mxu1 %v6739_v6  ;;  %v3951_v4 = vadd.f32 %v6688_v44, %v3838_v24  ;;  %v3646_v44 = vld [vmem:[#allocation10 + $0x348] sm:$0xff] }
 0x3be   : > { %4373 = vmatpush.msra.mxu3 %v3646_v44  ;;  %v3734_v44 = vadd.f32 %v6650_v52, %v6541_v29 }
 0x3bf   : > { %3887 = vmatmul.f32.gmra.mxu2 %v6488_v54  ;;  %v4069_v12 = vpop.f32.mrf.mxu0  ;;  %v6746_v27 = vadd.f32 %v4063_v49, %v3951_v4  ;;  %v2829_v54 = vld [vmem:[#allocation3 + $0x318] sm:$0xff]  ;;  %v3662_v4 = vld [vmem:[#allocation10 + $0x3c8] sm:$0xff] }
 0x3c0   : > { %4012 = vmatmul.f32.gmra.mxu3 %v2829_v54  ;;  %4486 = vmatpush.msra.mxu0 %v3662_v4 }
 0x3c2   : > { %v6750_v51 = vpop.f32.mrf.mxu1  ;;  %v3840_v40 = vpop.f32.mrf.mxu2  ;;  %4116 = vmatmul.f32.gmra.mxu0 %v6562_v48  ;;  %v3731_v48 = vadd.f32 %v6650_v52, %v6524_v7 }
 0x3c3   : > { %v3841_v10 = vadd.f32 %v3840_v40, %v3728_v50  ;;  %v6758_v43 = vpop.f32.mrf.mxu3  ;;  %v3629_v40 = vld [vmem:[#allocation10 + $0x2c0] sm:$0xff] }
 0x3c4   : > { %4261 = vmatpush.msra.mxu2 %v3629_v40  ;;  %v3660_v40 = vld [vmem:[#allocation10 + $0x3b8] sm:$0xff] }
 0x3c5   : > { %4178 = vmatmul.f32.gmra.mxu1 %v6753_v5  ;;  %v3954_v49 = vadd.f32 %v6702_v14, %v3841_v10  ;;  %v2830_v14 = vld [vmem:[#allocation3 + $0x320] sm:$0xff] }
 0x3c7   : > { %3890 = vmatmul.f32.gmra.mxu2 %v6505_v3  ;;  %v4072_v19 = vpop.f32.mrf.mxu0  ;;  %v6760_v22 = vadd.f32 %v4066_v37, %v3954_v49  ;;  %v3678_v37 = vld [vmem:[#allocation10 + $0x448] sm:$0xff] }
 0x3c8   : > { %4015 = vmatmul.f32.gmra.mxu3 %v2830_v14  ;;  %4599 = vmatpush.msra.mxu1 %v3678_v37  ;;  %v3644_v37 = vld [vmem:[#allocation10 + $0x338] sm:$0xff] }
 0x3ca   : > { %v6764_v24 = vpop.f32.mrf.mxu1  ;;  %v3843_v56 = vpop.f32.mrf.mxu2  ;;  %4119 = vmatmul.f32.gmra.mxu0 %v6579_v17 }
 0x3cb   : > { %v3844_v9 = vadd.f32 %v3843_v56, %v3731_v48  ;;  %v6772_v50 = vpop.f32.mrf.mxu3  ;;  %v6781_v48 = vld [vmem:[#allocation3 + $0x178] sm:$0xff]  ;;  %v3661_v56 = vld [vmem:[#allocation10 + $0x3c0] sm:$0xff] }
 0x3cc   : > { %4487 = vmatpush.msra.mxu0 %v3661_v56  ;;  %v3642_v56 = vld [vmem:[#allocation10 + $0x328] sm:$0xff] }
 0x3cd   : > { %4181 = vmatmul.f32.gmra.mxu1 %v6767_v55  ;;  %v3957_v3 = vadd.f32 %v6716_v59, %v3844_v9  ;;  %v3645_v59 = vld [vmem:[#allocation10 + $0x340] sm:$0xff]  ;;  %v3737_v9 = vadd.f32 %v6650_v52, %v6558_v25 }
 0x3ce   : > { %4374 = vmatpush.msra.mxu3 %v3645_v59  ;;  %4488 = vmatpush.msra.mxu0 %v3660_v40  ;;  %v3643_v59 = vld [vmem:[#allocation10 + $0x330] sm:$0xff]  ;;  %v3625_v40 = vld [vmem:[#allocation10 + $0x2a0] sm:$0xff] }
 0x3cf   : > { %3893 = vmatmul.f32.gmra.mxu2 %v6522_v42  ;;  %v4075_v7 = vpop.f32.mrf.mxu0  ;;  %v6774_v17 = vadd.f32 %v4069_v12, %v3957_v3  ;;  %v2831_v42 = vld [vmem:[#allocation3 + $0x328] sm:$0xff]  ;;  %v3628_v3 = vld [vmem:[#allocation10 + $0x2b8] sm:$0xff] }
 0x3d0   : > { %4018 = vmatmul.f32.gmra.mxu3 %v2831_v42  ;;  %4262 = vmatpush.msra.mxu2 %v3628_v3  ;;  %v3677_v42 = vld [vmem:[#allocation10 + $0x440] sm:$0xff] }
 0x3d1   : > { %4375 = vmatpush.msra.mxu3 %v3644_v37  ;;  %4600 = vmatpush.msra.mxu1 %v3677_v42  ;;  %v3641_v3 = vld [vmem:[#allocation10 + $0x320] sm:$0xff] }
 0x3d2   : > { %v6778_v10 = vpop.f32.mrf.mxu1  ;;  %v3846_v54 = vpop.f32.mrf.mxu2  ;;  %4122 = vmatmul.f32.gmra.mxu0 %v6596_v46 }
 0x3d3   : > { %v3847_v49 = vadd.f32 %v3846_v54, %v3734_v44  ;;  %v6788_v4 = vpop.f32.mrf.mxu3  ;;  %4376 = vmatpush.msra.mxu3 %v3643_v59 }
 0x3d5   : > { %4184 = vmatmul.f32.gmra.mxu1 %v6781_v48  ;;  %v3960_v12 = vadd.f32 %v6730_v38, %v3847_v49  ;;  %v6796_v38 = vld [vmem:[#allocation3 + $0x180] sm:$0xff]  ;;  %v3659_v49 = vld [vmem:[#allocation10 + $0x3b0] sm:$0xff]  ;;  %4377 = vmatpush.msra.mxu3 %v3642_v56  ;;  %v6813_v56 = vld [vmem:[#allocation3 + $0x188] sm:$0xff] }
 0x3d6   : > { %4489 = vmatpush.msra.mxu0 %v3659_v49  ;;  %v3656_v49 = vld [vmem:[#allocation10 + $0x398] sm:$0xff] }
 0x3d7   : > { %3896 = vmatmul.f32.gmra.mxu2 %v6539_v32  ;;  %v6786_v29 = vpop.f32.mrf.mxu0  ;;  %v6790_v46 = vadd.f32 %v4072_v19, %v3960_v12  ;;  %v2832_v32 = vld [vmem:[#allocation3 + $0x330] sm:$0xff]  ;;  %v3626_v12 = vld [vmem:[#allocation10 + $0x2a8] sm:$0xff]  ;;  %4378 = vmatpush.msra.mxu3 %v3641_v3 }
 0x3d8   : > { %v3627_v19 = vld [vmem:[#allocation10 + $0x2b0] sm:$0xff]  ;;  %4021 = vmatmul.f32.gmra.mxu3 %v2832_v32  ;;  %v3740_v32 = vadd.f32 %v6650_v52, %v6575_v21  ;;  %v3654_v3 = vld [vmem:[#allocation10 + $0x388] sm:$0xff] }
 0x3d9   : > { %7457 = vst [vmem:[#allocation23_spill] sm:$0xff] %v6790_v46  ;;  %4263 = vmatpush.msra.mxu2 %v3627_v19  ;;  %v3640_v19 = vld [vmem:[#allocation10 + $0x318] sm:$0xff]  ;;  %v3655_v21 = vld [vmem:[#allocation10 + $0x390] sm:$0xff]  ;;  %v7004_v46 = vld [vmem:[#allocation3 + $0x2a8] sm:$0xff] }
 0x3da   : > { %v6794_v14 = vpop.f32.mrf.mxu1  ;;  %v3849_v44 = vpop.f32.mrf.mxu2  ;;  %4125 = vmatmul.f32.gmra.mxu0 %v6613_v53  ;;  %v3658_v53 = vld [vmem:[#allocation10 + $0x3a8] sm:$0xff]  ;;  %4379 = vmatpush.msra.mxu3 %v3640_v19 }
 0x3db   : > { %v3850_v54 = vadd.f32 %v3849_v44, %v3737_v9  ;;  %v6804_v37 = vpop.f32.mrf.mxu3  ;;  %4264 = vmatpush.msra.mxu2 %v3626_v12  ;;  %4490 = vmatpush.msra.mxu0 %v3658_v53  ;;  %v3623_v53 = vld [vmem:[#allocation10 + $0x290] sm:$0xff] }
 0x3dd   : > { %4187 = vmatmul.f32.gmra.mxu1 %v6796_v38  ;;  %v3963_v25 = vadd.f32 %v6744_v39, %v3850_v54  ;;  %v3657_v39 = vld [vmem:[#allocation10 + $0x3a0] sm:$0xff]  ;;  %4265 = vmatpush.msra.mxu2 %v3625_v40 }
 0x3de   : > { %4491 = vmatpush.msra.mxu0 %v3657_v39  ;;  %v3622_v39 = vld [vmem:[#allocation10 + $0x288] sm:$0xff] }
 0x3df   : > { %3899 = vmatmul.f32.gmra.mxu2 %v6556_v23  ;;  %v6802_v9 = vpop.f32.mrf.mxu0  ;;  %v6806_v44 = vadd.f32 %v4075_v7, %v3963_v25  ;;  %v3624_v23 = vld [vmem:[#allocation10 + $0x298] sm:$0xff]  ;;  %v3639_v25 = vld [vmem:[#allocation10 + $0x310] sm:$0xff] }
 0x3e0   : > { %v2833_v7 = vld [vmem:[#allocation3 + $0x338] sm:$0xff]  ;;  %4266 = vmatpush.msra.mxu2 %v3624_v23  ;;  %4492 = vmatpush.msra.mxu0 %v3656_v49  ;;  %v3743_v23 = vadd.f32 %v6650_v52, %v6592_v35 }
 0x3e1   : > { %7458 = vst [vmem:[#allocation26_spill] sm:$0xff] %v6806_v44  ;;  %4024 = vmatmul.f32.gmra.mxu3 %v2833_v7  ;;  %v3676_v35 = vld [vmem:[#allocation10 + $0x438] sm:$0xff]  ;;  %v3670_v44 = vld [vmem:[#allocation10 + $0x408] sm:$0xff] }
 0x3e2   : > { %v6810_v54 = vpop.f32.mrf.mxu1  ;;  %v3852_v59 = vpop.f32.mrf.mxu2  ;;  %4128 = vmatmul.f32.gmra.mxu0 %v6630_v36  ;;  %v3638_v36 = vld [vmem:[#allocation10 + $0x308] sm:$0xff]  ;;  %4380 = vmatpush.msra.mxu3 %v3639_v25  ;;  %v6828_v25 = vld [vmem:[#allocation3 + $0x190] sm:$0xff] }
 0x3e3   : > { %v3853_v42 = vadd.f32 %v3852_v59, %v3740_v32  ;;  %v6818_v32 = vpop.f32.mrf.mxu3  ;;  %4493 = vmatpush.msra.mxu0 %v3655_v21  ;;  %4267 = vmatpush.msra.mxu2 %v3623_v53  ;;  %v3637_v59 = vld [vmem:[#allocation10 + $0x300] sm:$0xff] }
 0x3e4   : > { %4381 = vmatpush.msra.mxu3 %v3638_v36  ;;  %4601 = vmatpush.msra.mxu1 %v3676_v35  ;;  %v3746_v36 = vadd.f32 %v6650_v52, %v6609_v47  ;;  %v3749_v47 = vadd.f32 %v6650_v52, %v6626_v63 }
 0x3e5   : > { %4190 = vmatmul.f32.gmra.mxu1 %v6813_v56  ;;  %v3966_v12 = vadd.f32 %v6758_v43, %v3853_v42  ;;  %v3653_v43 = vld [vmem:[#allocation10 + $0x380] sm:$0xff]  ;;  %4494 = vmatpush.msra.mxu0 %v3654_v3 }
 0x3e6   : > { %v3621_v42 = vld [vmem:[#allocation10 + $0x280] sm:$0xff]  ;;  %4268 = vmatpush.msra.mxu2 %v3622_v39  ;;  %4382 = vmatpush.msra.mxu3 %v3637_v59 }
 0x3e7   : > { %3902 = vmatmul.f32.gmra.mxu2 %v6573_v62  ;;  %v4084_v40 = vpop.f32.mrf.mxu0  ;;  %v6821_v19 = vadd.f32 %v6786_v29, %v3966_v12  ;;  %4495 = vmatpush.msra.mxu0 %v3653_v43  ;;  %v3059_v29 = vld [vmem:[#allocation3 + $0x20] sm:$0xff] }
 0x3e8   : > { %4269 = vmatpush.msra.mxu2 %v3621_v42  ;;  %v2896_v39 = vld [vmem:[#allocation3 + $0x100] sm:$0xff] }
 0x3e9   : > { %7459 = vst [vmem:[#allocation15_spill] sm:$0xff] %v6821_v19  ;;  %4383 = vmatmul.f32.vlgmr.msra.gmra.mxu3 %v3059_v29  ;;  %v2897_v29 = vld [vmem:[#allocation3 + $0x108] sm:$0xff]  ;;  %v6965_v19 = vld [vmem:[#allocation3 + $0x290] sm:$0xff] }
 0x3ea   : > { %v6825_v49 = vpop.f32.mrf.mxu1  ;;  %v3855_v62 = vpop.f32.mrf.mxu2  ;;  %4131 = vmatmul.f32.gmra.mxu0 %v6644_v57 }
 0x3eb   : > { %v3856_v7 = vadd.f32 %v3855_v62, %v3743_v23  ;;  %v3980_v53 = vpop.f32.mrf.mxu3  ;;  %v3060_v23 = vld [vmem:[#allocation3 + $0x28] sm:$0xff] }
 0x3ed   : > { %4193 = vmatmul.f32.gmra.mxu1 %v6828_v25  ;;  %v3969_v21 = vadd.f32 %v6772_v50, %v3856_v7  ;;  %v6840_v50 = vld [vmem:[#allocation3 + $0x198] sm:$0xff] }
 0x3ef   : > { %3905 = vmatmul.f32.gmra.mxu2 %v6590_v28  ;;  %v4087_v12 = vpop.f32.mrf.mxu0  ;;  %v6834_v57 = vadd.f32 %v6802_v9, %v3969_v21 }
 0x3f1   : > { %7460 = vst [vmem:[#allocation24_spill] sm:$0xff] %v6834_v57  ;;  %4386 = vmatmul.f32.gmra.mxu3 %v3060_v23  ;;  %v6949_v57 = vld [vmem:[#allocation3 + $0x1e0] sm:$0xff] }
 0x3f2   : > { %v6838_v3 = vpop.f32.mrf.mxu1  ;;  %v3858_v59 = vpop.f32.mrf.mxu2  ;;  %4134 = vmatmul.f32.gmra.mxu0 %v2896_v39  ;;  %v3675_v39 = vld [vmem:[#allocation10 + $0x430] sm:$0xff] }
 0x3f3   : > { %v3859_v43 = vadd.f32 %v3858_v59, %v3746_v36  ;;  %v3983_v42 = vpop.f32.mrf.mxu3  ;;  %v6851_v36 = vld [vmem:[#allocation3 + $0x1a0] sm:$0xff]  ;;  %4602 = vmatpush.msra.mxu1 %v3675_v39 }
 0x3f5   : > { %4196 = vmatmul.f32.gmra.mxu1 %v6840_v50  ;;  %v3972_v28 = vadd.f32 %v6788_v4, %v3859_v43  ;;  %v3061_v4 = vld [vmem:[#allocation3 + $0x30] sm:$0xff]  ;;  %v3752_v43 = vadd.f32 %v6650_v52, %v6641_v58  ;;  %v3755_v58 = vadd.f32 %v6650_v52, %v6658_v8 }
 0x3f7   : > { %3908 = vmatmul.f32.gmra.mxu2 %v6607_v26  ;;  %v4090_v9 = vpop.f32.mrf.mxu0  ;;  %v6845_v62 = vadd.f32 %v4084_v40, %v3972_v28 }
 0x3f9   : > { %7461 = vst [vmem:[#allocation27_spill] sm:$0xff] %v6845_v62  ;;  %4389 = vmatmul.f32.gmra.mxu3 %v3061_v4  ;;  %v6926_v62 = vld [vmem:[#allocation3 + $0x278] sm:$0xff] }
 0x3fa   : > { %v6849_v7 = vpop.f32.mrf.mxu1  ;;  %v3861_v21 = vpop.f32.mrf.mxu2  ;;  %4137 = vmatmul.f32.gmra.mxu0 %v2897_v29  ;;  %v6863_v29 = vld [vmem:[#allocation3 + $0x1a8] sm:$0xff] }
 0x3fb   : > { %v3862_v35 = vadd.f32 %v3861_v21, %v3749_v47  ;;  %v3986_v63 = vpop.f32.mrf.mxu3  ;;  %v2994_v21 = vld [vmem:[#allocation3 + $0x250] sm:$0xff] }
 0x3fd   : > { %4199 = vmatmul.f32.gmra.mxu1 %v6851_v36  ;;  %v3975_v26 = vadd.f32 %v6804_v37, %v3862_v35  ;;  %v3062_v37 = vld [vmem:[#allocation3 + $0x38] sm:$0xff] }
 0x3ff   : > { %3911 = vmatmul.f32.gmra.mxu2 %v6624_v34  ;;  %v4093_v40 = vpop.f32.mrf.mxu0  ;;  %v6856_v59 = vadd.f32 %v4087_v12, %v3975_v26 }
 0x401   : > { %7462 = vst [vmem:[#allocation16_spill] sm:$0xff] %v6856_v59  ;;  %4392 = vmatmul.f32.gmra.mxu3 %v3062_v37  ;;  %v2995_v37 = vld [vmem:[#allocation3 + $0x258] sm:$0xff]  ;;  %v6923_v59 = vld [vmem:[#allocation3 + $0x1d0] sm:$0xff] }
 0x402   : > { %v6860_v23 = vpop.f32.mrf.mxu1  ;;  %v3864_v28 = vpop.f32.mrf.mxu2  ;;  %4496 = vmatmul.f32.vlgmr.msra.gmra.mxu0 %v6683_v61 }
 0x403   : > { %v3865_v47 = vadd.f32 %v3864_v28, %v3752_v43  ;;  %v3989_v35 = vpop.f32.mrf.mxu3  ;;  %v6874_v43 = vld [vmem:[#allocation3 + $0x1b0] sm:$0xff] }
 0x405   : > { %4202 = vmatmul.f32.gmra.mxu1 %v6863_v29  ;;  %v3978_v34 = vadd.f32 %v6818_v32, %v3865_v47  ;;  %v3063_v32 = vld [vmem:[#allocation3 + $0x40] sm:$0xff]  ;;  %v3674_v47 = vld [vmem:[#allocation10 + $0x428] sm:$0xff] }
 0x406   : > { %4603 = vmatpush.msra.mxu1 %v3674_v47  ;;  %v3761_v47 = vadd.f32 %v6650_v52, %v6680_v20 }
 0x407   : > { %4270 = vmatmul.f32.vlgmr.msra.gmra.mxu2 %v2994_v21  ;;  %v4096_v12 = vpop.f32.mrf.mxu0  ;;  %v6867_v4 = vadd.f32 %v4090_v9, %v3978_v34  ;;  %v3758_v21 = vadd.f32 %v6650_v52, %v6669_v13 }
 0x409   : > { %7463 = vst [vmem:[#allocation25_spill] sm:$0xff] %v6867_v4  ;;  %4395 = vmatmul.f32.gmra.mxu3 %v3063_v32  ;;  %v6884_v4 = vld [vmem:[#allocation3 + $0x1b8] sm:$0xff]  ;;  %v6887_v32 = vld [vmem:[#allocation3 + $0x260] sm:$0xff] }
 0x40a   : > { %v6871_v26 = vpop.f32.mrf.mxu1  ;;  %v3867_v61 = vpop.f32.mrf.mxu2  ;;  %4499 = vmatmul.f32.gmra.mxu0 %v6697_v2 }
 0x40b   : > { %v3868_v39 = vadd.f32 %v3867_v61, %v3755_v58  ;;  %v3992_v34 = vpop.f32.mrf.mxu3 }
 0x40d   : > { %4205 = vmatmul.f32.gmra.mxu1 %v6874_v43  ;;  %v3981_v28 = vadd.f32 %v3980_v53, %v3868_v39  ;;  %v3064_v53 = vld [vmem:[#allocation3 + $0x48] sm:$0xff] }
 0x40f   : > { %4273 = vmatmul.f32.gmra.mxu2 %v2995_v37  ;;  %v4099_v9 = vpop.f32.mrf.mxu0  ;;  %v6877_v8 = vadd.f32 %v4093_v40, %v3981_v28 }
 0x411   : > { %7464 = vst [vmem:[#allocation29_spill] sm:$0xff] %v6877_v8  ;;  %4398 = vmatmul.f32.gmra.mxu3 %v3064_v53  ;;  %v3673_v53 = vld [vmem:[#allocation10 + $0x420] sm:$0xff]  ;;  %v6900_v8 = vld [vmem:[#allocation3 + $0x268] sm:$0xff] }
 0x412   : > { %v6881_v2 = vpop.f32.mrf.mxu1  ;;  %v3870_v58 = vpop.f32.mrf.mxu2  ;;  %4502 = vmatmul.f32.gmra.mxu0 %v6711_v31  ;;  %4604 = vmatpush.msra.mxu1 %v3673_v53 }
 0x413   : > { %v3871_v61 = vadd.f32 %v3870_v58, %v3758_v21  ;;  %v3995_v28 = vpop.f32.mrf.mxu3  ;;  %v6897_v58 = vld [vmem:[#allocation3 + $0x1c0] sm:$0xff] }
 0x415   : > { %4208 = vmatmul.f32.gmra.mxu1 %v6884_v4  ;;  %v3984_v39 = vadd.f32 %v3983_v42, %v3871_v61  ;;  %v3065_v42 = vld [vmem:[#allocation3 + $0x50] sm:$0xff] }
 0x417   : > { %4276 = vmatmul.f32.gmra.mxu2 %v6887_v32  ;;  %v4102_v40 = vpop.f32.mrf.mxu0  ;;  %v6890_v13 = vadd.f32 %v4096_v12, %v3984_v39 }
 0x419   : > { %7465 = vst [vmem:[#allocation17_spill] sm:$0xff] %v6890_v13  ;;  %4401 = vmatmul.f32.gmra.mxu3 %v3065_v42  ;;  %v3066_v42 = vld [vmem:[#allocation3 + $0x58] sm:$0xff]  ;;  %v6913_v13 = vld [vmem:[#allocation3 + $0x270] sm:$0xff] }
 0x41a   : > { %v6894_v31 = vpop.f32.mrf.mxu1  ;;  %v3873_v37 = vpop.f32.mrf.mxu2  ;;  %4505 = vmatmul.f32.gmra.mxu0 %v6725_v45  ;;  %v3764_v45 = vadd.f32 %v6650_v52, %v6694_v30 }
 0x41b   : > { %v3874_v21 = vadd.f32 %v3873_v37, %v3761_v47  ;;  %v3998_v12 = vpop.f32.mrf.mxu3 }
 0x41d   : > { %4211 = vmatmul.f32.gmra.mxu1 %v6897_v58  ;;  %v3987_v61 = vadd.f32 %v3986_v63, %v3874_v21  ;;  %v6910_v21 = vld [vmem:[#allocation3 + $0x1c8] sm:$0xff] }
 0x41f   : > { %4279 = vmatmul.f32.gmra.mxu2 %v6900_v8  ;;  %v4105_v20 = vpop.f32.mrf.mxu0  ;;  %v6903_v39 = vadd.f32 %v4099_v9, %v3987_v61 }
 0x421   : > { %7466 = vst [vmem:[#allocation28_spill] sm:$0xff] %v6903_v39  ;;  %4404 = vmatmul.f32.gmra.mxu3 %v3066_v42  ;;  %v3767_v39 = vadd.f32 %v6650_v52, %v6708_v0  ;;  %v3672_v42 = vld [vmem:[#allocation10 + $0x418] sm:$0xff] }
 0x422   : > { %v6907_v47 = vpop.f32.mrf.mxu1  ;;  %v3876_v37 = vpop.f32.mrf.mxu2  ;;  %4508 = vmatmul.f32.gmra.mxu0 %v6739_v6  ;;  %4605 = vmatpush.msra.mxu1 %v3672_v42 }
 0x423   : > { %v3877_v63 = vadd.f32 %v3876_v37, %v3764_v45  ;;  %v4001_v61 = vpop.f32.mrf.mxu3 }
 0x425   : > { %4214 = vmatmul.f32.gmra.mxu1 %v6910_v21  ;;  %v3990_v53 = vadd.f32 %v3989_v35, %v3877_v63  ;;  %v3067_v35 = vld [vmem:[#allocation3 + $0x60] sm:$0xff] }
 0x427   : > { %4282 = vmatmul.f32.gmra.mxu2 %v6913_v13  ;;  %v4108_v9 = vpop.f32.mrf.mxu0  ;;  %v6916_v30 = vadd.f32 %v4102_v40, %v3990_v53 }
 0x429   : > { %7467 = vst [vmem:[#allocation31_spill] sm:$0xff] %v6916_v30  ;;  %4407 = vmatmul.f32.gmra.mxu3 %v3067_v35  ;;  %v3068_v35 = vld [vmem:[#allocation3 + $0x68] sm:$0xff]  ;;  %v6939_v30 = vld [vmem:[#allocation3 + $0x280] sm:$0xff] }
 0x42a   : > { %v6920_v6 = vpop.f32.mrf.mxu1  ;;  %v3879_v45 = vpop.f32.mrf.mxu2  ;;  %4511 = vmatmul.f32.gmra.mxu0 %v6753_v5  ;;  %v3770_v5 = vadd.f32 %v6650_v52, %v6722_v41 }
 0x42b   : > { %v3880_v37 = vadd.f32 %v3879_v45, %v3767_v39  ;;  %v4004_v40 = vpop.f32.mrf.mxu3 }
 0x42d   : > { %4217 = vmatmul.f32.gmra.mxu1 %v6923_v59  ;;  %v3993_v63 = vadd.f32 %v3992_v34, %v3880_v37  ;;  %v6936_v37 = vld [vmem:[#allocation3 + $0x1d8] sm:$0xff] }
 0x42f   : > { %4285 = vmatmul.f32.gmra.mxu2 %v6926_v62  ;;  %v4111_v0 = vpop.f32.mrf.mxu0  ;;  %v6929_v53 = vadd.f32 %v4105_v20, %v3993_v63 }
 0x431   : > { %7468 = vst [vmem:[#allocation18_spill] sm:$0xff] %v6929_v53  ;;  %4410 = vmatmul.f32.gmra.mxu3 %v3068_v35  ;;  %v3773_v53 = vadd.f32 %v6650_v52, %v6736_v60  ;;  %v3671_v35 = vld [vmem:[#allocation10 + $0x410] sm:$0xff] }
 0x432   : > { %v6933_v39 = vpop.f32.mrf.mxu1  ;;  %v3882_v45 = vpop.f32.mrf.mxu2  ;;  %4514 = vmatmul.f32.gmra.mxu0 %v6767_v55  ;;  %4606 = vmatpush.msra.mxu1 %v3671_v35 }
 0x433   : > { %v3883_v34 = vadd.f32 %v3882_v45, %v3770_v5  ;;  %v4007_v41 = vpop.f32.mrf.mxu3 }
 0x434   : > { %4607 = vmatpush.msra.mxu1 %v3670_v44 }
 0x435   : > { %4220 = vmatmul.f32.gmra.mxu1 %v6936_v37  ;;  %v3996_v42 = vadd.f32 %v3995_v28, %v3883_v34  ;;  %v3069_v28 = vld [vmem:[#allocation3 + $0x70] sm:$0xff] }
 0x437   : > { %4288 = vmatmul.f32.gmra.mxu2 %v6939_v30  ;;  %v4114_v20 = vpop.f32.mrf.mxu0  ;;  %v6942_v63 = vadd.f32 %v4108_v9, %v3996_v42  ;;  %v6952_v9 = vld [vmem:[#allocation3 + $0x288] sm:$0xff] }
 0x439   : > { %7469 = vst [vmem:[#allocation30_spill] sm:$0xff] %v6942_v63  ;;  %4413 = vmatmul.f32.gmra.mxu3 %v3069_v28  ;;  %v3070_v28 = vld [vmem:[#allocation3 + $0x78] sm:$0xff] }
 0x43a   : > { %v6946_v55 = vpop.f32.mrf.mxu1  ;;  %v3885_v5 = vpop.f32.mrf.mxu2  ;;  %4517 = vmatmul.f32.gmra.mxu0 %v6781_v48  ;;  %v3776_v48 = vadd.f32 %v6650_v52, %v6750_v51 }
 0x43b   : > { %v3886_v45 = vadd.f32 %v3885_v5, %v3773_v53  ;;  %v4010_v63 = vpop.f32.mrf.mxu3 }
 0x43d   : > { %4223 = vmatmul.f32.gmra.mxu1 %v6949_v57  ;;  %v3999_v34 = vadd.f32 %v3998_v12, %v3886_v45  ;;  %v6962_v45 = vld [vmem:[#allocation3 + $0x1e8] sm:$0xff] }
 0x43f   : > { %4291 = vmatmul.f32.gmra.mxu2 %v6952_v9  ;;  %v4117_v60 = vpop.f32.mrf.mxu0  ;;  %v6955_v42 = vadd.f32 %v4111_v0, %v3999_v34  ;;  %v3779_v34 = vadd.f32 %v6650_v52, %v6764_v24 }
 0x441   : > { %7470 = vst [vmem:[#allocation33_spill] sm:$0xff] %v6955_v42  ;;  %4416 = vmatmul.f32.gmra.mxu3 %v3070_v28  ;;  %v6975_v42 = vld [vmem:[#allocation3 + $0x1f0] sm:$0xff] }
 0x442   : > { %v6959_v53 = vpop.f32.mrf.mxu1  ;;  %v3888_v5 = vpop.f32.mrf.mxu2  ;;  %4520 = vmatmul.f32.gmra.mxu0 %v6796_v38 }
 0x443   : > { %v3889_v12 = vadd.f32 %v3888_v5, %v3776_v48 }
 0x445   : > { %4226 = vmatmul.f32.gmra.mxu1 %v6962_v45  ;;  %v4002_v35 = vadd.f32 %v4001_v61, %v3889_v12  ;;  %v4013_v61 = vpop.f32.mrf.mxu3  ;;  %v3071_v12 = vld [vmem:[#allocation3 + $0x80] sm:$0xff] }
 0x447   : > { %4294 = vmatmul.f32.gmra.mxu2 %v6965_v19  ;;  %v4120_v0 = vpop.f32.mrf.mxu0  ;;  %v6968_v51 = vadd.f32 %v4114_v20, %v4002_v35  ;;  %v6978_v20 = vld [vmem:[#allocation3 + $0x298] sm:$0xff] }
 0x449   : > { %7471 = vst [vmem:[#allocation19_spill] sm:$0xff] %v6968_v51  ;;  %4419 = vmatmul.f32.gmra.mxu3 %v3071_v12  ;;  %v6991_v12 = vld [vmem:[#allocation3 + $0x2a0] sm:$0xff] }
 0x44a   : > { %v6972_v38 = vpop.f32.mrf.mxu1  ;;  %v3891_v48 = vpop.f32.mrf.mxu2  ;;  %4523 = vmatmul.f32.gmra.mxu0 %v6813_v56  ;;  %v3782_v56 = vadd.f32 %v6650_v52, %v6778_v10 }
 0x44b   : > { %v3892_v5 = vadd.f32 %v3891_v48, %v3779_v34 }
 0x44d   : > { %4229 = vmatmul.f32.gmra.mxu1 %v6975_v42  ;;  %v4005_v28 = vadd.f32 %v4004_v40, %v3892_v5  ;;  %v6988_v40 = vld [vmem:[#allocation3 + $0x1f8] sm:$0xff]  ;;  %v3072_v5 = vld [vmem:[#allocation3 + $0x88] sm:$0xff] }
 0x44f   : > { %4297 = vmatmul.f32.gmra.mxu2 %v6978_v20  ;;  %v4123_v24 = vpop.f32.mrf.mxu0  ;;  %v6981_v35 = vadd.f32 %v4117_v60, %v4005_v28  ;;  %v4016_v60 = vpop.f32.mrf.mxu3 }
 0x451   : > { %7472 = vst [vmem:[#allocation32_spill] sm:$0xff] %v6981_v35  ;;  %4422 = vmatmul.f32.gmra.mxu3 %v3072_v5  ;;  %v3785_v35 = vadd.f32 %v6650_v52, %v6794_v14  ;;  %v3669_v5 = vld [vmem:[#allocation10 + $0x400] sm:$0xff] }
 0x452   : > { %v6985_v34 = vpop.f32.mrf.mxu1  ;;  %v3894_v48 = vpop.f32.mrf.mxu2  ;;  %4526 = vmatmul.f32.gmra.mxu0 %v6828_v25  ;;  %4608 = vmatpush.msra.mxu1 %v3669_v5 }
 0x453   : > { %7473 = vst [vmem:[#allocation20_spill] sm:$0xff] %v6985_v34  ;;  %v3895_v51 = vadd.f32 %v3894_v48, %v3782_v56  ;;  %v7001_v34 = vld [vmem:[#allocation3 + $0x200] sm:$0xff] }
 0x455   : > { %4232 = vmatmul.f32.gmra.mxu1 %v6988_v40  ;;  %v4008_v44 = vadd.f32 %v4007_v41, %v3895_v51  ;;  %v3073_v41 = vld [vmem:[#allocation3 + $0x90] sm:$0xff] }
 0x457   : > { %4300 = vmatmul.f32.gmra.mxu2 %v6991_v12  ;;  %v4126_v28 = vpop.f32.mrf.mxu0  ;;  %v6994_v10 = vadd.f32 %v4120_v0, %v4008_v44  ;;  %v4019_v44 = vpop.f32.mrf.mxu3 }
 0x459   : > { %7474 = vst [vmem:[#allocation21_spill] sm:$0xff] %v6994_v10  ;;  %4425 = vmatmul.f32.gmra.mxu3 %v3073_v41  ;;  %v3074_v41 = vld [vmem:[#allocation3 + $0x98] sm:$0xff]  ;;  %v7017_v10 = vld [vmem:[#allocation3 + $0x2b0] sm:$0xff] }
 0x45a   : > { %v6998_v25 = vpop.f32.mrf.mxu1  ;;  %v3897_v56 = vpop.f32.mrf.mxu2  ;;  %4529 = vmatmul.f32.gmra.mxu0 %v6840_v50  ;;  %v3788_v50 = vadd.f32 %v6650_v52, %v6810_v54  ;;  %v5046_v52 = vld [vmem:[%s7385_s4] ss:$0 sm:$0xff] }
 0x45b   : > { %v3898_v48 = vadd.f32 %v3897_v56, %v3785_v35  ;;  %v3791_v54 = vadd.f32 %v5046_v52, %v6825_v49 }
 0x45d   : > { %4235 = vmatmul.f32.gmra.mxu1 %v7001_v34  ;;  %v4011_v51 = vadd.f32 %v4010_v63, %v3898_v48  ;;  %v7014_v48 = vld [vmem:[#allocation3 + $0x208] sm:$0xff] }
 0x45f   : > { %4303 = vmatmul.f32.gmra.mxu2 %v7004_v46  ;;  %v4129_v14 = vpop.f32.mrf.mxu0  ;;  %v7007_v0 = vadd.f32 %v4123_v24, %v4011_v51 }
 0x461   : > { %7475 = vst [vmem:[#allocation22_spill] sm:$0xff] %v7007_v0  ;;  %4428 = vmatmul.f32.gmra.mxu3 %v3074_v41  ;;  %v3075_v41 = vld [vmem:[#allocation3 + $0xa0] sm:$0xff]  ;;  %v3794_v0 = vadd.f32 %v5046_v52, %v6838_v3 }
 0x462   : > { %v7011_v35 = vpop.f32.mrf.mxu1  ;;  %v3900_v56 = vpop.f32.mrf.mxu2  ;;  %4532 = vmatmul.f32.gmra.mxu0 %v6851_v36 }
 0x463   : > { %7476 = vst [vmem:[#allocation34_spill] sm:$0xff] %v7011_v35  ;;  %v3901_v63 = vadd.f32 %v3900_v56, %v3788_v50  ;;  %v7044_v35 = vld [vmem:[#allocation3 + $0x2c0] sm:$0xff] }
 0x465   : > { %4238 = vmatmul.f32.gmra.mxu1 %v7014_v48  ;;  %v4014_v5 = vadd.f32 %v4013_v61, %v3901_v63  ;;  %v4022_v61 = vpop.f32.mrf.mxu3  ;;  %v7029_v63 = vld [vmem:[#allocation3 + $0x210] sm:$0xff] }
 0x467   : > { %4306 = vmatmul.f32.gmra.mxu2 %v7017_v10  ;;  %v4132_v24 = vpop.f32.mrf.mxu0  ;;  %v7020_v51 = vadd.f32 %v4126_v28, %v4014_v5  ;;  %v7032_v5 = vld [vmem:[#allocation3 + $0x2b8] sm:$0xff] }
 0x469   : > { %7477 = vst [vmem:[#allocation35_spill] sm:$0xff] %v7020_v51  ;;  %4431 = vmatmul.f32.gmra.mxu3 %v3075_v41 }
 0x46a   : > { %v7026_v36 = vpop.f32.mrf.mxu1  ;;  %v3903_v50 = vpop.f32.mrf.mxu2  ;;  %4535 = vmatmul.f32.gmra.mxu0 %v6863_v29 }
 0x46b   : > { %7478 = vst [vmem:[#allocation36_spill] sm:$0xff] %v7026_v36  ;;  %v3904_v56 = vadd.f32 %v3903_v50, %v3791_v54  ;;  %v7041_v50 = vld [vmem:[#allocation3 + $0x218] sm:$0xff] }
 0x46d   : > { %4241 = vmatmul.f32.gmra.mxu1 %v7029_v63  ;;  %v4017_v28 = vadd.f32 %v4016_v60, %v3904_v56  ;;  %v4025_v60 = vpop.f32.mrf.mxu3  ;;  %v3076_v56 = vld [vmem:[#allocation3 + $0xa8] sm:$0xff] }
 0x46f   : > { %4309 = vmatmul.f32.gmra.mxu2 %v7032_v5  ;;  %v4135_v51 = vpop.f32.mrf.mxu0  ;;  %v7035_v49 = vadd.f32 %v4129_v14, %v4017_v28  ;;  %v3797_v28 = vadd.f32 %v5046_v52, %v6849_v7 }
 0x471   : > { %7479 = vst [vmem:[#allocation37_spill] sm:$0xff] %v7035_v49  ;;  %4434 = vmatmul.f32.gmra.mxu3 %v3076_v56  ;;  %v7056_v56 = vld [vmem:[#allocation3 + $0x2c8] sm:$0xff] }
 0x472   : > { %v7038_v36 = vpop.f32.mrf.mxu1  ;;  %v3906_v29 = vpop.f32.mrf.mxu2  ;;  %4538 = vmatmul.f32.gmra.mxu0 %v6874_v43 }
 0x473   : > { %7480 = vst [vmem:[#allocation38_spill] sm:$0xff] %v7038_v36  ;;  %v3907_v54 = vadd.f32 %v3906_v29, %v3794_v0  ;;  %v7053_v29 = vld [vmem:[#allocation3 + $0x220] sm:$0xff] }
 0x475   : > { %4244 = vmatmul.f32.gmra.mxu1 %v7041_v50  ;;  %v4020_v41 = vadd.f32 %v4019_v44, %v3907_v54  ;;  %v3077_v44 = vld [vmem:[#allocation3 + $0xb0] sm:$0xff]  ;;  %v4384_v36 = vpop.f32.mrf.mxu3 }
 0x477   : > { %4312 = vmatmul.f32.gmra.mxu2 %v7044_v35  ;;  %v4138_v14 = vpop.f32.mrf.mxu0  ;;  %v7047_v3 = vadd.f32 %v4132_v24, %v4020_v41  ;;  %v3800_v41 = vadd.f32 %v5046_v52, %v6860_v23  ;;  %v4159_v52 = vadd.f32 %v6871_v26, %v6665_v18  ;;  %v4162_v18 = vadd.f32 %v6881_v2, %v6676_v33 }
 0x478   : > { %v4165_v33 = vadd.f32 %v6894_v31, %v6690_v16  ;;  %v4168_v16 = vadd.f32 %v6907_v47, %v6704_v15  ;;  %v4171_v15 = vadd.f32 %v6920_v6, %v6718_v11  ;;  %v4174_v11 = vadd.f32 %v6933_v39, %v6732_v1 }
 0x479   : > { %7481 = vst [vmem:[#allocation39_spill] sm:$0xff] %v7047_v3  ;;  %4437 = vmatmul.f32.gmra.mxu3 %v3077_v44  ;;  %v7068_v44 = vld [vmem:[#allocation3 + $0x2d0] sm:$0xff]  ;;  %v4177_v1 = vadd.f32 %v6946_v55, %v6746_v27  ;;  %v4180_v27 = vadd.f32 %v6959_v53, %v6760_v22  ;;  %v3087_v53 = vld [vmem:[#allocation3 + $0x100] sm:$0xff] }
 0x47a   : > { %v7050_v49 = vpop.f32.mrf.mxu1  ;;  %v3909_v43 = vpop.f32.mrf.mxu2  ;;  %4541 = vmatmul.f32.gmra.mxu0 %v6884_v4 }
 0x47b   : > { %v3910_v0 = vadd.f32 %v3909_v43, %v3797_v28  ;;  %v7065_v43 = vld [vmem:[#allocation3 + $0x228] sm:$0xff] }
 0x47d   : > { %4247 = vmatmul.f32.gmra.mxu1 %v7053_v29  ;;  %v4023_v54 = vadd.f32 %v4022_v61, %v3910_v0  ;;  %v3078_v61 = vld [vmem:[#allocation3 + $0xb8] sm:$0xff]  ;;  %v4387_v23 = vpop.f32.mrf.mxu3 }
 0x47f   : > { %4315 = vmatmul.f32.gmra.mxu2 %v7056_v56  ;;  %v7059_v24 = vadd.f32 %v4135_v51, %v4023_v54  ;;  %v4497_v7 = vpop.f32.mrf.mxu0 }
 0x481   : > { %4440 = vmatmul.f32.gmra.mxu3 %v3078_v61  ;;  %v7079_v61 = vld [vmem:[#allocation3 + $0x2d8] sm:$0xff] }
 0x482   : > { %v7062_v3 = vpop.f32.mrf.mxu1  ;;  %v3912_v4 = vpop.f32.mrf.mxu2  ;;  %4544 = vmatmul.f32.gmra.mxu0 %v6897_v58 }
 0x483   : > { %v3913_v28 = vadd.f32 %v3912_v4, %v3800_v41 }
 0x485   : > { %4250 = vmatmul.f32.gmra.mxu1 %v7065_v43  ;;  %v4026_v0 = vadd.f32 %v4025_v60, %v3913_v28  ;;  %v3079_v60 = vld [vmem:[#allocation3 + $0xc0] sm:$0xff] }
 0x487   : > { %4318 = vmatmul.f32.gmra.mxu2 %v7068_v44  ;;  %v7071_v51 = vadd.f32 %v4138_v14, %v4026_v0  ;;  %v4500_v41 = vpop.f32.mrf.mxu0 }
 0x489   : > { %4443 = vmatmul.f32.gmra.mxu3 %v3079_v60 }
 0x48a   : > { %v7075_v54 = vpop.f32.mrf.mxu1  ;;  %v4271_v58 = vpop.f32.mrf.mxu2  ;;  %4547 = vmatmul.f32.gmra.mxu0 %v6910_v21 }
 0x48b   : > { %v4272_v4 = vadd.f32 %v4271_v58, %v4159_v52  ;;  %v4390_v21 = vpop.f32.mrf.mxu3 }
 0x48d   : > { %4609 = vmatmul.f32.vlgmr.msra.gmra.mxu1 %v6887_v32  ;;  %v4385_v28 = vadd.f32 %v4384_v36, %v4272_v4  ;;  %v3080_v36 = vld [vmem:[#allocation3 + $0xc8] sm:$0xff]  ;;  %v7090_v4 = vld [vmem:[#allocation3 + $0x2e0] sm:$0xff] }
 0x48f   : > { %4321 = vmatmul.f32.gmra.mxu2 %v7079_v61  ;;  %v7082_v14 = vadd.f32 %v4497_v7, %v4385_v28  ;;  %v4503_v32 = vpop.f32.mrf.mxu0 }
 0x491   : > { %4446 = vmatmul.f32.gmra.mxu3 %v3080_v36  ;;  %v7112_v36 = vld [vmem:[#allocation3 + $0x2f0] sm:$0xff] }
 0x492   : > { %v7086_v26 = vpop.f32.mrf.mxu1  ;;  %v4274_v0 = vpop.f32.mrf.mxu2  ;;  %4550 = vmatmul.f32.gmra.mxu0 %v6923_v59 }
 0x493   : > { %v4275_v52 = vadd.f32 %v4274_v0, %v4162_v18  ;;  %v7101_v0 = vld [vmem:[#allocation3 + $0x2e8] sm:$0xff] }
 0x495   : > { %4612 = vmatmul.f32.gmra.mxu1 %v6900_v8  ;;  %v4388_v58 = vadd.f32 %v4387_v23, %v4275_v52  ;;  %v4393_v8 = vpop.f32.mrf.mxu3  ;;  %v3081_v23 = vld [vmem:[#allocation3 + $0xd0] sm:$0xff] }
 0x497   : > { %4324 = vmatmul.f32.gmra.mxu2 %v7090_v4  ;;  %v7093_v7 = vadd.f32 %v4500_v41, %v4388_v58  ;;  %v4506_v18 = vpop.f32.mrf.mxu0 }
 0x499   : > { %4449 = vmatmul.f32.gmra.mxu3 %v3081_v23 }
 0x49a   : > { %v7097_v2 = vpop.f32.mrf.mxu1  ;;  %v4277_v59 = vpop.f32.mrf.mxu2  ;;  %4553 = vmatmul.f32.gmra.mxu0 %v6936_v37 }
 0x49b   : > { %v4278_v60 = vadd.f32 %v4277_v59, %v4165_v33  ;;  %v3083_v59 = vld [vmem:[#allocation3 + $0xe0] sm:$0xff] }
 0x49d   : > { %4615 = vmatmul.f32.gmra.mxu1 %v6913_v13  ;;  %v4391_v28 = vadd.f32 %v4390_v21, %v4278_v60  ;;  %v3082_v21 = vld [vmem:[#allocation3 + $0xd8] sm:$0xff]  ;;  %v4396_v58 = vpop.f32.mrf.mxu3 }
 0x49f   : > { %4327 = vmatmul.f32.gmra.mxu2 %v7101_v0  ;;  %v7104_v41 = vadd.f32 %v4503_v32, %v4391_v28  ;;  %v4509_v33 = vpop.f32.mrf.mxu0 }
 0x4a1   : > { %4452 = vmatmul.f32.gmra.mxu3 %v3082_v21 }
 0x4a2   : > { %v7108_v31 = vpop.f32.mrf.mxu1  ;;  %v4280_v37 = vpop.f32.mrf.mxu2  ;;  %4556 = vmatmul.f32.gmra.mxu0 %v6949_v57 }
 0x4a3   : > { %v4281_v13 = vadd.f32 %v4280_v37, %v4168_v16  ;;  %v3084_v16 = vld [vmem:[#allocation3 + $0xe8] sm:$0xff] }
 0x4a5   : > { %4618 = vmatmul.f32.gmra.mxu1 %v6926_v62  ;;  %v4394_v52 = vadd.f32 %v4393_v8, %v4281_v13  ;;  %v7123_v8 = vld [vmem:[#allocation3 + $0x2f8] sm:$0xff]  ;;  %v4399_v28 = vpop.f32.mrf.mxu3  ;;  %v7134_v13 = vld [vmem:[#allocation3 + $0x300] sm:$0xff] }
 0x4a7   : > { %4330 = vmatmul.f32.gmra.mxu2 %v7112_v36  ;;  %v7115_v32 = vadd.f32 %v4506_v18, %v4394_v52  ;;  %v4512_v18 = vpop.f32.mrf.mxu0 }
 0x4a9   : > { %4455 = vmatmul.f32.gmra.mxu3 %v3083_v59 }
 0x4aa   : > { %v7119_v47 = vpop.f32.mrf.mxu1  ;;  %v4283_v57 = vpop.f32.mrf.mxu2  ;;  %4559 = vmatmul.f32.gmra.mxu0 %v6962_v45 }
 0x4ab   : > { %v4284_v62 = vadd.f32 %v4283_v57, %v4171_v15  ;;  %v7145_v57 = vld [vmem:[#allocation3 + $0x308] sm:$0xff] }
 0x4ad   : > { %4621 = vmatmul.f32.gmra.mxu1 %v6939_v30  ;;  %v4397_v60 = vadd.f32 %v4396_v58, %v4284_v62  ;;  %v4402_v58 = vpop.f32.mrf.mxu3 }
 0x4af   : > { %4333 = vmatmul.f32.gmra.mxu2 %v7123_v8  ;;  %v7126_v23 = vadd.f32 %v4509_v33, %v4397_v60  ;;  %v3085_v33 = vld [vmem:[#allocation3 + $0xf0] sm:$0xff] }
 0x4b1   : > { %4458 = vmatmul.f32.gmra.mxu3 %v3084_v16  ;;  %v7172_v16 = vld [vmem:[#allocation3 + $0x320] sm:$0xff] }
 0x4b2   : > { %v7130_v6 = vpop.f32.mrf.mxu1  ;;  %v4286_v45 = vpop.f32.mrf.mxu2  ;;  %4562 = vmatmul.f32.gmra.mxu0 %v6975_v42 }
 0x4b3   : > { %v4287_v30 = vadd.f32 %v4286_v45, %v4174_v11 }
 0x4b5   : > { %4624 = vmatmul.f32.gmra.mxu1 %v6952_v9  ;;  %v4400_v37 = vadd.f32 %v4399_v28, %v4287_v30  ;;  %v4515_v9 = vpop.f32.mrf.mxu0  ;;  %v4405_v60 = vpop.f32.mrf.mxu3  ;;  %v3088_v30 = vld [vmem:[#allocation3 + $0x108] sm:$0xff] }
 0x4b7   : > { %4336 = vmatmul.f32.gmra.mxu2 %v7134_v13  ;;  %v7137_v21 = vadd.f32 %v4512_v18, %v4400_v37  ;;  %v7156_v18 = vld [vmem:[#allocation3 + $0x310] sm:$0xff]  ;;  %v7179_v37 = vld [vmem:[#allocation3 + $0x328] sm:$0xff] }
 0x4b9   : > { %4461 = vmatmul.f32.gmra.mxu3 %v3085_v33 }
 0x4ba   : > { %v7141_v39 = vpop.f32.mrf.mxu1  ;;  %v4289_v52 = vpop.f32.mrf.mxu2  ;;  %4565 = vmatmul.f32.gmra.mxu0 %v6988_v40 }
 0x4bb   : > { %v4290_v42 = vadd.f32 %v4289_v52, %v4177_v1  ;;  %v7189_v1 = vld [vmem:[#allocation3 + $0x330] sm:$0xff] }
 0x4bd   : > { %4627 = vmatmul.f32.gmra.mxu1 %v6965_v19  ;;  %v4403_v15 = vadd.f32 %v4402_v58, %v4290_v42  ;;  %v3086_v19 = vld [vmem:[#allocation3 + $0xf8] sm:$0xff]  ;;  %v4518_v11 = vpop.f32.mrf.mxu0 }
 0x4be   : > { %v5048_v42 = vld [vmem:[#allocation2 + $0x11] sm:$0xff] }
 0x4bf   : > { %4339 = vmatmul.f32.gmra.mxu2 %v7145_v57  ;;  %v7148_v62 = vadd.f32 %v4515_v9, %v4403_v15 }
 0x4c1   : > { %4464 = vmatmul.f32.gmra.mxu3 %v3086_v19 }
 0x4c2   : > { %v7152_v55 = vpop.f32.mrf.mxu1  ;;  %v4292_v59 = vpop.f32.mrf.mxu2  ;;  %4568 = vmatmul.f32.gmra.mxu0 %v7001_v34  ;;  %v7165_v34 = vld [vmem:[#allocation3 + $0x318] sm:$0xff] }
 0x4c3   : > { %v4293_v40 = vadd.f32 %v4292_v59, %v4180_v27 }
 0x4c5   : > { %4630 = vmatmul.f32.gmra.mxu1 %v6978_v20  ;;  %v4406_v28 = vadd.f32 %v4405_v60, %v4293_v40  ;;  %v7225_v60 = vpop.f32.mrf.mxu0 }
 0x4c7   : > { %4342 = vmatmul.f32.gmra.mxu2 %v7156_v18  ;;  %v7159_v45 = vadd.f32 %v4518_v11, %v4406_v28  ;;  %v5050_v11 = vld [vmem:[#allocation2 + $0x21] sm:$0xff] }
 0x4c9   : > { %4467 = vmatmul.f32.gmra.mxu3 %v3087_v53 }
 0x4ca   : > { %v7161_v22 = vpop.f32.mrf.mxu1  ;;  %4571 = vmatmul.f32.gmra.mxu0 %v7014_v48  ;;  %v4295_v15 = vpop.f32.mrf.mxu2 }
 0x4cd   : > { %4633 = vmatmul.f32.gmra.mxu1 %v6991_v12  ;;  %v3089_v12 = vld [vmem:[#allocation3 + $0x110] sm:$0xff] }
 0x4cf   : > { %4345 = vmatmul.f32.gmra.mxu2 %v7165_v34 }
 0x4d1   : > { %4470 = vmatmul.f32.gmra.mxu3 %v3088_v30 }
 0x4d2   : > { %v7168_v20 = vpop.f32.mrf.mxu1  ;;  %4574 = vmatmul.f32.gmra.mxu0 %v7029_v63 }
 0x4d5   : > { %4636 = vmatmul.f32.gmra.mxu1 %v7004_v46  ;;  %v7186_v46 = vld [vmem:[#allocation2 + $0x8] sm:$0xff] }
 0x4d7   : > { %4348 = vmatmul.f32.gmra.mxu2 %v7172_v16 }
 0x4d9   : > { %4473 = vmatmul.f32.gmra.mxu3 %v3089_v12 }
 0x4da   : > { %v7175_v48 = vpop.f32.mrf.mxu1  ;;  %4577 = vmatmul.f32.gmra.mxu0 %v7041_v50  ;;  %v7196_v50 = vld [vmem:[#allocation3 + $0x338] sm:$0xff] }
 0x4dd   : > { %4639 = vmatmul.f32.gmra.mxu1 %v7017_v10 }
 0x4df   : > { %4351 = vmatmul.f32.gmra.mxu2 %v7179_v37 }
 0x4e1   : > { %4476 = vmatmul.f32.gmra.mxu3 %v7186_v46 }
 0x4e2   : > { %v7182_v63 = vpop.f32.mrf.mxu1  ;;  %4580 = vmatmul.f32.gmra.mxu0 %v7053_v29 }
 0x4e5   : > { %4642 = vmatmul.f32.gmra.mxu1 %v7032_v5  ;;  %v7203_v5 = vld [vmem:[#allocation3 + $0x340] sm:$0xff] }
 0x4e7   : > { %4354 = vmatmul.f32.gmra.mxu2 %v7189_v1 }
 0x4ea   : > { %v7192_v10 = vpop.f32.mrf.mxu1  ;;  %4583 = vmatmul.f32.gmra.mxu0 %v7065_v43 }
 0x4ed   : > { %4645 = vmatmul.f32.gmra.mxu1 %v7044_v35  ;;  %v7210_v35 = vld [vmem:[#allocation3 + $0x348] sm:$0xff] }
 0x4ef   : > { %4357 = vmatmul.f32.gmra.mxu2 %v7196_v50 }
 0x4f2   : > { %v7199_v29 = vpop.f32.mrf.mxu1  ;;  %4586 = vmatmul.f32.gmra.mxu0 %v7186_v46 }
 0x4f5   : > { %4648 = vmatmul.f32.gmra.mxu1 %v7056_v56 }
 0x4f7   : > { %4360 = vmatmul.f32.gmra.mxu2 %v7203_v5 }
 0x4fa   : > { %v7206_v52 = vpop.f32.mrf.mxu1  ;;  %4589 = vmatmul.f32.gmra.mxu0 %v7186_v46 }
 0x4fd   : > { %4651 = vmatmul.f32.gmra.mxu1 %v7068_v44 }
 0x4ff   : > { %4363 = vmatmul.f32.gmra.mxu2 %v7210_v35 }
 0x502   : > { %v7213_v43 = vpop.f32.mrf.mxu1 }
 0x505   : > { %4654 = vmatmul.f32.gmra.mxu1 %v7079_v61  ;;  %v5049_v61 = vld [vmem:[#allocation2 + $0x138] sm:$0xff] }
 0x50a   : > { %v4610_v56 = vpop.f32.mrf.mxu1 }
 0x50b   : > { %v4611_v58 = vadd.f32 %v4610_v56, %v7082_v14  ;;  %v4408_v14 = vpop.f32.mrf.mxu3  ;;  %v7231_v56 = vpop.f32.mrf.mxu0 }
 0x50d   : > { %v4706_v9 = vadd.f32 %v5048_v42, %v4611_v58  ;;  %4657 = vmatmul.f32.gmra.mxu1 %v7090_v4  ;;  %v4298_v4 = vpop.f32.mrf.mxu2  ;;  %v5051_v42 = vld [vmem:[#allocation2 + $0x148] sm:$0xff] }
 0x50f   : > { %v4738_v33 = vmax.f32 %v4706_v9, 0.0 }
 0x511   : > { %4770 = vst [vmem:[%s7220_s30] sm:$0xff] %v4738_v33 }
 0x512   : > { %v4613_v44 = vpop.f32.mrf.mxu1 }
 0x513   : > { %v4614_v27 = vadd.f32 %v4613_v44, %v7093_v7  ;;  %v4411_v30 = vpop.f32.mrf.mxu3 }
 0x515   : > { %v4707_v59 = vadd.f32 %v5049_v61, %v4614_v27  ;;  %4660 = vmatmul.f32.gmra.mxu1 %v7101_v0  ;;  %v4301_v58 = vpop.f32.mrf.mxu2  ;;  %v7237_v27 = vpop.f32.mrf.mxu0  ;;  %v5052_v61 = vld [vmem:[#allocation2 + $0x31] sm:$0xff] }
 0x517   : > { %v4739_v40 = vmax.f32 %v4707_v59, 0.0 }
 0x519   : > { %4771 = vst [vmem:[%s7220_s30 + $0x8] sm:$0xff] %v4739_v40 }
 0x51a   : > { %v4616_v19 = vpop.f32.mrf.mxu1 }
 0x51b   : > { %v4617_v28 = vadd.f32 %v4616_v19, %v7104_v41  ;;  %v4414_v41 = vpop.f32.mrf.mxu3 }
 0x51d   : > { %v4708_v53 = vadd.f32 %v5050_v11, %v4617_v28  ;;  %4663 = vmatmul.f32.gmra.mxu1 %v7112_v36  ;;  %v5053_v11 = vld [vmem:[#allocation2 + $0x158] sm:$0xff] }
 0x51f   : > { %v4740_v7 = vmax.f32 %v4708_v53, 0.0 }
 0x521   : > { %4772 = vst [vmem:[%s7220_s30 + $0x10] sm:$0xff] %v4740_v7 }
 0x522   : > { %v4619_v12 = vpop.f32.mrf.mxu1 }
 0x523   : > { %v4620_v0 = vadd.f32 %v4619_v12, %v7115_v32  ;;  %v4304_v32 = vpop.f32.mrf.mxu2 }
 0x525   : > { %v4709_v9 = vadd.f32 %v5051_v42, %v4620_v0  ;;  %4666 = vmatmul.f32.gmra.mxu1 %v7123_v8  ;;  %v4417_v8 = vpop.f32.mrf.mxu3  ;;  %v5054_v42 = vld [vmem:[#allocation2 + $0x41] sm:$0xff] }
 0x527   : > { %v4741_v33 = vmax.f32 %v4709_v9, 0.0 }
 0x529   : > { %4773 = vst [vmem:[%s7220_s30 + $0x18] sm:$0xff] %v4741_v33  ;;  %v4183_v33 = vadd.f32 %v6972_v38, %v6774_v17 }
 0x52a   : > { %v4622_v44 = vpop.f32.mrf.mxu1 }
 0x52b   : > { %v4623_v36 = vadd.f32 %v4622_v44, %v7126_v23  ;;  %v7243_v23 = vpop.f32.mrf.mxu0  ;;  %v7245_v12 = vpop.f32.mrf.mxu2 }
 0x52d   : > { %v4710_v59 = vadd.f32 %v5052_v61, %v4623_v36  ;;  %4669 = vmatmul.f32.gmra.mxu1 %v7134_v13 }
 0x52f   : > { %v4742_v40 = vmax.f32 %v4710_v59, 0.0 }
 0x531   : > { %4774 = vst [vmem:[%s7220_s30 + $0x20] sm:$0xff] %v4742_v40 }
 0x532   : > { %v4625_v19 = vpop.f32.mrf.mxu1 }
 0x533   : > { %v4626_v28 = vadd.f32 %v4625_v19, %v7137_v21  ;;  %v4420_v21 = vpop.f32.mrf.mxu3  ;;  %v7252_v36 = vpop.f32.mrf.mxu0  ;;  %v5055_v19 = vld [vmem:[#allocation2 + $0x168] sm:$0xff] }
 0x534   : > { %v7255_v61 = vpop.f32.mrf.mxu2 }
 0x535   : > { %v4711_v53 = vadd.f32 %v5053_v11, %v4626_v28  ;;  %4672 = vmatmul.f32.gmra.mxu1 %v7145_v57  ;;  %v4296_v57 = vadd.f32 %v4295_v15, %v4183_v33  ;;  %v7483_v11 = vld [vmem:[#allocation20_spill] sm:$0xff] }
 0x537   : > { %v4743_v7 = vmax.f32 %v4711_v53, 0.0 }
 0x539   : > { %4775 = vst [vmem:[%s7220_s30 + $0x28] sm:$0xff] %v4743_v7 }
 0x53a   : > { %v4628_v0 = vpop.f32.mrf.mxu1 }
 0x53b   : > { %v4629_v13 = vadd.f32 %v4628_v0, %v7148_v62  ;;  %v4409_v62 = vadd.f32 %v4408_v14, %v4296_v57  ;;  %v4423_v38 = vpop.f32.mrf.mxu3 }
 0x53d   : > { %v4712_v9 = vadd.f32 %v5054_v42, %v4629_v13  ;;  %4675 = vmatmul.f32.gmra.mxu1 %v7156_v18  ;;  %v7482_v18 = vld [vmem:[#allocation23_spill] sm:$0xff]  ;;  %v4522_v7 = vadd.f32 %v7225_v60, %v4409_v62  ;;  %v7263_v13 = vpop.f32.mrf.mxu0 }
 0x53e   : > { %v4186_v53 = vadd.f32 %v7483_v11, %v7482_v18  ;;  %v5057_v18 = vld [vmem:[#allocation2 + $0x178] sm:$0xff] }
 0x53f   : > { %v4744_v44 = vmax.f32 %v4712_v9, 0.0  ;;  %v5056_v9 = vld [vmem:[#allocation2 + $0x51] sm:$0xff] }
 0x540   : > { %v4299_v15 = vadd.f32 %v4298_v4, %v4186_v53  ;;  %v7486_v53 = vld [vmem:[#allocation34_spill] sm:$0xff] }
 0x541   : > { %4776 = vst [vmem:[%s7220_s30 + $0x30] sm:$0xff] %v4744_v44 }
 0x542   : > { %v4631_v59 = vpop.f32.mrf.mxu1  ;;  %v4412_v14 = vadd.f32 %v4411_v30, %v4299_v15 }
 0x543   : > { %v4632_v40 = vadd.f32 %v4631_v59, %v7159_v45  ;;  %v4313_v45 = vpop.f32.mrf.mxu2  ;;  %v4426_v60 = vpop.f32.mrf.mxu3 }
 0x544   : > { %v4525_v4 = vadd.f32 %v7231_v56, %v4412_v14 }
 0x545   : > { %v4713_v28 = vadd.f32 %v5055_v19, %v4632_v40  ;;  %4678 = vmatmul.f32.gmra.mxu1 %v7165_v34  ;;  %v7484_v34 = vld [vmem:[#allocation26_spill] sm:$0xff] }
 0x546   : > { %v4189_v44 = vadd.f32 %v6998_v25, %v7484_v34 }
 0x547   : > { %v4745_v17 = vmax.f32 %v4713_v28, 0.0  ;;  %v4539_v28 = vpop.f32.mrf.mxu0 }
 0x548   : > { %v4302_v59 = vadd.f32 %v4301_v58, %v4189_v44 }
 0x549   : > { %4777 = vst [vmem:[%s7220_s30 + $0x38] sm:$0xff] %v4745_v17 }
 0x54a   : > { %v4634_v0 = vpop.f32.mrf.mxu1  ;;  %v4415_v19 = vadd.f32 %v4414_v41, %v4302_v59  ;;  %v5058_v41 = vld [vmem:[#allocation2 + $0x61] sm:$0xff] }
 0x54b   : > { %v4635_v42 = vadd.f32 %v4634_v0, %v4522_v7  ;;  %v4316_v11 = vpop.f32.mrf.mxu2  ;;  %v4429_v0 = vpop.f32.mrf.mxu3 }
 0x54c   : > { %v4528_v58 = vadd.f32 %v7237_v27, %v4415_v19  ;;  %v7489_v19 = vld [vmem:[#allocation27_spill] sm:$0xff] }
 0x54d   : > { %v4714_v33 = vadd.f32 %v5056_v9, %v4635_v42  ;;  %4681 = vmatmul.f32.gmra.mxu1 %v7172_v16  ;;  %v7485_v16 = vld [vmem:[#allocation15_spill] sm:$0xff]  ;;  %v7487_v9 = vld [vmem:[#allocation24_spill] sm:$0xff] }
 0x54e   : > { %v4192_v17 = vadd.f32 %v7486_v53, %v7485_v16 }
 0x54f   : > { %v4746_v57 = vmax.f32 %v4714_v33, 0.0  ;;  %v4542_v34 = vpop.f32.mrf.mxu0 }
 0x550   : > { %v4305_v15 = vadd.f32 %v4304_v32, %v4192_v17 }
 0x551   : > { %4778 = vst [vmem:[%s7220_s30 + $0x40] sm:$0xff] %v4746_v57 }
 0x552   : > { %v4637_v40 = vpop.f32.mrf.mxu1  ;;  %v4418_v42 = vadd.f32 %v4417_v8, %v4305_v15  ;;  %v5059_v8 = vld [vmem:[#allocation2 + $0x188] sm:$0xff] }
 0x553   : > { %v4638_v62 = vadd.f32 %v4637_v40, %v4525_v4  ;;  %v4319_v57 = vpop.f32.mrf.mxu2 }
 0x554   : > { %v4531_v27 = vadd.f32 %v7243_v23, %v4418_v42 }
 0x555   : > { %v4715_v30 = vadd.f32 %v5057_v18, %v4638_v62  ;;  %4684 = vmatmul.f32.gmra.mxu1 %v7179_v37  ;;  %v7488_v37 = vld [vmem:[#allocation36_spill] sm:$0xff]  ;;  %v7490_v18 = vld [vmem:[#allocation38_spill] sm:$0xff] }
 0x556   : > { %v4195_v33 = vadd.f32 %v7488_v37, %v7487_v9 }
 0x557   : > { %v4747_v25 = vmax.f32 %v4715_v30, 0.0  ;;  %v4198_v30 = vadd.f32 %v7490_v18, %v7489_v19  ;;  %v4545_v17 = vpop.f32.mrf.mxu0  ;;  %v5062_v19 = vld [vmem:[#allocation2 + $0x81] sm:$0xff] }
 0x558   : > { %v4308_v32 = vadd.f32 %v7245_v12, %v4195_v33 }
 0x559   : > { %4779 = vst [vmem:[%s7220_s30 + $0x48] sm:$0xff] %v4747_v25  ;;  %v4311_v53 = vadd.f32 %v7255_v61, %v4198_v30  ;;  %v7493_v30 = vld [vmem:[#allocation29_spill] sm:$0xff] }
 0x55a   : > { %v4640_v56 = vpop.f32.mrf.mxu1  ;;  %v4421_v40 = vadd.f32 %v4420_v21, %v4308_v32 }
 0x55b   : > { %v4641_v7 = vadd.f32 %v4640_v56, %v4528_v58  ;;  %v4322_v23 = vpop.f32.mrf.mxu2  ;;  %v4424_v21 = vadd.f32 %v4423_v38, %v4311_v53  ;;  %v5060_v58 = vld [vmem:[#allocation2 + $0x71] sm:$0xff] }
 0x55c   : > { %v4534_v12 = vadd.f32 %v7252_v36, %v4421_v40  ;;  %v5061_v38 = vld [vmem:[#allocation2 + $0x198] sm:$0xff] }
 0x55d   : > { %v4716_v14 = vadd.f32 %v5058_v41, %v4641_v7  ;;  %4687 = vmatmul.f32.gmra.mxu1 %v7189_v1  ;;  %v4432_v1 = vpop.f32.mrf.mxu3  ;;  %v4537_v61 = vadd.f32 %v7263_v13, %v4424_v21 }
 0x55f   : > { %v4748_v44 = vmax.f32 %v4716_v14, 0.0  ;;  %v4548_v36 = vpop.f32.mrf.mxu0 }
 0x561   : > { %4780 = vst [vmem:[%s7220_s30 + $0x50] sm:$0xff] %v4748_v44 }
 0x562   : > { %v4643_v59 = vpop.f32.mrf.mxu1 }
 0x563   : > { %v4644_v4 = vadd.f32 %v4643_v59, %v4531_v27  ;;  %v4325_v33 = vpop.f32.mrf.mxu2 }
 0x565   : > { %v4717_v62 = vadd.f32 %v5059_v8, %v4644_v4  ;;  %4690 = vmatmul.f32.gmra.mxu1 %v7196_v50  ;;  %v7491_v50 = vld [vmem:[#allocation16_spill] sm:$0xff]  ;;  %v4435_v41 = vpop.f32.mrf.mxu3 }
 0x566   : > { %v4201_v7 = vadd.f32 %v7050_v49, %v7491_v50 }
 0x567   : > { %v4749_v16 = vmax.f32 %v4717_v62, 0.0  ;;  %v4551_v62 = vpop.f32.mrf.mxu0 }
 0x568   : > { %v4314_v14 = vadd.f32 %v4313_v45, %v4201_v7 }
 0x569   : > { %4781 = vst [vmem:[%s7220_s30 + $0x58] sm:$0xff] %v4749_v16 }
 0x56a   : > { %v4646_v25 = vpop.f32.mrf.mxu1  ;;  %v4427_v44 = vadd.f32 %v4426_v60, %v4314_v14 }
 0x56b   : > { %v4647_v15 = vadd.f32 %v4646_v25, %v4534_v12  ;;  %v4328_v60 = vpop.f32.mrf.mxu2 }
 0x56c   : > { %v4540_v45 = vadd.f32 %v4539_v28, %v4427_v44  ;;  %v3220_v28 = vld [vmem:[#allocation3 + $0x358] sm:$0xff] }
 0x56d   : > { %v4718_v56 = vadd.f32 %v5060_v58, %v4647_v15  ;;  %4693 = vmatmul.f32.gmra.mxu1 %v7203_v5  ;;  %v7492_v5 = vld [vmem:[#allocation25_spill] sm:$0xff]  ;;  %v4438_v4 = vpop.f32.mrf.mxu3 }
 0x56e   : > { %v4204_v27 = vadd.f32 %v7062_v3, %v7492_v5  ;;  %v7494_v58 = vld [vmem:[#allocation17_spill] sm:$0xff] }
 0x56f   : > { %v4750_v42 = vmax.f32 %v4718_v56, 0.0  ;;  %v4554_v56 = vpop.f32.mrf.mxu0 }
 0x570   : > { %v4317_v59 = vadd.f32 %v4316_v11, %v4204_v27 }
 0x571   : > { %4782 = vst [vmem:[%s7220_s30 + $0x60] sm:$0xff] %v4750_v42 }
 0x572   : > { %v4649_v9 = vpop.f32.mrf.mxu1  ;;  %v4430_v8 = vadd.f32 %v4429_v0, %v4317_v59  ;;  %v5063_v0 = vld [vmem:[#allocation2 + $0x1a8] sm:$0xff] }
 0x573   : > { %v4650_v37 = vadd.f32 %v4649_v9, %v4537_v61  ;;  %v5064_v61 = vld [vmem:[#allocation2 + $0x91] sm:$0xff] }
 0x574   : > { %v4543_v11 = vadd.f32 %v4542_v34, %v4430_v8 }
 0x575   : > { %v4719_v32 = vadd.f32 %v5061_v38, %v4650_v37  ;;  %4696 = vmatmul.f32.gmra.mxu1 %v7210_v35  ;;  %v4207_v35 = vadd.f32 %v7075_v54, %v7493_v30  ;;  %v4441_v25 = vpop.f32.mrf.mxu3  ;;  %v4331_v54 = vpop.f32.mrf.mxu2 }
 0x577   : > { %v4751_v49 = vmax.f32 %v4719_v32, 0.0  ;;  %v4320_v3 = vadd.f32 %v4319_v57, %v4207_v35 }
 0x579   : > { %4783 = vst [vmem:[%s7220_s30 + $0x68] sm:$0xff] %v4751_v49  ;;  %v4433_v15 = vadd.f32 %v4432_v1, %v4320_v3  ;;  %v7495_v1 = vld [vmem:[#allocation28_spill] sm:$0xff] }
 0x57a   : > { %v4652_v40 = vpop.f32.mrf.mxu1  ;;  %v4213_v44 = vadd.f32 %v7097_v2, %v7495_v1 }
 0x57b   : > { %v4653_v13 = vadd.f32 %v4652_v40, %v4540_v45  ;;  %v4546_v57 = vadd.f32 %v4545_v17, %v4433_v15  ;;  %v5065_v17 = vld [vmem:[#allocation2 + $0x1b8] sm:$0xff]  ;;  %v7496_v40 = vld [vmem:[#allocation31_spill] sm:$0xff] }
 0x57c   : > { %v4326_v32 = vadd.f32 %v4325_v33, %v4213_v44 }
 0x57d   : > { %v4720_v18 = vadd.f32 %v5062_v19, %v4653_v13  ;;  %4699 = vmatmul.f32.gmra.mxu1 %v7186_v46  ;;  %v4210_v46 = vadd.f32 %v7086_v26, %v7494_v58  ;;  %v4444_v37 = vpop.f32.mrf.mxu3  ;;  %v4557_v26 = vpop.f32.mrf.mxu0 }
 0x57e   : > { %v4334_v27 = vpop.f32.mrf.mxu2  ;;  %v4439_v59 = vadd.f32 %v4438_v4, %v4326_v32 }
 0x57f   : > { %v4752_v16 = vmax.f32 %v4720_v18, 0.0  ;;  %v4323_v7 = vadd.f32 %v4322_v23, %v4210_v46 }
 0x580   : > { %v4552_v2 = vadd.f32 %v4551_v62, %v4439_v59 }
 0x581   : > { %4784 = vst [vmem:[%s7220_s30 + $0x70] sm:$0xff] %v4752_v16  ;;  %v4436_v14 = vadd.f32 %v4435_v41, %v4323_v7  ;;  %v4216_v41 = vadd.f32 %v7108_v31, %v7496_v40  ;;  %v5066_v16 = vld [vmem:[#allocation2 + $0xa1] sm:$0xff] }
 0x582   : > { %v4655_v53 = vpop.f32.mrf.mxu1 }
 0x583   : > { %v4656_v12 = vadd.f32 %v4655_v53, %v4543_v11  ;;  %v4549_v5 = vadd.f32 %v4548_v36, %v4436_v14  ;;  %v4329_v19 = vadd.f32 %v4328_v60, %v4216_v41  ;;  %v7497_v11 = vld [vmem:[#allocation18_spill] sm:$0xff] }
 0x584   : > { %v4219_v4 = vadd.f32 %v7119_v47, %v7497_v11  ;;  %v5068_v14 = vld [vmem:[#allocation2 + $0xb1] sm:$0xff] }
 0x585   : > { %v4721_v21 = vadd.f32 %v5063_v0, %v4656_v12  ;;  %4702 = vmatmul.f32.gmra.mxu1 %v3220_v28  ;;  %v4447_v8 = vpop.f32.mrf.mxu3  ;;  %v4560_v33 = vpop.f32.mrf.mxu0  ;;  %v4442_v36 = vadd.f32 %v4441_v25, %v4329_v19 }
 0x586   : > { %v4337_v35 = vpop.f32.mrf.mxu2  ;;  %v4332_v28 = vadd.f32 %v4331_v54, %v4219_v4 }
 0x587   : > { %v4753_v50 = vmax.f32 %v4721_v21, 0.0  ;;  %v4555_v31 = vadd.f32 %v4554_v56, %v4442_v36  ;;  %v5067_v21 = vld [vmem:[#allocation2 + $0x1c8] sm:$0xff] }
 0x588   : > { %v4445_v0 = vadd.f32 %v4444_v37, %v4332_v28 }
 0x589   : > { %4785 = vst [vmem:[%s7220_s30 + $0x78] sm:$0xff] %v4753_v50  ;;  %v7498_v50 = vld [vmem:[#allocation30_spill] sm:$0xff] }
 0x58a   : > { %v4658_v42 = vpop.f32.mrf.mxu1  ;;  %v4222_v25 = vadd.f32 %v7130_v6, %v7498_v50  ;;  %v4558_v47 = vadd.f32 %v4557_v26, %v4445_v0  ;;  %v5069_v26 = vld [vmem:[#allocation2 + $0x1d8] sm:$0xff]  ;;  %v7502_v0 = vld [vmem:[#allocation21_spill] sm:$0xff] }
 0x58b   : > { %v4659_v34 = vadd.f32 %v4658_v42, %v4546_v57 }
 0x58c   : > { %v4335_v57 = vadd.f32 %v4334_v27, %v4222_v25 }
 0x58d   : > { %v4722_v9 = vadd.f32 %v5064_v61, %v4659_v34  ;;  %v4450_v12 = vpop.f32.mrf.mxu3  ;;  %v4563_v62 = vpop.f32.mrf.mxu0 }
 0x58e   : > { %v4340_v46 = vpop.f32.mrf.mxu2  ;;  %v4448_v56 = vadd.f32 %v4447_v8, %v4335_v57 }
 0x58f   : > { %v4754_v38 = vmax.f32 %v4722_v9, 0.0  ;;  %v7499_v9 = vld [vmem:[#allocation33_spill] sm:$0xff] }
 0x590   : > { %v4225_v37 = vadd.f32 %v7141_v39, %v7499_v9  ;;  %v4561_v6 = vadd.f32 %v4560_v33, %v4448_v56  ;;  %v5070_v33 = vld [vmem:[#allocation2 + $0xc1] sm:$0xff] }
 0x591   : > { %4786 = vst [vmem:[%s7220_s30 + $0x80] sm:$0xff] %v4754_v38 }
 0x592   : > { %v4661_v49 = vpop.f32.mrf.mxu1  ;;  %v4338_v32 = vadd.f32 %v4337_v35, %v4225_v37  ;;  %v7501_v35 = vld [vmem:[#allocation32_spill] sm:$0xff] }
 0x593   : > { %v4662_v23 = vadd.f32 %v4661_v49, %v4549_v5  ;;  %v4231_v36 = vadd.f32 %v7161_v22, %v7501_v35 }
 0x594   : > { %v4451_v49 = vadd.f32 %v4450_v12, %v4338_v32 }
 0x595   : > { %v4723_v45 = vadd.f32 %v5065_v17, %v4662_v23  ;;  %v4453_v34 = vpop.f32.mrf.mxu3  ;;  %v4566_v1 = vpop.f32.mrf.mxu0  ;;  %v7500_v17 = vld [vmem:[#allocation19_spill] sm:$0xff] }
 0x596   : > { %v4343_v38 = vpop.f32.mrf.mxu2 }
 0x597   : > { %v4755_v13 = vmax.f32 %v4723_v45, 0.0  ;;  %v4228_v45 = vadd.f32 %v7152_v55, %v7500_v17  ;;  %v4344_v11 = vadd.f32 %v4343_v38, %v4231_v36  ;;  %v5073_v38 = vld [vmem:[#allocation2 + $0x1f8] sm:$0xff] }
 0x599   : > { %4787 = vst [vmem:[%s7220_s30 + $0x88] sm:$0xff] %v4755_v13  ;;  %v4341_v41 = vadd.f32 %v4340_v46, %v4228_v45  ;;  %v4564_v13 = vadd.f32 %v4563_v62, %v4451_v49  ;;  %v4234_v62 = vadd.f32 %v7168_v20, %v7502_v0 }
 0x59a   : > { %v4664_v18 = vpop.f32.mrf.mxu1 }
 0x59b   : > { %v4665_v30 = vadd.f32 %v4664_v18, %v4552_v2  ;;  %v4454_v18 = vadd.f32 %v4453_v34, %v4341_v41  ;;  %v7503_v34 = vld [vmem:[#allocation22_spill] sm:$0xff] }
 0x59c   : > { %v4237_v56 = vadd.f32 %v7175_v48, %v7503_v34 }
 0x59d   : > { %v4724_v3 = vadd.f32 %v5066_v16, %v4665_v30  ;;  %v4456_v59 = vpop.f32.mrf.mxu3  ;;  %v4569_v39 = vpop.f32.mrf.mxu0  ;;  %v4567_v55 = vadd.f32 %v4566_v1, %v4454_v18 }
 0x59e   : > { %v4346_v8 = vpop.f32.mrf.mxu2  ;;  %v4457_v12 = vadd.f32 %v4456_v59, %v4344_v11  ;;  %v7506_v11 = vld [vmem:[#allocation39_spill] sm:$0xff] }
 0x59f   : > { %v4756_v53 = vmax.f32 %v4724_v3, 0.0 }
 0x5a0   : > { %v4570_v22 = vadd.f32 %v4569_v39, %v4457_v12 }
 0x5a1   : > { %4788 = vst [vmem:[%s7220_s30 + $0x90] sm:$0xff] %v4756_v53 }
 0x5a2   : > { %v4667_v15 = vpop.f32.mrf.mxu1 }
 0x5a3   : > { %v4668_v60 = vadd.f32 %v4667_v15, %v4555_v31  ;;  %v5071_v15 = vld [vmem:[#allocation2 + $0x1e8] sm:$0xff] }
 0x5a5   : > { %v4725_v58 = vadd.f32 %v5067_v21, %v4668_v60  ;;  %v4459_v3 = vpop.f32.mrf.mxu3  ;;  %v4572_v53 = vpop.f32.mrf.mxu0 }
 0x5a6   : > { %v4349_v31 = vpop.f32.mrf.mxu2 }
 0x5a7   : > { %v4757_v7 = vmax.f32 %v4725_v58, 0.0  ;;  %v4347_v58 = vadd.f32 %v4346_v8, %v4234_v62  ;;  %v5076_v62 = vld [vmem:[#allocation2 + $0xf1] sm:$0xff] }
 0x5a9   : > { %4789 = vst [vmem:[%s7220_s30 + $0x98] sm:$0xff] %v4757_v7  ;;  %v4460_v7 = vadd.f32 %v4459_v3, %v4347_v58  ;;  %v4249_v58 = vadd.f32 %v7206_v52, %v7059_v24 }
 0x5aa   : > { %v4670_v42 = vpop.f32.mrf.mxu1 }
 0x5ab   : > { %v4671_v54 = vadd.f32 %v4670_v42, %v4558_v47  ;;  %v5072_v47 = vld [vmem:[#allocation2 + $0xd1] sm:$0xff]  ;;  %v4573_v20 = vadd.f32 %v4572_v53, %v4460_v7 }
 0x5ad   : > { %v4726_v61 = vadd.f32 %v5068_v14, %v4671_v54  ;;  %v4462_v46 = vpop.f32.mrf.mxu3  ;;  %v4575_v57 = vpop.f32.mrf.mxu0 }
 0x5ae   : > { %v4352_v54 = vpop.f32.mrf.mxu2 }
 0x5af   : > { %v4758_v44 = vmax.f32 %v4726_v61, 0.0  ;;  %v4350_v61 = vadd.f32 %v4349_v31, %v4237_v56  ;;  %v4252_v56 = vadd.f32 %v7213_v43, %v7071_v51 }
 0x5b1   : > { %4790 = vst [vmem:[%s7220_s30 + $0xa0] sm:$0xff] %v4758_v44  ;;  %v4463_v44 = vadd.f32 %v4462_v46, %v4350_v61 }
 0x5b2   : > { %v4673_v5 = vpop.f32.mrf.mxu1 }
 0x5b3   : > { %v4674_v27 = vadd.f32 %v4673_v5, %v4561_v6  ;;  %v7504_v6 = vld [vmem:[#allocation35_spill] sm:$0xff]  ;;  %v4576_v48 = vadd.f32 %v4575_v57, %v4463_v44 }
 0x5b4   : > { %v4240_v5 = vadd.f32 %v7182_v63, %v7504_v6 }
 0x5b5   : > { %v4727_v23 = vadd.f32 %v5069_v26, %v4674_v27  ;;  %v4465_v1 = vpop.f32.mrf.mxu3  ;;  %v4578_v27 = vpop.f32.mrf.mxu0 }
 0x5b6   : > { %v4355_v26 = vpop.f32.mrf.mxu2 }
 0x5b7   : > { %v4759_v40 = vmax.f32 %v4727_v23, 0.0  ;;  %v4353_v23 = vadd.f32 %v4352_v54, %v4240_v5  ;;  %v5079_v5 = vld [vmem:[#allocation2 + $0x228] sm:$0xff] }
 0x5b9   : > { %4791 = vst [vmem:[%s7220_s30 + $0xa8] sm:$0xff] %v4759_v40  ;;  %v4466_v45 = vadd.f32 %v4465_v1, %v4353_v23  ;;  %v5074_v40 = vld [vmem:[#allocation2 + $0xe1] sm:$0xff] }
 0x5ba   : > { %v4676_v19 = vpop.f32.mrf.mxu1  ;;  %v5078_v1 = vld [vmem:[#allocation2 + $0x101] sm:$0xff] }
 0x5bb   : > { %v4677_v2 = vadd.f32 %v4676_v19, %v4564_v13  ;;  %v7505_v13 = vld [vmem:[#allocation37_spill] sm:$0xff]  ;;  %v4579_v18 = vadd.f32 %v4578_v27, %v4466_v45 }
 0x5bc   : > { %v4243_v8 = vadd.f32 %v7192_v10, %v7505_v13 }
 0x5bd   : > { %v4728_v30 = vadd.f32 %v5070_v33, %v4677_v2  ;;  %v4468_v39 = vpop.f32.mrf.mxu3  ;;  %v4581_v2 = vpop.f32.mrf.mxu0 }
 0x5be   : > { %v4356_v63 = vadd.f32 %v4355_v26, %v4243_v8  ;;  %v4358_v33 = vpop.f32.mrf.mxu2 }
 0x5bf   : > { %v4760_v16 = vmax.f32 %v4728_v30, 0.0 }
 0x5c0   : > { %v4469_v36 = vadd.f32 %v4468_v39, %v4356_v63 }
 0x5c1   : > { %4792 = vst [vmem:[%s7220_s30 + $0xb0] sm:$0xff] %v4760_v16  ;;  %v5075_v16 = vld [vmem:[#allocation2 + $0x208] sm:$0xff] }
 0x5c2   : > { %v4679_v4 = vpop.f32.mrf.mxu1  ;;  %v4582_v10 = vadd.f32 %v4581_v2, %v4469_v36 }
 0x5c3   : > { %v4680_v28 = vadd.f32 %v4679_v4, %v4567_v55  ;;  %v4246_v55 = vadd.f32 %v7199_v29, %v7506_v11 }
 0x5c5   : > { %v4729_v60 = vadd.f32 %v5071_v15, %v4680_v28  ;;  %v4471_v53 = vpop.f32.mrf.mxu3  ;;  %v4359_v28 = vadd.f32 %v4358_v33, %v4246_v55  ;;  %v4584_v15 = vpop.f32.mrf.mxu0 }
 0x5c7   : > { %v4761_v21 = vmax.f32 %v4729_v60, 0.0  ;;  %v4361_v60 = vpop.f32.mrf.mxu2  ;;  %v4472_v0 = vadd.f32 %v4471_v53, %v4359_v28 }
 0x5c8   : > { %v4362_v29 = vadd.f32 %v4361_v60, %v4249_v58 }
 0x5c9   : > { %4793 = vst [vmem:[%s7220_s30 + $0xb8] sm:$0xff] %v4761_v21 }
 0x5ca   : > { %v4682_v50 = vpop.f32.mrf.mxu1 }
 0x5cb   : > { %v4683_v25 = vadd.f32 %v4682_v50, %v4570_v22  ;;  %v4585_v50 = vadd.f32 %v4584_v15, %v4472_v0 }
 0x5cd   : > { %v4730_v42 = vadd.f32 %v5072_v47, %v4683_v25  ;;  %v4474_v46 = vpop.f32.mrf.mxu3  ;;  %v4587_v57 = vpop.f32.mrf.mxu0 }
 0x5ce   : > { %v4475_v47 = vadd.f32 %v4474_v46, %v4362_v29 }
 0x5cf   : > { %v4762_v14 = vmax.f32 %v4730_v42, 0.0  ;;  %v5077_v42 = vld [vmem:[#allocation2 + $0x218] sm:$0xff]  ;;  %v4364_v34 = vpop.f32.mrf.mxu2 }
 0x5d0   : > { %v4588_v24 = vadd.f32 %v4587_v57, %v4475_v47  ;;  %v4365_v52 = vadd.f32 %v4364_v34, %v4252_v56 }
 0x5d1   : > { %4794 = vst [vmem:[%s7220_s30 + $0xc0] sm:$0xff] %v4762_v14 }
 0x5d2   : > { %v4685_v9 = vpop.f32.mrf.mxu1 }
 0x5d3   : > { %v4686_v37 = vadd.f32 %v4685_v9, %v4573_v20 }
 0x5d5   : > { %v4731_v32 = vadd.f32 %v5073_v38, %v4686_v37  ;;  %v4477_v61 = vpop.f32.mrf.mxu3  ;;  %v4590_v38 = vpop.f32.mrf.mxu0 }
 0x5d6   : > { %v4478_v37 = vadd.f32 %v4477_v61, %v4365_v52 }
 0x5d7   : > { %v4763_v49 = vmax.f32 %v4731_v32, 0.0 }
 0x5d8   : > { %v4591_v51 = vadd.f32 %v4590_v38, %v4478_v37 }
 0x5d9   : > { %4795 = vst [vmem:[%s7220_s30 + $0xc8] sm:$0xff] %v4763_v49 }
 0x5da   : > { %v4688_v59 = vpop.f32.mrf.mxu1 }
 0x5db   : > { %v4689_v17 = vadd.f32 %v4688_v59, %v4576_v48 }
 0x5dd   : > { %v4732_v41 = vadd.f32 %v5074_v40, %v4689_v17 }
 0x5df   : > { %v4764_v19 = vmax.f32 %v4732_v41, 0.0 }
 0x5e1   : > { %4796 = vst [vmem:[%s7220_s30 + $0xd0] sm:$0xff] %v4764_v19 }
 0x5e2   : > { %v4691_v30 = vpop.f32.mrf.mxu1 }
 0x5e3   : > { %v4692_v35 = vadd.f32 %v4691_v30, %v4579_v18 }
 0x5e5   : > { %v4733_v3 = vadd.f32 %v5075_v16, %v4692_v35 }
 0x5e7   : > { %v4765_v4 = vmax.f32 %v4733_v3, 0.0 }
 0x5e9   : > { %4797 = vst [vmem:[%s7220_s30 + $0xd8] sm:$0xff] %v4765_v4 }
 0x5ea   : > { %v4694_v31 = vpop.f32.mrf.mxu1 }
 0x5eb   : > { %v4695_v12 = vadd.f32 %v4694_v31, %v4582_v10 }
 0x5ed   : > { %v4734_v21 = vadd.f32 %v5076_v62, %v4695_v12 }
 0x5ef   : > { %v4766_v22 = vmax.f32 %v4734_v21, 0.0 }
 0x5f1   : > { %4798 = vst [vmem:[%s7220_s30 + $0xe0] sm:$0xff] %v4766_v22 }
 0x5f2   : > { %v4697_v25 = vpop.f32.mrf.mxu1 }
 0x5f3   : > { %v4698_v7 = vadd.f32 %v4697_v25, %v4585_v50 }
 0x5f5   : > { %v4735_v54 = vadd.f32 %v5077_v42, %v4698_v7 }
 0x5f7   : > { %v4767_v14 = vmax.f32 %v4735_v54, 0.0 }
 0x5f9   : > { %4799 = vst [vmem:[%s7220_s30 + $0xe8] sm:$0xff] %v4767_v14 }
 0x5fa   : > { %v4700_v20 = vpop.f32.mrf.mxu1 }
 0x5fb   : > { %v4701_v9 = vadd.f32 %v4700_v20, %v4588_v24 }
 0x5fd   : > { %v4736_v44 = vadd.f32 %v5078_v1, %v4701_v9 }
 0x5ff   : > { %v4768_v32 = vmax.f32 %v4736_v44, 0.0 }
 0x601   : > { %4800 = vst [vmem:[%s7220_s30 + $0xf0] sm:$0xff] %v4768_v32 }
 0x602   : > { %v4703_v43 = vpop.f32.mrf.mxu1 }
 0x603   : > { %v4704_v6 = vadd.f32 %v4703_v43, %v4591_v51 }
 0x605   : > { %v4737_v27 = vadd.f32 %v5079_v5, %v4704_v6 }
 0x607   : > { %v4769_v49 = vmax.f32 %v4737_v27, 0.0 }
 0x609   : > { %4801 = vst [vmem:[%s7220_s30 + $0xf8] sm:$0xff] %v4769_v49 }
 0x60a   : > { %5197 = shalt.err (!%p5194_p10)
}
 0x60b   : > { %s5247_s8 = smov 128   ;;  %s5248_s27 = smov 8  }
 0x60c   : > { %4972 = dma.vmem_to_hbm [thread:$0]  (%p5351_p3), %s4816_s16, 4096, %s4818_s28, %s4803_s22, %s5247_s8, %s5247_s8, %s5248_s27  }
 0x60d PF: > { %s4832_s30 = sand.u32 1, %s5228_s18   ;;  %p7507_p12 = scmp.ge.s32.totalorder %s5240_s21, 2 }
 0x60e   : > { %s4833_s6 = scalar_lea.sflag [#allocation7], %s4832_s30 }
 0x60f   : > { %p4986_p13 = pnand %p7507_p12, %p5314_p6 }
 0x611   : > { %p4987_p0 = pneg %p4986_p13 }
 0x613   : > { %5223 = dma.done.wait (%p4987_p0), %s4833_s6, 4096  }
 0x614   : > { %5225 = vsyncadd (%p4987_p0), %s4833_s6, 4294963200  ;;  %p19_p5 = scmp.ge.s32.totalorder %s5341_s14, 4   ;;  %s7508_s18 = smov %s5232_s19 }
 0x615   : > { %s7509_s19 = smov %s5236_s20  ;;  %s7510_s20 = smov %s5357_s23 }
 0x616   : > { %s7511_s21 = smov %s5341_s14  ;;  %21 = sbr.rel (!%p19_p5) target bundleno = 6 (0x6), region = 111 }
 0x61b   :  { %4839 = vsyncpa [#allocation6], 1 }
 0x61c   :  { %4841 = vsyncpa [#allocation6 + $0x1], 1 }
 0x61d   :  { %4842 = vsyncpa [#allocation9], 1 }
 0x61e   :  { %4843 = vsyncpa [#allocation7], 1 }
 0x61f   :  { %4845 = vsyncpa [#allocation7 + $0x1], 1 }

</bundles_post_ra>
